<compile_context>
chip_gen: v6e
topology: v6e:2x2x1
jax: 0.10.0
libtpu: 0.0.40
codegen_flags: <defaults>
</compile_context>

<pallas_src>
import jax
import jax.numpy as jnp
from jax.experimental import pallas as pl
from jax.experimental.pallas import tpu as pltpu


CHUNK_T = 8  # timesteps per gate-precompute chunk (wrapper pads L to a multiple)


# ----------------------------------------------------------------------------
# Pallas kernel: Linear + fused bidirectional LSTM + (avg, max) time pooling.
# ----------------------------------------------------------------------------
def _fused_bilstm_pool_kernel(x_ref, lens_ref, wlin_ref, blin_ref,
                              winf_ref, binf_ref, winb_ref, binb_ref,
                              wrecf_ref, wrecb_ref,
                              out_ref, xgf_ref, xgb_ref):
    L, bn, Din = x_ref.shape
    H4 = winf_ref.shape[1]
    H = H4 // 4

    lens = lens_ref[...]                       # [bn, 1] int32 true lengths (>= 1)
    t0 = L - lens                              # [bn, 1] first valid bwd kernel step (hoisted)

    # Resident weights, loaded once.
    wlin = wlin_ref[...]
    blin = blin_ref[...]
    winf = winf_ref[...]
    binf = binf_ref[...]
    winb = winb_ref[...]
    binb = binb_ref[...]
    wrecf = wrecf_ref[...]
    wrecb = wrecb_ref[...]

    # Backward-gate clamp for padded timesteps: i -> -30 (sigmoid ~ 0),
    # f -> +30 (sigmoid ~ 1); o, g untouched (irrelevant while c, h stay ~0).
    # This freezes the backward state through the padded prefix so the valid
    # part of the reversed sequence starts from (h, c) ~ (0, 0).
    col = jax.lax.broadcasted_iota(jnp.int32, (1, H4), 1)
    is_if_col = col < 2 * H
    clamp_val = jnp.where(col < H, jnp.float32(-30.0),
                          jnp.where(is_if_col, jnp.float32(30.0), jnp.float32(0.0)))

    # ---- chunked precompute: Linear + input gates for BOTH directions -------
    # Dropout(p=0.0) == identity.
    # TODO(synk): dropout > 0 (training-mode mask) is not modeled.
    for c in range(L // CHUNK_T):              # static Python loop
        base = c * CHUNK_T
        xc = x_ref[pl.ds(base, CHUNK_T)].reshape(CHUNK_T * bn, Din)        # bf16
        xp = jnp.dot(xc, wlin, preferred_element_type=jnp.float32) + blin  # [T*bn, P] f32
        xpb = xp.astype(jnp.bfloat16)
        gf = (jnp.dot(xpb, winf, preferred_element_type=jnp.float32)
              + binf).reshape(CHUNK_T, bn, H4)
        gb = (jnp.dot(xpb, winb, preferred_element_type=jnp.float32)
              + binb).reshape(CHUNK_T, bn, H4)
        # Forward gates: natural time order, one contiguous bf16 slab store.
        xgf_ref[pl.ds(base, CHUNK_T)] = gf.astype(jnp.bfloat16)
        # Backward gates: time-reversed, with i/f clamped on padded timesteps.
        for l in range(CHUNK_T):
            t = base + l                                   # real timestep
            padded = t >= lens                             # [bn, 1] bool
            row = jnp.where(padded & is_if_col, clamp_val, gb[l])
            xgb_ref[L - 1 - t] = row.astype(jnp.bfloat16)

    # ---- bidirectional LSTM recurrence with on-the-fly masked pooling -------
    def step(t, carry):
        h_f, c_f, h_b, c_b, sum_f, sum_b, max_f, max_b = carry   # each [bn, H] f32
        # Gate layout per direction: [i | f | o | g], each H wide.
        g_fw = xgf_ref[t] + jnp.dot(h_f.astype(jnp.bfloat16), wrecf,
                                    preferred_element_type=jnp.float32)
        g_bw = xgb_ref[t] + jnp.dot(h_b.astype(jnp.bfloat16), wrecb,
                                    preferred_element_type=jnp.float32)
        sig_f = jax.nn.sigmoid(g_fw[:, :3 * H])          # contiguous i|f|o slab
        sig_b = jax.nn.sigmoid(g_bw[:, :3 * H])
        i_f, f_f, o_f = sig_f[:, :H], sig_f[:, H:2 * H], sig_f[:, 2 * H:]
        i_b, f_b, o_b = sig_b[:, :H], sig_b[:, H:2 * H], sig_b[:, 2 * H:]
        gg_f = jnp.tanh(g_fw[:, 3 * H:])
        gg_b = jnp.tanh(g_bw[:, 3 * H:])
        c_f = f_f * c_f + i_f * gg_f
        c_b = f_b * c_b + i_b * gg_b
        h_f = o_f * jnp.tanh(c_f)
        h_b = o_b * jnp.tanh(c_b)
        # Only the pooled sum/max are masked; h/c run free (fwd tail never
        # reaches the output, bwd prefix is frozen by the gate clamp).
        v_f = t < lens                                   # [bn, 1]
        v_b = t >= t0                                    # [bn, 1]
        sum_f = sum_f + jnp.where(v_f, h_f, 0.0)
        sum_b = sum_b + jnp.where(v_b, h_b, 0.0)
        max_f = jnp.maximum(max_f, jnp.where(v_f, h_f, -jnp.inf))
        max_b = jnp.maximum(max_b, jnp.where(v_b, h_b, -jnp.inf))
        return h_f, c_f, h_b, c_b, sum_f, sum_b, max_f, max_b

    z = jnp.zeros((bn, H), jnp.float32)
    ninf = jnp.full((bn, H), -jnp.inf, jnp.float32)
    init = (z, z, z, z, z, z, ninf, ninf)
    # Partial unroll keeps scheduler visibility without blowing vreg pressure at long L.
    carry = jax.lax.fori_loop(0, L, step, init, unroll=max(1, min(L, 8)))
    _, _, _, _, sum_f, sum_b, max_f, max_b = carry

    inv_len = 1.0 / lens.astype(jnp.float32)             # per-sequence 1/true_L
    avg = jnp.concatenate([sum_f, sum_b], axis=-1) * inv_len
    mx = jnp.concatenate([max_f, max_b], axis=-1)
    # PoolingLayer output layout: [avg_f | avg_b | max_f | max_b] -> lane-dense [bn, 4H].
    out_ref[...] = jnp.concatenate([avg, mx], axis=-1)


# ----------------------------------------------------------------------------
# Wrappers
# ----------------------------------------------------------------------------
def _round_up(a, b):
    return (a + b - 1) // b * b


def _pad_time_major(x, L):
    """[B, l, D] -> time-major [L, B, D] bf16, zero-padded along time."""
    x = jnp.transpose(x, (1, 0, 2)).astype(jnp.bfloat16)
    l = x.shape[0]
    if l < L:
        x = jnp.concatenate(
            [x, jnp.zeros((L - l,) + x.shape[1:], jnp.bfloat16)], axis=0)
    return x


def inference_composition_layer(m_p, m_h, kparams):
    """m_p: [B, Lp, Din], m_h: [B, Lh, Din] -> [B, 8H]."""
    B, Lp_true, Din = m_p.shape
    _, Lh_true, _ = m_h.shape
    H = kparams["w_rec_f"].shape[0]
    P = kparams["wlin"].shape[1]

    L = _round_up(max(Lp_true, Lh_true), CHUNK_T)   # common padded length
    N = 2 * B                                       # merged batch (m_p rows, then m_h rows)

    # Batch tile size: multiple of 16 (bf16 sublane packing), capped by a VMEM
    # budget for the batch-scaled buffers and by 256 rows per tile.
    per_row_bytes = L * (8 * H * 2 + Din * 4) + CHUNK_T * (P * 6 + 8 * H * 4)
    bn_cap = max(16, ((20 << 20) // max(per_row_bytes, 1)) // 16 * 16)
    bn = max(16, min(_round_up(N, 16), 256, bn_cap))
    Np = _round_up(N, bn)
    grid = (Np // bn,)

    # Merge the two composition/pooling passes into one kernel call: pad to a
    # common length, stack along batch, pass true lengths for masking.  Batch
    # padding rows get lens=1 (avoids inf/-inf) and are dropped afterwards.
    x_all = jnp.concatenate(
        [_pad_time_major(m_p, L), _pad_time_major(m_h, L)], axis=1)
    lens_parts = [jnp.full((B, 1), Lp_true, jnp.int32),
                  jnp.full((B, 1), Lh_true, jnp.int32)]
    if Np > N:
        x_all = jnp.concatenate(
            [x_all, jnp.zeros((L, Np - N, Din), jnp.bfloat16)], axis=1)
        lens_parts.append(jnp.ones((Np - N, 1), jnp.int32))
    lens = jnp.concatenate(lens_parts, axis=0)

    def _full(a):
        return pl.BlockSpec(a.shape, lambda i, _nd=a.ndim: (0,) * _nd)

    kp = kparams
    # VMEM budget from actual buffer sizes (scratches, double-buffered blocks,
    # resident weights, chunk temporaries, recurrence carries) + headroom.
    vmem_needed = (
        2 * L * bn * 4 * H * 2                 # xgf + xgb scratches (bf16)
        + 2 * L * bn * Din * 2                 # x block, double-buffered (bf16)
        + 2 * bn * 4 * H * 4                   # out block, double-buffered (f32)
        + (Din * P + 2 * P * 4 * H + 2 * H * 4 * H) * 2 + (P + 8 * H) * 4
        + CHUNK_T * bn * (Din * 2 + P * 6 + 8 * H * 4)   # chunk temporaries
        + bn * H * 8 * 4 * 2)                  # recurrence carries / temps
    vmem_limit = int(min(128 << 20, max(32 << 20, int(vmem_needed * 1.5) + (4 << 20))))

    pooled = pl.pallas_call(
        _fused_bilstm_pool_kernel,
        out_shape=jax.ShapeDtypeStruct((Np, 4 * H), jnp.float32),
        grid=grid,
        in_specs=[
            pl.BlockSpec((L, bn, Din), lambda i: (0, i, 0)),   # x (batch-tiled)
            pl.BlockSpec((bn, 1), lambda i: (i, 0)),           # lens
            _full(kp["wlin"]), _full(kp["blin"]),
            _full(kp["w_in_f"]), _full(kp["b_in_f"]),
            _full(kp["w_in_b"]), _full(kp["b_in_b"]),
            _full(kp["w_rec_f"]), _full(kp["w_rec_b"]),
        ],
        out_specs=pl.BlockSpec((bn, 4 * H), lambda i: (i, 0)),
        scratch_shapes=[pltpu.VMEM((L, bn, 4 * H), jnp.bfloat16),   # fwd gates
                        pltpu.VMEM((L, bn, 4 * H), jnp.bfloat16)],  # bwd gates (time-reversed)
        compiler_params=pltpu.CompilerParams(
            dimension_semantics=("parallel",),
            vmem_limit_bytes=vmem_limit),
    )(x_all, lens, kp["wlin"], kp["blin"], kp["w_in_f"], kp["b_in_f"],
      kp["w_in_b"], kp["b_in_b"], kp["w_rec_f"], kp["w_rec_b"])

    # cat(pool(m_p), pool(m_h)) along the feature axis -> [B, 8H].
    return jnp.concatenate([pooled[:B], pooled[B:2 * B]], axis=1)


# ----------------------------------------------------------------------------
# Parameters: PyTorch-layout init + packing into the kernel's fused layout.
# ----------------------------------------------------------------------------
def init_params(key, input_size, output_size, hidden_size):
    """Deterministic synthetic parameters in native PyTorch layout."""
    P, H = hidden_size, output_size   # Linear out dim / LSTM hidden dim (ctor swap)
    ks = jax.random.split(key, 10)
    u = lambda k, shape, s: jax.random.uniform(k, shape, jnp.float32, -s, s)
    sl = 1.0 / (input_size ** 0.5)
    sh = 1.0 / (H ** 0.5)
    return dict(
        lin_w=u(ks[0], (P, input_size), sl), lin_b=u(ks[1], (P,), sl),
        w_ih_f=u(ks[2], (4 * H, P), sh), w_hh_f=u(ks[3], (4 * H, H), sh),
        b_ih_f=u(ks[4], (4 * H,), sh), b_hh_f=u(ks[5], (4 * H,), sh),
        w_ih_b=u(ks[6], (4 * H, P), sh), w_hh_b=u(ks[7], (4 * H, H), sh),
        b_ih_b=u(ks[8], (4 * H,), sh), b_hh_b=u(ks[9], (4 * H,), sh),
    )


def _reorder_ifgo_to_ifog(w):
    """Reorder the last (4H) axis from PyTorch (i,f,g,o) to (i,f,o,g)."""
    H = w.shape[-1] // 4
    return jnp.concatenate([w[..., :2 * H], w[..., 3 * H:], w[..., 2 * H:3 * H]], axis=-1)


def pack_params(p):
    """Pack PyTorch-layout params into the kernel's per-direction bf16 layout."""
    return dict(
        wlin=p["lin_w"].T.astype(jnp.bfloat16),                               # [Din, P]
        blin=p["lin_b"][None, :].astype(jnp.float32),                         # [1, P]
        w_in_f=_reorder_ifgo_to_ifog(p["w_ih_f"].T).astype(jnp.bfloat16),     # [P, 4H]
        b_in_f=_reorder_ifgo_to_ifog((p["b_ih_f"] + p["b_hh_f"])[None, :]).astype(jnp.float32),
        w_in_b=_reorder_ifgo_to_ifog(p["w_ih_b"].T).astype(jnp.bfloat16),     # [P, 4H]
        b_in_b=_reorder_ifgo_to_ifog((p["b_ih_b"] + p["b_hh_b"])[None, :]).astype(jnp.float32),
        w_rec_f=_reorder_ifgo_to_ifog(p["w_hh_f"].T).astype(jnp.bfloat16),    # [H, 4H]
        w_rec_b=_reorder_ifgo_to_ifog(p["w_hh_b"].T).astype(jnp.bfloat16),    # [H, 4H]
    )


# ----------------------------------------------------------------------------
# Pure-JAX reference (PyTorch layout / math, all f32) for a correctness check.
# ----------------------------------------------------------------------------
def _reference_composition_pool(x, p):
    H = p["w_hh_f"].shape[-1]
    xp = x @ p["lin_w"].T + p["lin_b"]
    B, L, _ = xp.shape

    def run_dir(w_ih, w_hh, b_ih, b_hh, reverse):
        xg = xp @ w_ih.T + (b_ih + b_hh)
        h = jnp.zeros((B, H), jnp.float32)
        c = jnp.zeros((B, H), jnp.float32)
        hs = []
        order = range(L - 1, -1, -1) if reverse else range(L)
        for t in order:
            gates = xg[:, t] + h @ w_hh.T
            i = jax.nn.sigmoid(gates[:, :H])
            f = jax.nn.sigmoid(gates[:, H:2 * H])
            g = jnp.tanh(gates[:, 2 * H:3 * H])
            o = jax.nn.sigmoid(gates[:, 3 * H:])
            c = f * c + i * g
            h = o * jnp.tanh(c)
            hs.append(h)
        if reverse:
            hs = hs[::-1]
        return jnp.stack(hs, axis=1)

    hf = run_dir(p["w_ih_f"], p["w_hh_f"], p["b_ih_f"], p["b_hh_f"], False)
    hb = run_dir(p["w_ih_b"], p["w_hh_b"], p["b_ih_b"], p["b_hh_b"], True)
    y = jnp.concatenate([hf, hb], axis=-1)
    v_ave = y.sum(1) / y.shape[1]
    v_max = y.max(1)
    return jnp.concatenate([v_ave, v_max], axis=-1)


def reference_forward(m_p, m_h, p):
    return jnp.concatenate([_reference_composition_pool(m_p, p),
                            _reference_composition_pool(m_h, p)], axis=1)


# ----------------------------------------------------------------------------
if __name__ == "__main__":
    key = jax.random.PRNGKey(0)
    B, Lp, Lh = 2, 8, 6
    input_size, output_size, hidden_size = 32, 32, 32   # ICL(input, output, hidden)

    kp_key, kh_key, kw_key = jax.random.split(key, 3)
    m_p = jax.random.normal(kp_key, (B, Lp, input_size), jnp.float32)
    m_h = jax.random.normal(kh_key, (B, Lh, input_size), jnp.float32)
    params = init_params(kw_key, input_size, output_size, hidden_size)
    kparams = pack_params(params)

    out = jax.jit(inference_composition_layer)(m_p, m_h, kparams)
    out = jax.block_until_ready(out)
    assert out.shape == (B, 8 * output_size), out.shape

    ref = reference_forward(m_p, m_h, params)
    err = float(jnp.max(jnp.abs(out - ref)))
    # bf16 MXU operands / bf16 gate scratch (f32 accumulation + f32 activations).
    assert err < 3e-2, f"max abs error too large: {err}"
    print("KERNEL_OK")
</pallas_src>

<mosaic_0001>
module attributes {stable_mosaic.version = 11 : i64} {
  func.func @_fused_bilstm_pool_kernel(%arg0: i32, %arg1: memref<8x16x32xbf16, #tpu.memory_space<vmem>>, %arg2: memref<16x1xi32, #tpu.memory_space<vmem>>, %arg3: memref<32x32xbf16, #tpu.memory_space<vmem>>, %arg4: memref<1x32xf32, #tpu.memory_space<vmem>>, %arg5: memref<32x128xbf16, #tpu.memory_space<vmem>>, %arg6: memref<1x128xf32, #tpu.memory_space<vmem>>, %arg7: memref<32x128xbf16, #tpu.memory_space<vmem>>, %arg8: memref<1x128xf32, #tpu.memory_space<vmem>>, %arg9: memref<32x128xbf16, #tpu.memory_space<vmem>>, %arg10: memref<32x128xbf16, #tpu.memory_space<vmem>>, %arg11: memref<16x128xf32, #tpu.memory_space<vmem>>, %arg12: memref<8x16x128xbf16, #tpu.memory_space<vmem>>, %arg13: memref<8x16x128xbf16, #tpu.memory_space<vmem>>) attributes {dimension_semantics = [#tpu.dimension_semantics<parallel>], iteration_bounds = array<i64: 1>, scalar_prefetch = 0 : i64, scratch_operands = 2 : i64, tpu.core_type = #tpu.core_type<tc>, window_params = [{transform_indices = @transform_0, window_bounds = array<i64: 8, 16, 32>}, {transform_indices = @transform_1, window_bounds = array<i64: 16, 1>}, {pipeline_mode = #tpu.pipeline_mode<synchronous>, transform_indices = @transform_2, window_bounds = array<i64: 32, 32>}, {pipeline_mode = #tpu.pipeline_mode<synchronous>, transform_indices = @transform_3, window_bounds = array<i64: 1, 32>}, {pipeline_mode = #tpu.pipeline_mode<synchronous>, transform_indices = @transform_4, window_bounds = array<i64: 32, 128>}, {pipeline_mode = #tpu.pipeline_mode<synchronous>, transform_indices = @transform_5, window_bounds = array<i64: 1, 128>}, {pipeline_mode = #tpu.pipeline_mode<synchronous>, transform_indices = @transform_6, window_bounds = array<i64: 32, 128>}, {pipeline_mode = #tpu.pipeline_mode<synchronous>, transform_indices = @transform_7, window_bounds = array<i64: 1, 128>}, {pipeline_mode = #tpu.pipeline_mode<synchronous>, transform_indices = @transform_8, window_bounds = array<i64: 32, 128>}, {pipeline_mode = #tpu.pipeline_mode<synchronous>, transform_indices = @transform_9, window_bounds = array<i64: 32, 128>}, {transform_indices = @transform_10, window_bounds = array<i64: 16, 128>}]} {
    %c0 = arith.constant 0 : index
    %c0_0 = arith.constant 0 : index
    %0 = vector.load %arg2[%c0, %c0_0] : memref<16x1xi32, #tpu.memory_space<vmem>>, vector<16x1xi32>
    %c8_i32 = arith.constant 8 : i32
    %1 = vector.broadcast %c8_i32 : i32 to vector<16x1xi32>
    %2 = arith.subi %1, %0 : vector<16x1xi32>
    %c0_1 = arith.constant 0 : index
    %c0_2 = arith.constant 0 : index
    %3 = vector.load %arg3[%c0_1, %c0_2] : memref<32x32xbf16, #tpu.memory_space<vmem>>, vector<32x32xbf16>
    %c0_3 = arith.constant 0 : index
    %c0_4 = arith.constant 0 : index
    %4 = vector.load %arg4[%c0_3, %c0_4] : memref<1x32xf32, #tpu.memory_space<vmem>>, vector<1x32xf32>
    %c0_5 = arith.constant 0 : index
    %c0_6 = arith.constant 0 : index
    %5 = vector.load %arg5[%c0_5, %c0_6] : memref<32x128xbf16, #tpu.memory_space<vmem>>, vector<32x128xbf16>
    %c0_7 = arith.constant 0 : index
    %c0_8 = arith.constant 0 : index
    %6 = vector.load %arg6[%c0_7, %c0_8] : memref<1x128xf32, #tpu.memory_space<vmem>>, vector<1x128xf32>
    %c0_9 = arith.constant 0 : index
    %c0_10 = arith.constant 0 : index
    %7 = vector.load %arg7[%c0_9, %c0_10] : memref<32x128xbf16, #tpu.memory_space<vmem>>, vector<32x128xbf16>
    %c0_11 = arith.constant 0 : index
    %c0_12 = arith.constant 0 : index
    %8 = vector.load %arg8[%c0_11, %c0_12] : memref<1x128xf32, #tpu.memory_space<vmem>>, vector<1x128xf32>
    %c0_13 = arith.constant 0 : index
    %c0_14 = arith.constant 0 : index
    %9 = vector.load %arg9[%c0_13, %c0_14] : memref<32x128xbf16, #tpu.memory_space<vmem>>, vector<32x128xbf16>
    %c0_15 = arith.constant 0 : index
    %c0_16 = arith.constant 0 : index
    %10 = vector.load %arg10[%c0_15, %c0_16] : memref<32x128xbf16, #tpu.memory_space<vmem>>, vector<32x128xbf16>
    %11 = tpu.iota {dimensions = array<i32: 1>} : vector<1x128xi32>
    %c64_i32 = arith.constant 64 : i32
    %12 = vector.broadcast %c64_i32 : i32 to vector<1x128xi32>
    %13 = arith.cmpi slt, %11, %12 : vector<1x128xi32>
    %c32_i32 = arith.constant 32 : i32
    %14 = vector.broadcast %c32_i32 : i32 to vector<1x128xi32>
    %15 = arith.cmpi slt, %11, %14 : vector<1x128xi32>
    %cst = arith.constant 3.000000e+01 : f32
    %cst_17 = arith.constant 0.000000e+00 : f32
    %16 = vector.broadcast %cst : f32 to vector<1x128xf32>
    %17 = vector.broadcast %cst_17 : f32 to vector<1x128xf32>
    %18 = arith.select %13, %16, %17 : vector<1x128xi1>, vector<1x128xf32>
    %cst_18 = arith.constant -3.000000e+01 : f32
    %19 = vector.broadcast %cst_18 : f32 to vector<1x128xf32>
    %20 = arith.select %15, %19, %18 : vector<1x128xi1>, vector<1x128xf32>
    %c0_19 = arith.constant 0 : index
    %c0_20 = arith.constant 0 : index
    %c0_21 = arith.constant 0 : index
    %21 = vector.load %arg1[%c0_19, %c0_20, %c0_21] : memref<8x16x32xbf16, #tpu.memory_space<vmem>>, vector<8x16x32xbf16>
    %22 = vector.shape_cast %21 : vector<8x16x32xbf16> to vector<128x32xbf16>
    %cst_22 = arith.constant dense<0.000000e+00> : vector<128x32xf32>
    %23 = tpu.matmul %22, %3, %cst_22 {dimension_numbers = #tpu.dot_dimension_numbers<[1], [0], [0], [1], [0, 0, 1, 1], [], []>} : vector<128x32xbf16>, vector<32x32xbf16>, vector<128x32xf32> -> vector<128x32xf32>
    %24 = vector.broadcast %4 : vector<1x32xf32> to vector<128x32xf32>
    %25 = arith.addf %23, %24 : vector<128x32xf32>
    %26 = arith.truncf %25 : vector<128x32xf32> to vector<128x32xbf16>
    %cst_23 = arith.constant dense<0.000000e+00> : vector<128x128xf32>
    %27 = tpu.matmul %26, %5, %cst_23 {dimension_numbers = #tpu.dot_dimension_numbers<[1], [0], [0], [1], [0, 0, 1, 1], [], []>} : vector<128x32xbf16>, vector<32x128xbf16>, vector<128x128xf32> -> vector<128x128xf32>
    %28 = vector.broadcast %6 : vector<1x128xf32> to vector<128x128xf32>
    %29 = arith.addf %27, %28 : vector<128x128xf32>
    %30 = vector.shape_cast %29 : vector<128x128xf32> to vector<8x16x128xf32>
    %cst_24 = arith.constant dense<0.000000e+00> : vector<128x128xf32>
    %31 = tpu.matmul %26, %7, %cst_24 {dimension_numbers = #tpu.dot_dimension_numbers<[1], [0], [0], [1], [0, 0, 1, 1], [], []>} : vector<128x32xbf16>, vector<32x128xbf16>, vector<128x128xf32> -> vector<128x128xf32>
    %32 = vector.broadcast %8 : vector<1x128xf32> to vector<128x128xf32>
    %33 = arith.addf %31, %32 : vector<128x128xf32>
    %34 = vector.shape_cast %33 : vector<128x128xf32> to vector<8x16x128xf32>
    %35 = arith.truncf %30 : vector<8x16x128xf32> to vector<8x16x128xbf16>
    %c0_25 = arith.constant 0 : index
    %c0_26 = arith.constant 0 : index
    %c0_27 = arith.constant 0 : index
    %36 = vector.load %arg12[%c0_25, %c0_26, %c0_27] : memref<8x16x128xbf16, #tpu.memory_space<vmem>>, vector<8x16x128xbf16>
    tpu.vector_store %arg12[%c0_25, %c0_26, %c0_27], %35 {strides = array<i32>} : memref<8x16x128xbf16, #tpu.memory_space<vmem>>, vector<8x16x128xbf16>,
    %c0_i32 = arith.constant 0 : i32
    %37 = vector.broadcast %c0_i32 : i32 to vector<16x1xi32>
    %38 = arith.cmpi sle, %0, %37 : vector<16x1xi32>
    %39 = vector.broadcast %38 : vector<16x1xi1> to vector<16x128xi1>
    %40 = vector.broadcast %13 : vector<1x128xi1> to vector<16x128xi1>
    %41 = arith.andi %39, %40 : vector<16x128xi1>
    %42 = vector.extract_strided_slice %34 {offsets = [0, 0, 0], sizes = [1, 16, 128], strides = [1, 1, 1]} : vector<8x16x128xf32> to vector<1x16x128xf32>
    %43 = vector.shape_cast %42 : vector<1x16x128xf32> to vector<16x128xf32>
    %44 = vector.shape_cast %20 : vector<1x128xf32> to vector<1x128xf32>
    %45 = vector.broadcast %44 : vector<1x128xf32> to vector<16x128xf32>
    %46 = arith.select %41, %45, %43 : vector<16x128xi1>, vector<16x128xf32>
    %47 = arith.truncf %46 : vector<16x128xf32> to vector<16x128xbf16>
    %c7 = arith.constant 7 : index
    %c0_28 = arith.constant 0 : index
    %c0_29 = arith.constant 0 : index
    %48 = vector.load %arg13[%c7, %c0_28, %c0_29] : memref<8x16x128xbf16, #tpu.memory_space<vmem>>, vector<1x16x128xbf16>
    %49 = vector.shape_cast %48 : vector<1x16x128xbf16> to vector<16x128xbf16>
    %50 = vector.shape_cast %47 : vector<16x128xbf16> to vector<1x16x128xbf16>
    tpu.vector_store %arg13[%c7, %c0_28, %c0_29], %50 {strides = array<i32>} : memref<8x16x128xbf16, #tpu.memory_space<vmem>>, vector<1x16x128xbf16>,
    %c1_i32 = arith.constant 1 : i32
    %51 = vector.broadcast %c1_i32 : i32 to vector<16x1xi32>
    %52 = arith.cmpi sle, %0, %51 : vector<16x1xi32>
    %53 = vector.broadcast %52 : vector<16x1xi1> to vector<16x128xi1>
    %54 = vector.broadcast %13 : vector<1x128xi1> to vector<16x128xi1>
    %55 = arith.andi %53, %54 : vector<16x128xi1>
    %56 = vector.extract_strided_slice %34 {offsets = [1, 0, 0], sizes = [1, 16, 128], strides = [1, 1, 1]} : vector<8x16x128xf32> to vector<1x16x128xf32>
    %57 = vector.shape_cast %56 : vector<1x16x128xf32> to vector<16x128xf32>
    %58 = vector.shape_cast %20 : vector<1x128xf32> to vector<1x128xf32>
    %59 = vector.broadcast %58 : vector<1x128xf32> to vector<16x128xf32>
    %60 = arith.select %55, %59, %57 : vector<16x128xi1>, vector<16x128xf32>
    %61 = arith.truncf %60 : vector<16x128xf32> to vector<16x128xbf16>
    %c6 = arith.constant 6 : index
    %c0_30 = arith.constant 0 : index
    %c0_31 = arith.constant 0 : index
    %62 = vector.load %arg13[%c6, %c0_30, %c0_31] : memref<8x16x128xbf16, #tpu.memory_space<vmem>>, vector<1x16x128xbf16>
    %63 = vector.shape_cast %62 : vector<1x16x128xbf16> to vector<16x128xbf16>
    %64 = vector.shape_cast %61 : vector<16x128xbf16> to vector<1x16x128xbf16>
    tpu.vector_store %arg13[%c6, %c0_30, %c0_31], %64 {strides = array<i32>} : memref<8x16x128xbf16, #tpu.memory_space<vmem>>, vector<1x16x128xbf16>,
    %c2_i32 = arith.constant 2 : i32
    %65 = vector.broadcast %c2_i32 : i32 to vector<16x1xi32>
    %66 = arith.cmpi sle, %0, %65 : vector<16x1xi32>
    %67 = vector.broadcast %66 : vector<16x1xi1> to vector<16x128xi1>
    %68 = vector.broadcast %13 : vector<1x128xi1> to vector<16x128xi1>
    %69 = arith.andi %67, %68 : vector<16x128xi1>
    %70 = vector.extract_strided_slice %34 {offsets = [2, 0, 0], sizes = [1, 16, 128], strides = [1, 1, 1]} : vector<8x16x128xf32> to vector<1x16x128xf32>
    %71 = vector.shape_cast %70 : vector<1x16x128xf32> to vector<16x128xf32>
    %72 = vector.shape_cast %20 : vector<1x128xf32> to vector<1x128xf32>
    %73 = vector.broadcast %72 : vector<1x128xf32> to vector<16x128xf32>
    %74 = arith.select %69, %73, %71 : vector<16x128xi1>, vector<16x128xf32>
    %75 = arith.truncf %74 : vector<16x128xf32> to vector<16x128xbf16>
    %c5 = arith.constant 5 : index
    %c0_32 = arith.constant 0 : index
    %c0_33 = arith.constant 0 : index
    %76 = vector.load %arg13[%c5, %c0_32, %c0_33] : memref<8x16x128xbf16, #tpu.memory_space<vmem>>, vector<1x16x128xbf16>
    %77 = vector.shape_cast %76 : vector<1x16x128xbf16> to vector<16x128xbf16>
    %78 = vector.shape_cast %75 : vector<16x128xbf16> to vector<1x16x128xbf16>
    tpu.vector_store %arg13[%c5, %c0_32, %c0_33], %78 {strides = array<i32>} : memref<8x16x128xbf16, #tpu.memory_space<vmem>>, vector<1x16x128xbf16>,
    %c3_i32 = arith.constant 3 : i32
    %79 = vector.broadcast %c3_i32 : i32 to vector<16x1xi32>
    %80 = arith.cmpi sle, %0, %79 : vector<16x1xi32>
    %81 = vector.broadcast %80 : vector<16x1xi1> to vector<16x128xi1>
    %82 = vector.broadcast %13 : vector<1x128xi1> to vector<16x128xi1>
    %83 = arith.andi %81, %82 : vector<16x128xi1>
    %84 = vector.extract_strided_slice %34 {offsets = [3, 0, 0], sizes = [1, 16, 128], strides = [1, 1, 1]} : vector<8x16x128xf32> to vector<1x16x128xf32>
    %85 = vector.shape_cast %84 : vector<1x16x128xf32> to vector<16x128xf32>
    %86 = vector.shape_cast %20 : vector<1x128xf32> to vector<1x128xf32>
    %87 = vector.broadcast %86 : vector<1x128xf32> to vector<16x128xf32>
    %88 = arith.select %83, %87, %85 : vector<16x128xi1>, vector<16x128xf32>
    %89 = arith.truncf %88 : vector<16x128xf32> to vector<16x128xbf16>
    %c4 = arith.constant 4 : index
    %c0_34 = arith.constant 0 : index
    %c0_35 = arith.constant 0 : index
    %90 = vector.load %arg13[%c4, %c0_34, %c0_35] : memref<8x16x128xbf16, #tpu.memory_space<vmem>>, vector<1x16x128xbf16>
    %91 = vector.shape_cast %90 : vector<1x16x128xbf16> to vector<16x128xbf16>
    %92 = vector.shape_cast %89 : vector<16x128xbf16> to vector<1x16x128xbf16>
    tpu.vector_store %arg13[%c4, %c0_34, %c0_35], %92 {strides = array<i32>} : memref<8x16x128xbf16, #tpu.memory_space<vmem>>, vector<1x16x128xbf16>,
    %c4_i32 = arith.constant 4 : i32
    %93 = vector.broadcast %c4_i32 : i32 to vector<16x1xi32>
    %94 = arith.cmpi sle, %0, %93 : vector<16x1xi32>
    %95 = vector.broadcast %94 : vector<16x1xi1> to vector<16x128xi1>
    %96 = vector.broadcast %13 : vector<1x128xi1> to vector<16x128xi1>
    %97 = arith.andi %95, %96 : vector<16x128xi1>
    %98 = vector.extract_strided_slice %34 {offsets = [4, 0, 0], sizes = [1, 16, 128], strides = [1, 1, 1]} : vector<8x16x128xf32> to vector<1x16x128xf32>
    %99 = vector.shape_cast %98 : vector<1x16x128xf32> to vector<16x128xf32>
    %100 = vector.shape_cast %20 : vector<1x128xf32> to vector<1x128xf32>
    %101 = vector.broadcast %100 : vector<1x128xf32> to vector<16x128xf32>
    %102 = arith.select %97, %101, %99 : vector<16x128xi1>, vector<16x128xf32>
    %103 = arith.truncf %102 : vector<16x128xf32> to vector<16x128xbf16>
    %c3 = arith.constant 3 : index
    %c0_36 = arith.constant 0 : index
    %c0_37 = arith.constant 0 : index
    %104 = vector.load %arg13[%c3, %c0_36, %c0_37] : memref<8x16x128xbf16, #tpu.memory_space<vmem>>, vector<1x16x128xbf16>
    %105 = vector.shape_cast %104 : vector<1x16x128xbf16> to vector<16x128xbf16>
    %106 = vector.shape_cast %103 : vector<16x128xbf16> to vector<1x16x128xbf16>
    tpu.vector_store %arg13[%c3, %c0_36, %c0_37], %106 {strides = array<i32>} : memref<8x16x128xbf16, #tpu.memory_space<vmem>>, vector<1x16x128xbf16>,
    %c5_i32 = arith.constant 5 : i32
    %107 = vector.broadcast %c5_i32 : i32 to vector<16x1xi32>
    %108 = arith.cmpi sle, %0, %107 : vector<16x1xi32>
    %109 = vector.broadcast %108 : vector<16x1xi1> to vector<16x128xi1>
    %110 = vector.broadcast %13 : vector<1x128xi1> to vector<16x128xi1>
    %111 = arith.andi %109, %110 : vector<16x128xi1>
    %112 = vector.extract_strided_slice %34 {offsets = [5, 0, 0], sizes = [1, 16, 128], strides = [1, 1, 1]} : vector<8x16x128xf32> to vector<1x16x128xf32>
    %113 = vector.shape_cast %112 : vector<1x16x128xf32> to vector<16x128xf32>
    %114 = vector.shape_cast %20 : vector<1x128xf32> to vector<1x128xf32>
    %115 = vector.broadcast %114 : vector<1x128xf32> to vector<16x128xf32>
    %116 = arith.select %111, %115, %113 : vector<16x128xi1>, vector<16x128xf32>
    %117 = arith.truncf %116 : vector<16x128xf32> to vector<16x128xbf16>
    %c2 = arith.constant 2 : index
    %c0_38 = arith.constant 0 : index
    %c0_39 = arith.constant 0 : index
    %118 = vector.load %arg13[%c2, %c0_38, %c0_39] : memref<8x16x128xbf16, #tpu.memory_space<vmem>>, vector<1x16x128xbf16>
    %119 = vector.shape_cast %118 : vector<1x16x128xbf16> to vector<16x128xbf16>
    %120 = vector.shape_cast %117 : vector<16x128xbf16> to vector<1x16x128xbf16>
    tpu.vector_store %arg13[%c2, %c0_38, %c0_39], %120 {strides = array<i32>} : memref<8x16x128xbf16, #tpu.memory_space<vmem>>, vector<1x16x128xbf16>,
    %c6_i32 = arith.constant 6 : i32
    %121 = vector.broadcast %c6_i32 : i32 to vector<16x1xi32>
    %122 = arith.cmpi sle, %0, %121 : vector<16x1xi32>
    %123 = vector.broadcast %122 : vector<16x1xi1> to vector<16x128xi1>
    %124 = vector.broadcast %13 : vector<1x128xi1> to vector<16x128xi1>
    %125 = arith.andi %123, %124 : vector<16x128xi1>
    %126 = vector.extract_strided_slice %34 {offsets = [6, 0, 0], sizes = [1, 16, 128], strides = [1, 1, 1]} : vector<8x16x128xf32> to vector<1x16x128xf32>
    %127 = vector.shape_cast %126 : vector<1x16x128xf32> to vector<16x128xf32>
    %128 = vector.shape_cast %20 : vector<1x128xf32> to vector<1x128xf32>
    %129 = vector.broadcast %128 : vector<1x128xf32> to vector<16x128xf32>
    %130 = arith.select %125, %129, %127 : vector<16x128xi1>, vector<16x128xf32>
    %131 = arith.truncf %130 : vector<16x128xf32> to vector<16x128xbf16>
    %c1 = arith.constant 1 : index
    %c0_40 = arith.constant 0 : index
    %c0_41 = arith.constant 0 : index
    %132 = vector.load %arg13[%c1, %c0_40, %c0_41] : memref<8x16x128xbf16, #tpu.memory_space<vmem>>, vector<1x16x128xbf16>
    %133 = vector.shape_cast %132 : vector<1x16x128xbf16> to vector<16x128xbf16>
    %134 = vector.shape_cast %131 : vector<16x128xbf16> to vector<1x16x128xbf16>
    tpu.vector_store %arg13[%c1, %c0_40, %c0_41], %134 {strides = array<i32>} : memref<8x16x128xbf16, #tpu.memory_space<vmem>>, vector<1x16x128xbf16>,
    %c7_i32 = arith.constant 7 : i32
    %135 = vector.broadcast %c7_i32 : i32 to vector<16x1xi32>
    %136 = arith.cmpi sle, %0, %135 : vector<16x1xi32>
    %137 = vector.broadcast %136 : vector<16x1xi1> to vector<16x128xi1>
    %138 = vector.broadcast %13 : vector<1x128xi1> to vector<16x128xi1>
    %139 = arith.andi %137, %138 : vector<16x128xi1>
    %140 = vector.extract_strided_slice %34 {offsets = [7, 0, 0], sizes = [1, 16, 128], strides = [1, 1, 1]} : vector<8x16x128xf32> to vector<1x16x128xf32>
    %141 = vector.shape_cast %140 : vector<1x16x128xf32> to vector<16x128xf32>
    %142 = vector.shape_cast %20 : vector<1x128xf32> to vector<1x128xf32>
    %143 = vector.broadcast %142 : vector<1x128xf32> to vector<16x128xf32>
    %144 = arith.select %139, %143, %141 : vector<16x128xi1>, vector<16x128xf32>
    %145 = arith.truncf %144 : vector<16x128xf32> to vector<16x128xbf16>
    %c0_42 = arith.constant 0 : index
    %c0_43 = arith.constant 0 : index
    %c0_44 = arith.constant 0 : index
    %146 = vector.load %arg13[%c0_42, %c0_43, %c0_44] : memref<8x16x128xbf16, #tpu.memory_space<vmem>>, vector<1x16x128xbf16>
    %147 = vector.shape_cast %146 : vector<1x16x128xbf16> to vector<16x128xbf16>
    %148 = vector.shape_cast %145 : vector<16x128xbf16> to vector<1x16x128xbf16>
    tpu.vector_store %arg13[%c0_42, %c0_43, %c0_44], %148 {strides = array<i32>} : memref<8x16x128xbf16, #tpu.memory_space<vmem>>, vector<1x16x128xbf16>,
    %cst_45 = arith.constant 0.000000e+00 : f32
    %149 = vector.broadcast %cst_45 : f32 to vector<16x32xf32>
    %cst_46 = arith.constant 0xFF800000 : f32
    %150 = vector.broadcast %cst_46 : f32 to vector<16x32xf32>
    %c0_i32_47 = arith.constant 0 : i32
    %151 = arith.index_cast %c0_i32_47 : i32 to index
    %c0_48 = arith.constant 0 : index
    %c0_49 = arith.constant 0 : index
    %152 = vector.load %arg12[%151, %c0_48, %c0_49] : memref<8x16x128xbf16, #tpu.memory_space<vmem>>, vector<1x16x128xbf16>
    %153 = vector.shape_cast %152 : vector<1x16x128xbf16> to vector<16x128xbf16>
    %154 = arith.truncf %149 : vector<16x32xf32> to vector<16x32xbf16>
    %cst_50 = arith.constant dense<0.000000e+00> : vector<16x128xf32>
    %155 = tpu.matmul %154, %9, %cst_50 {dimension_numbers = #tpu.dot_dimension_numbers<[1], [0], [0], [1], [0, 0, 1, 1], [], []>} : vector<16x32xbf16>, vector<32x128xbf16>, vector<16x128xf32> -> vector<16x128xf32>
    %156 = arith.extf %153 : vector<16x128xbf16> to vector<16x128xf32>
    %157 = arith.addf %156, %155 : vector<16x128xf32>
    %158 = arith.index_cast %c0_i32_47 : i32 to index
    %c0_51 = arith.constant 0 : index
    %c0_52 = arith.constant 0 : index
    %159 = vector.load %arg13[%158, %c0_51, %c0_52] : memref<8x16x128xbf16, #tpu.memory_space<vmem>>, vector<1x16x128xbf16>
    %160 = vector.shape_cast %159 : vector<1x16x128xbf16> to vector<16x128xbf16>
    %161 = arith.truncf %149 : vector<16x32xf32> to vector<16x32xbf16>
    %cst_53 = arith.constant dense<0.000000e+00> : vector<16x128xf32>
    %162 = tpu.matmul %161, %10, %cst_53 {dimension_numbers = #tpu.dot_dimension_numbers<[1], [0], [0], [1], [0, 0, 1, 1], [], []>} : vector<16x32xbf16>, vector<32x128xbf16>, vector<16x128xf32> -> vector<16x128xf32>
    %163 = arith.extf %160 : vector<16x128xbf16> to vector<16x128xf32>
    %164 = arith.addf %163, %162 : vector<16x128xf32>
    %165 = vector.extract_strided_slice %157 {offsets = [0, 0], sizes = [16, 96], strides = [1, 1]} : vector<16x128xf32> to vector<16x96xf32>
    %166 = arith.negf %165 : vector<16x96xf32>
    %167 = math.exp %166 : vector<16x96xf32>
    %cst_54 = arith.constant 1.000000e+00 : f32
    %168 = vector.broadcast %cst_54 : f32 to vector<16x96xf32>
    %169 = arith.addf %168, %167 : vector<16x96xf32>
    %170 = arith.divf %168, %169 : vector<16x96xf32>
    %171 = vector.extract_strided_slice %164 {offsets = [0, 0], sizes = [16, 96], strides = [1, 1]} : vector<16x128xf32> to vector<16x96xf32>
    %172 = arith.negf %171 : vector<16x96xf32>
    %173 = math.exp %172 : vector<16x96xf32>
    %cst_55 = arith.constant 1.000000e+00 : f32
    %174 = vector.broadcast %cst_55 : f32 to vector<16x96xf32>
    %175 = arith.addf %174, %173 : vector<16x96xf32>
    %176 = arith.divf %174, %175 : vector<16x96xf32>
    %177 = vector.extract_strided_slice %170 {offsets = [0, 0], sizes = [16, 32], strides = [1, 1]} : vector<16x96xf32> to vector<16x32xf32>
    %178 = vector.extract_strided_slice %170 {offsets = [0, 32], sizes = [16, 32], strides = [1, 1]} : vector<16x96xf32> to vector<16x32xf32>
    %179 = vector.extract_strided_slice %170 {offsets = [0, 64], sizes = [16, 32], strides = [1, 1]} : vector<16x96xf32> to vector<16x32xf32>
    %180 = vector.extract_strided_slice %176 {offsets = [0, 0], sizes = [16, 32], strides = [1, 1]} : vector<16x96xf32> to vector<16x32xf32>
    %181 = vector.extract_strided_slice %176 {offsets = [0, 32], sizes = [16, 32], strides = [1, 1]} : vector<16x96xf32> to vector<16x32xf32>
    %182 = vector.extract_strided_slice %176 {offsets = [0, 64], sizes = [16, 32], strides = [1, 1]} : vector<16x96xf32> to vector<16x32xf32>
    %183 = vector.extract_strided_slice %157 {offsets = [0, 96], sizes = [16, 32], strides = [1, 1]} : vector<16x128xf32> to vector<16x32xf32>
    %184 = math.tanh %183 : vector<16x32xf32>
    %185 = vector.extract_strided_slice %164 {offsets = [0, 96], sizes = [16, 32], strides = [1, 1]} : vector<16x128xf32> to vector<16x32xf32>
    %186 = math.tanh %185 : vector<16x32xf32>
    %187 = arith.mulf %178, %149 : vector<16x32xf32>
    %188 = arith.mulf %177, %184 : vector<16x32xf32>
    %189 = arith.addf %187, %188 : vector<16x32xf32>
    %190 = arith.mulf %181, %149 : vector<16x32xf32>
    %191 = arith.mulf %180, %186 : vector<16x32xf32>
    %192 = arith.addf %190, %191 : vector<16x32xf32>
    %193 = math.tanh %189 : vector<16x32xf32>
    %194 = arith.mulf %179, %193 : vector<16x32xf32>
    %195 = math.tanh %192 : vector<16x32xf32>
    %196 = arith.mulf %182, %195 : vector<16x32xf32>
    %197 = vector.broadcast %c0_i32_47 : i32 to vector<16x1xi32>
    %198 = arith.cmpi slt, %197, %0 : vector<16x1xi32>
    %199 = vector.broadcast %c0_i32_47 : i32 to vector<16x1xi32>
    %200 = arith.cmpi sge, %199, %2 : vector<16x1xi32>
    %cst_56 = arith.constant 0.000000e+00 : f32
    %201 = vector.shape_cast %198 : vector<16x1xi1> to vector<16x1xi1>
    %202 = vector.broadcast %201 : vector<16x1xi1> to vector<16x32xi1>
    %203 = vector.broadcast %cst_56 : f32 to vector<16x32xf32>
    %204 = arith.select %202, %194, %203 : vector<16x32xi1>, vector<16x32xf32>
    %205 = arith.addf %149, %204 : vector<16x32xf32>
    %cst_57 = arith.constant 0.000000e+00 : f32
    %206 = vector.shape_cast %200 : vector<16x1xi1> to vector<16x1xi1>
    %207 = vector.broadcast %206 : vector<16x1xi1> to vector<16x32xi1>
    %208 = vector.broadcast %cst_57 : f32 to vector<16x32xf32>
    %209 = arith.select %207, %196, %208 : vector<16x32xi1>, vector<16x32xf32>
    %210 = arith.addf %149, %209 : vector<16x32xf32>
    %cst_58 = arith.constant 0xFF800000 : f32
    %211 = vector.shape_cast %198 : vector<16x1xi1> to vector<16x1xi1>
    %212 = vector.broadcast %211 : vector<16x1xi1> to vector<16x32xi1>
    %213 = vector.broadcast %cst_58 : f32 to vector<16x32xf32>
    %214 = arith.select %212, %194, %213 : vector<16x32xi1>, vector<16x32xf32>
    %215 = arith.maximumf %150, %214 : vector<16x32xf32>
    %cst_59 = arith.constant 0xFF800000 : f32
    %216 = vector.shape_cast %200 : vector<16x1xi1> to vector<16x1xi1>
    %217 = vector.broadcast %216 : vector<16x1xi1> to vector<16x32xi1>
    %218 = vector.broadcast %cst_59 : f32 to vector<16x32xf32>
    %219 = arith.select %217, %196, %218 : vector<16x32xi1>, vector<16x32xf32>
    %220 = arith.maximumf %150, %219 : vector<16x32xf32>
    %c1_i32_60 = arith.constant 1 : i32
    %221 = arith.index_cast %c1_i32_60 : i32 to index
    %c0_61 = arith.constant 0 : index
    %c0_62 = arith.constant 0 : index
    %222 = vector.load %arg12[%221, %c0_61, %c0_62] : memref<8x16x128xbf16, #tpu.memory_space<vmem>>, vector<1x16x128xbf16>
    %223 = vector.shape_cast %222 : vector<1x16x128xbf16> to vector<16x128xbf16>
    %224 = arith.truncf %194 : vector<16x32xf32> to vector<16x32xbf16>
    %cst_63 = arith.constant dense<0.000000e+00> : vector<16x128xf32>
    %225 = tpu.matmul %224, %9, %cst_63 {dimension_numbers = #tpu.dot_dimension_numbers<[1], [0], [0], [1], [0, 0, 1, 1], [], []>} : vector<16x32xbf16>, vector<32x128xbf16>, vector<16x128xf32> -> vector<16x128xf32>
    %226 = arith.extf %223 : vector<16x128xbf16> to vector<16x128xf32>
    %227 = arith.addf %226, %225 : vector<16x128xf32>
    %228 = arith.index_cast %c1_i32_60 : i32 to index
    %c0_64 = arith.constant 0 : index
    %c0_65 = arith.constant 0 : index
    %229 = vector.load %arg13[%228, %c0_64, %c0_65] : memref<8x16x128xbf16, #tpu.memory_space<vmem>>, vector<1x16x128xbf16>
    %230 = vector.shape_cast %229 : vector<1x16x128xbf16> to vector<16x128xbf16>
    %231 = arith.truncf %196 : vector<16x32xf32> to vector<16x32xbf16>
    %cst_66 = arith.constant dense<0.000000e+00> : vector<16x128xf32>
    %232 = tpu.matmul %231, %10, %cst_66 {dimension_numbers = #tpu.dot_dimension_numbers<[1], [0], [0], [1], [0, 0, 1, 1], [], []>} : vector<16x32xbf16>, vector<32x128xbf16>, vector<16x128xf32> -> vector<16x128xf32>
    %233 = arith.extf %230 : vector<16x128xbf16> to vector<16x128xf32>
    %234 = arith.addf %233, %232 : vector<16x128xf32>
    %235 = vector.extract_strided_slice %227 {offsets = [0, 0], sizes = [16, 96], strides = [1, 1]} : vector<16x128xf32> to vector<16x96xf32>
    %236 = arith.negf %235 : vector<16x96xf32>
    %237 = math.exp %236 : vector<16x96xf32>
    %cst_67 = arith.constant 1.000000e+00 : f32
    %238 = vector.broadcast %cst_67 : f32 to vector<16x96xf32>
    %239 = arith.addf %238, %237 : vector<16x96xf32>
    %240 = arith.divf %238, %239 : vector<16x96xf32>
    %241 = vector.extract_strided_slice %234 {offsets = [0, 0], sizes = [16, 96], strides = [1, 1]} : vector<16x128xf32> to vector<16x96xf32>
    %242 = arith.negf %241 : vector<16x96xf32>
    %243 = math.exp %242 : vector<16x96xf32>
    %cst_68 = arith.constant 1.000000e+00 : f32
    %244 = vector.broadcast %cst_68 : f32 to vector<16x96xf32>
    %245 = arith.addf %244, %243 : vector<16x96xf32>
    %246 = arith.divf %244, %245 : vector<16x96xf32>
    %247 = vector.extract_strided_slice %240 {offsets = [0, 0], sizes = [16, 32], strides = [1, 1]} : vector<16x96xf32> to vector<16x32xf32>
    %248 = vector.extract_strided_slice %240 {offsets = [0, 32], sizes = [16, 32], strides = [1, 1]} : vector<16x96xf32> to vector<16x32xf32>
    %249 = vector.extract_strided_slice %240 {offsets = [0, 64], sizes = [16, 32], strides = [1, 1]} : vector<16x96xf32> to vector<16x32xf32>
    %250 = vector.extract_strided_slice %246 {offsets = [0, 0], sizes = [16, 32], strides = [1, 1]} : vector<16x96xf32> to vector<16x32xf32>
    %251 = vector.extract_strided_slice %246 {offsets = [0, 32], sizes = [16, 32], strides = [1, 1]} : vector<16x96xf32> to vector<16x32xf32>
    %252 = vector.extract_strided_slice %246 {offsets = [0, 64], sizes = [16, 32], strides = [1, 1]} : vector<16x96xf32> to vector<16x32xf32>
    %253 = vector.extract_strided_slice %227 {offsets = [0, 96], sizes = [16, 32], strides = [1, 1]} : vector<16x128xf32> to vector<16x32xf32>
    %254 = math.tanh %253 : vector<16x32xf32>
    %255 = vector.extract_strided_slice %234 {offsets = [0, 96], sizes = [16, 32], strides = [1, 1]} : vector<16x128xf32> to vector<16x32xf32>
    %256 = math.tanh %255 : vector<16x32xf32>
    %257 = arith.mulf %248, %189 : vector<16x32xf32>
    %258 = arith.mulf %247, %254 : vector<16x32xf32>
    %259 = arith.addf %257, %258 : vector<16x32xf32>
    %260 = arith.mulf %251, %192 : vector<16x32xf32>
    %261 = arith.mulf %250, %256 : vector<16x32xf32>
    %262 = arith.addf %260, %261 : vector<16x32xf32>
    %263 = math.tanh %259 : vector<16x32xf32>
    %264 = arith.mulf %249, %263 : vector<16x32xf32>
    %265 = math.tanh %262 : vector<16x32xf32>
    %266 = arith.mulf %252, %265 : vector<16x32xf32>
    %267 = vector.broadcast %c1_i32_60 : i32 to vector<16x1xi32>
    %268 = arith.cmpi slt, %267, %0 : vector<16x1xi32>
    %269 = vector.broadcast %c1_i32_60 : i32 to vector<16x1xi32>
    %270 = arith.cmpi sge, %269, %2 : vector<16x1xi32>
    %cst_69 = arith.constant 0.000000e+00 : f32
    %271 = vector.shape_cast %268 : vector<16x1xi1> to vector<16x1xi1>
    %272 = vector.broadcast %271 : vector<16x1xi1> to vector<16x32xi1>
    %273 = vector.broadcast %cst_69 : f32 to vector<16x32xf32>
    %274 = arith.select %272, %264, %273 : vector<16x32xi1>, vector<16x32xf32>
    %275 = arith.addf %205, %274 : vector<16x32xf32>
    %cst_70 = arith.constant 0.000000e+00 : f32
    %276 = vector.shape_cast %270 : vector<16x1xi1> to vector<16x1xi1>
    %277 = vector.broadcast %276 : vector<16x1xi1> to vector<16x32xi1>
    %278 = vector.broadcast %cst_70 : f32 to vector<16x32xf32>
    %279 = arith.select %277, %266, %278 : vector<16x32xi1>, vector<16x32xf32>
    %280 = arith.addf %210, %279 : vector<16x32xf32>
    %cst_71 = arith.constant 0xFF800000 : f32
    %281 = vector.shape_cast %268 : vector<16x1xi1> to vector<16x1xi1>
    %282 = vector.broadcast %281 : vector<16x1xi1> to vector<16x32xi1>
    %283 = vector.broadcast %cst_71 : f32 to vector<16x32xf32>
    %284 = arith.select %282, %264, %283 : vector<16x32xi1>, vector<16x32xf32>
    %285 = arith.maximumf %215, %284 : vector<16x32xf32>
    %cst_72 = arith.constant 0xFF800000 : f32
    %286 = vector.shape_cast %270 : vector<16x1xi1> to vector<16x1xi1>
    %287 = vector.broadcast %286 : vector<16x1xi1> to vector<16x32xi1>
    %288 = vector.broadcast %cst_72 : f32 to vector<16x32xf32>
    %289 = arith.select %287, %266, %288 : vector<16x32xi1>, vector<16x32xf32>
    %290 = arith.maximumf %220, %289 : vector<16x32xf32>
    %c2_i32_73 = arith.constant 2 : i32
    %291 = arith.index_cast %c2_i32_73 : i32 to index
    %c0_74 = arith.constant 0 : index
    %c0_75 = arith.constant 0 : index
    %292 = vector.load %arg12[%291, %c0_74, %c0_75] : memref<8x16x128xbf16, #tpu.memory_space<vmem>>, vector<1x16x128xbf16>
    %293 = vector.shape_cast %292 : vector<1x16x128xbf16> to vector<16x128xbf16>
    %294 = arith.truncf %264 : vector<16x32xf32> to vector<16x32xbf16>
    %cst_76 = arith.constant dense<0.000000e+00> : vector<16x128xf32>
    %295 = tpu.matmul %294, %9, %cst_76 {dimension_numbers = #tpu.dot_dimension_numbers<[1], [0], [0], [1], [0, 0, 1, 1], [], []>} : vector<16x32xbf16>, vector<32x128xbf16>, vector<16x128xf32> -> vector<16x128xf32>
    %296 = arith.extf %293 : vector<16x128xbf16> to vector<16x128xf32>
    %297 = arith.addf %296, %295 : vector<16x128xf32>
    %298 = arith.index_cast %c2_i32_73 : i32 to index
    %c0_77 = arith.constant 0 : index
    %c0_78 = arith.constant 0 : index
    %299 = vector.load %arg13[%298, %c0_77, %c0_78] : memref<8x16x128xbf16, #tpu.memory_space<vmem>>, vector<1x16x128xbf16>
    %300 = vector.shape_cast %299 : vector<1x16x128xbf16> to vector<16x128xbf16>
    %301 = arith.truncf %266 : vector<16x32xf32> to vector<16x32xbf16>
    %cst_79 = arith.constant dense<0.000000e+00> : vector<16x128xf32>
    %302 = tpu.matmul %301, %10, %cst_79 {dimension_numbers = #tpu.dot_dimension_numbers<[1], [0], [0], [1], [0, 0, 1, 1], [], []>} : vector<16x32xbf16>, vector<32x128xbf16>, vector<16x128xf32> -> vector<16x128xf32>
    %303 = arith.extf %300 : vector<16x128xbf16> to vector<16x128xf32>
    %304 = arith.addf %303, %302 : vector<16x128xf32>
    %305 = vector.extract_strided_slice %297 {offsets = [0, 0], sizes = [16, 96], strides = [1, 1]} : vector<16x128xf32> to vector<16x96xf32>
    %306 = arith.negf %305 : vector<16x96xf32>
    %307 = math.exp %306 : vector<16x96xf32>
    %cst_80 = arith.constant 1.000000e+00 : f32
    %308 = vector.broadcast %cst_80 : f32 to vector<16x96xf32>
    %309 = arith.addf %308, %307 : vector<16x96xf32>
    %310 = arith.divf %308, %309 : vector<16x96xf32>
    %311 = vector.extract_strided_slice %304 {offsets = [0, 0], sizes = [16, 96], strides = [1, 1]} : vector<16x128xf32> to vector<16x96xf32>
    %312 = arith.negf %311 : vector<16x96xf32>
    %313 = math.exp %312 : vector<16x96xf32>
    %cst_81 = arith.constant 1.000000e+00 : f32
    %314 = vector.broadcast %cst_81 : f32 to vector<16x96xf32>
    %315 = arith.addf %314, %313 : vector<16x96xf32>
    %316 = arith.divf %314, %315 : vector<16x96xf32>
    %317 = vector.extract_strided_slice %310 {offsets = [0, 0], sizes = [16, 32], strides = [1, 1]} : vector<16x96xf32> to vector<16x32xf32>
    %318 = vector.extract_strided_slice %310 {offsets = [0, 32], sizes = [16, 32], strides = [1, 1]} : vector<16x96xf32> to vector<16x32xf32>
    %319 = vector.extract_strided_slice %310 {offsets = [0, 64], sizes = [16, 32], strides = [1, 1]} : vector<16x96xf32> to vector<16x32xf32>
    %320 = vector.extract_strided_slice %316 {offsets = [0, 0], sizes = [16, 32], strides = [1, 1]} : vector<16x96xf32> to vector<16x32xf32>
    %321 = vector.extract_strided_slice %316 {offsets = [0, 32], sizes = [16, 32], strides = [1, 1]} : vector<16x96xf32> to vector<16x32xf32>
    %322 = vector.extract_strided_slice %316 {offsets = [0, 64], sizes = [16, 32], strides = [1, 1]} : vector<16x96xf32> to vector<16x32xf32>
    %323 = vector.extract_strided_slice %297 {offsets = [0, 96], sizes = [16, 32], strides = [1, 1]} : vector<16x128xf32> to vector<16x32xf32>
    %324 = math.tanh %323 : vector<16x32xf32>
    %325 = vector.extract_strided_slice %304 {offsets = [0, 96], sizes = [16, 32], strides = [1, 1]} : vector<16x128xf32> to vector<16x32xf32>
    %326 = math.tanh %325 : vector<16x32xf32>
    %327 = arith.mulf %318, %259 : vector<16x32xf32>
    %328 = arith.mulf %317, %324 : vector<16x32xf32>
    %329 = arith.addf %327, %328 : vector<16x32xf32>
    %330 = arith.mulf %321, %262 : vector<16x32xf32>
    %331 = arith.mulf %320, %326 : vector<16x32xf32>
    %332 = arith.addf %330, %331 : vector<16x32xf32>
    %333 = math.tanh %329 : vector<16x32xf32>
    %334 = arith.mulf %319, %333 : vector<16x32xf32>
    %335 = math.tanh %332 : vector<16x32xf32>
    %336 = arith.mulf %322, %335 : vector<16x32xf32>
    %337 = vector.broadcast %c2_i32_73 : i32 to vector<16x1xi32>
    %338 = arith.cmpi slt, %337, %0 : vector<16x1xi32>
    %339 = vector.broadcast %c2_i32_73 : i32 to vector<16x1xi32>
    %340 = arith.cmpi sge, %339, %2 : vector<16x1xi32>
    %cst_82 = arith.constant 0.000000e+00 : f32
    %341 = vector.shape_cast %338 : vector<16x1xi1> to vector<16x1xi1>
    %342 = vector.broadcast %341 : vector<16x1xi1> to vector<16x32xi1>
    %343 = vector.broadcast %cst_82 : f32 to vector<16x32xf32>
    %344 = arith.select %342, %334, %343 : vector<16x32xi1>, vector<16x32xf32>
    %345 = arith.addf %275, %344 : vector<16x32xf32>
    %cst_83 = arith.constant 0.000000e+00 : f32
    %346 = vector.shape_cast %340 : vector<16x1xi1> to vector<16x1xi1>
    %347 = vector.broadcast %346 : vector<16x1xi1> to vector<16x32xi1>
    %348 = vector.broadcast %cst_83 : f32 to vector<16x32xf32>
    %349 = arith.select %347, %336, %348 : vector<16x32xi1>, vector<16x32xf32>
    %350 = arith.addf %280, %349 : vector<16x32xf32>
    %cst_84 = arith.constant 0xFF800000 : f32
    %351 = vector.shape_cast %338 : vector<16x1xi1> to vector<16x1xi1>
    %352 = vector.broadcast %351 : vector<16x1xi1> to vector<16x32xi1>
    %353 = vector.broadcast %cst_84 : f32 to vector<16x32xf32>
    %354 = arith.select %352, %334, %353 : vector<16x32xi1>, vector<16x32xf32>
    %355 = arith.maximumf %285, %354 : vector<16x32xf32>
    %cst_85 = arith.constant 0xFF800000 : f32
    %356 = vector.shape_cast %340 : vector<16x1xi1> to vector<16x1xi1>
    %357 = vector.broadcast %356 : vector<16x1xi1> to vector<16x32xi1>
    %358 = vector.broadcast %cst_85 : f32 to vector<16x32xf32>
    %359 = arith.select %357, %336, %358 : vector<16x32xi1>, vector<16x32xf32>
    %360 = arith.maximumf %290, %359 : vector<16x32xf32>
    %c3_i32_86 = arith.constant 3 : i32
    %361 = arith.index_cast %c3_i32_86 : i32 to index
    %c0_87 = arith.constant 0 : index
    %c0_88 = arith.constant 0 : index
    %362 = vector.load %arg12[%361, %c0_87, %c0_88] : memref<8x16x128xbf16, #tpu.memory_space<vmem>>, vector<1x16x128xbf16>
    %363 = vector.shape_cast %362 : vector<1x16x128xbf16> to vector<16x128xbf16>
    %364 = arith.truncf %334 : vector<16x32xf32> to vector<16x32xbf16>
    %cst_89 = arith.constant dense<0.000000e+00> : vector<16x128xf32>
    %365 = tpu.matmul %364, %9, %cst_89 {dimension_numbers = #tpu.dot_dimension_numbers<[1], [0], [0], [1], [0, 0, 1, 1], [], []>} : vector<16x32xbf16>, vector<32x128xbf16>, vector<16x128xf32> -> vector<16x128xf32>
    %366 = arith.extf %363 : vector<16x128xbf16> to vector<16x128xf32>
    %367 = arith.addf %366, %365 : vector<16x128xf32>
    %368 = arith.index_cast %c3_i32_86 : i32 to index
    %c0_90 = arith.constant 0 : index
    %c0_91 = arith.constant 0 : index
    %369 = vector.load %arg13[%368, %c0_90, %c0_91] : memref<8x16x128xbf16, #tpu.memory_space<vmem>>, vector<1x16x128xbf16>
    %370 = vector.shape_cast %369 : vector<1x16x128xbf16> to vector<16x128xbf16>
    %371 = arith.truncf %336 : vector<16x32xf32> to vector<16x32xbf16>
    %cst_92 = arith.constant dense<0.000000e+00> : vector<16x128xf32>
    %372 = tpu.matmul %371, %10, %cst_92 {dimension_numbers = #tpu.dot_dimension_numbers<[1], [0], [0], [1], [0, 0, 1, 1], [], []>} : vector<16x32xbf16>, vector<32x128xbf16>, vector<16x128xf32> -> vector<16x128xf32>
    %373 = arith.extf %370 : vector<16x128xbf16> to vector<16x128xf32>
    %374 = arith.addf %373, %372 : vector<16x128xf32>
    %375 = vector.extract_strided_slice %367 {offsets = [0, 0], sizes = [16, 96], strides = [1, 1]} : vector<16x128xf32> to vector<16x96xf32>
    %376 = arith.negf %375 : vector<16x96xf32>
    %377 = math.exp %376 : vector<16x96xf32>
    %cst_93 = arith.constant 1.000000e+00 : f32
    %378 = vector.broadcast %cst_93 : f32 to vector<16x96xf32>
    %379 = arith.addf %378, %377 : vector<16x96xf32>
    %380 = arith.divf %378, %379 : vector<16x96xf32>
    %381 = vector.extract_strided_slice %374 {offsets = [0, 0], sizes = [16, 96], strides = [1, 1]} : vector<16x128xf32> to vector<16x96xf32>
    %382 = arith.negf %381 : vector<16x96xf32>
    %383 = math.exp %382 : vector<16x96xf32>
    %cst_94 = arith.constant 1.000000e+00 : f32
    %384 = vector.broadcast %cst_94 : f32 to vector<16x96xf32>
    %385 = arith.addf %384, %383 : vector<16x96xf32>
    %386 = arith.divf %384, %385 : vector<16x96xf32>
    %387 = vector.extract_strided_slice %380 {offsets = [0, 0], sizes = [16, 32], strides = [1, 1]} : vector<16x96xf32> to vector<16x32xf32>
    %388 = vector.extract_strided_slice %380 {offsets = [0, 32], sizes = [16, 32], strides = [1, 1]} : vector<16x96xf32> to vector<16x32xf32>
    %389 = vector.extract_strided_slice %380 {offsets = [0, 64], sizes = [16, 32], strides = [1, 1]} : vector<16x96xf32> to vector<16x32xf32>
    %390 = vector.extract_strided_slice %386 {offsets = [0, 0], sizes = [16, 32], strides = [1, 1]} : vector<16x96xf32> to vector<16x32xf32>
    %391 = vector.extract_strided_slice %386 {offsets = [0, 32], sizes = [16, 32], strides = [1, 1]} : vector<16x96xf32> to vector<16x32xf32>
    %392 = vector.extract_strided_slice %386 {offsets = [0, 64], sizes = [16, 32], strides = [1, 1]} : vector<16x96xf32> to vector<16x32xf32>
    %393 = vector.extract_strided_slice %367 {offsets = [0, 96], sizes = [16, 32], strides = [1, 1]} : vector<16x128xf32> to vector<16x32xf32>
    %394 = math.tanh %393 : vector<16x32xf32>
    %395 = vector.extract_strided_slice %374 {offsets = [0, 96], sizes = [16, 32], strides = [1, 1]} : vector<16x128xf32> to vector<16x32xf32>
    %396 = math.tanh %395 : vector<16x32xf32>
    %397 = arith.mulf %388, %329 : vector<16x32xf32>
    %398 = arith.mulf %387, %394 : vector<16x32xf32>
    %399 = arith.addf %397, %398 : vector<16x32xf32>
    %400 = arith.mulf %391, %332 : vector<16x32xf32>
    %401 = arith.mulf %390, %396 : vector<16x32xf32>
    %402 = arith.addf %400, %401 : vector<16x32xf32>
    %403 = math.tanh %399 : vector<16x32xf32>
    %404 = arith.mulf %389, %403 : vector<16x32xf32>
    %405 = math.tanh %402 : vector<16x32xf32>
    %406 = arith.mulf %392, %405 : vector<16x32xf32>
    %407 = vector.broadcast %c3_i32_86 : i32 to vector<16x1xi32>
    %408 = arith.cmpi slt, %407, %0 : vector<16x1xi32>
    %409 = vector.broadcast %c3_i32_86 : i32 to vector<16x1xi32>
    %410 = arith.cmpi sge, %409, %2 : vector<16x1xi32>
    %cst_95 = arith.constant 0.000000e+00 : f32
    %411 = vector.shape_cast %408 : vector<16x1xi1> to vector<16x1xi1>
    %412 = vector.broadcast %411 : vector<16x1xi1> to vector<16x32xi1>
    %413 = vector.broadcast %cst_95 : f32 to vector<16x32xf32>
    %414 = arith.select %412, %404, %413 : vector<16x32xi1>, vector<16x32xf32>
    %415 = arith.addf %345, %414 : vector<16x32xf32>
    %cst_96 = arith.constant 0.000000e+00 : f32
    %416 = vector.shape_cast %410 : vector<16x1xi1> to vector<16x1xi1>
    %417 = vector.broadcast %416 : vector<16x1xi1> to vector<16x32xi1>
    %418 = vector.broadcast %cst_96 : f32 to vector<16x32xf32>
    %419 = arith.select %417, %406, %418 : vector<16x32xi1>, vector<16x32xf32>
    %420 = arith.addf %350, %419 : vector<16x32xf32>
    %cst_97 = arith.constant 0xFF800000 : f32
    %421 = vector.shape_cast %408 : vector<16x1xi1> to vector<16x1xi1>
    %422 = vector.broadcast %421 : vector<16x1xi1> to vector<16x32xi1>
    %423 = vector.broadcast %cst_97 : f32 to vector<16x32xf32>
    %424 = arith.select %422, %404, %423 : vector<16x32xi1>, vector<16x32xf32>
    %425 = arith.maximumf %355, %424 : vector<16x32xf32>
    %cst_98 = arith.constant 0xFF800000 : f32
    %426 = vector.shape_cast %410 : vector<16x1xi1> to vector<16x1xi1>
    %427 = vector.broadcast %426 : vector<16x1xi1> to vector<16x32xi1>
    %428 = vector.broadcast %cst_98 : f32 to vector<16x32xf32>
    %429 = arith.select %427, %406, %428 : vector<16x32xi1>, vector<16x32xf32>
    %430 = arith.maximumf %360, %429 : vector<16x32xf32>
    %c4_i32_99 = arith.constant 4 : i32
    %431 = arith.index_cast %c4_i32_99 : i32 to index
    %c0_100 = arith.constant 0 : index
    %c0_101 = arith.constant 0 : index
    %432 = vector.load %arg12[%431, %c0_100, %c0_101] : memref<8x16x128xbf16, #tpu.memory_space<vmem>>, vector<1x16x128xbf16>
    %433 = vector.shape_cast %432 : vector<1x16x128xbf16> to vector<16x128xbf16>
    %434 = arith.truncf %404 : vector<16x32xf32> to vector<16x32xbf16>
    %cst_102 = arith.constant dense<0.000000e+00> : vector<16x128xf32>
    %435 = tpu.matmul %434, %9, %cst_102 {dimension_numbers = #tpu.dot_dimension_numbers<[1], [0], [0], [1], [0, 0, 1, 1], [], []>} : vector<16x32xbf16>, vector<32x128xbf16>, vector<16x128xf32> -> vector<16x128xf32>
    %436 = arith.extf %433 : vector<16x128xbf16> to vector<16x128xf32>
    %437 = arith.addf %436, %435 : vector<16x128xf32>
    %438 = arith.index_cast %c4_i32_99 : i32 to index
    %c0_103 = arith.constant 0 : index
    %c0_104 = arith.constant 0 : index
    %439 = vector.load %arg13[%438, %c0_103, %c0_104] : memref<8x16x128xbf16, #tpu.memory_space<vmem>>, vector<1x16x128xbf16>
    %440 = vector.shape_cast %439 : vector<1x16x128xbf16> to vector<16x128xbf16>
    %441 = arith.truncf %406 : vector<16x32xf32> to vector<16x32xbf16>
    %cst_105 = arith.constant dense<0.000000e+00> : vector<16x128xf32>
    %442 = tpu.matmul %441, %10, %cst_105 {dimension_numbers = #tpu.dot_dimension_numbers<[1], [0], [0], [1], [0, 0, 1, 1], [], []>} : vector<16x32xbf16>, vector<32x128xbf16>, vector<16x128xf32> -> vector<16x128xf32>
    %443 = arith.extf %440 : vector<16x128xbf16> to vector<16x128xf32>
    %444 = arith.addf %443, %442 : vector<16x128xf32>
    %445 = vector.extract_strided_slice %437 {offsets = [0, 0], sizes = [16, 96], strides = [1, 1]} : vector<16x128xf32> to vector<16x96xf32>
    %446 = arith.negf %445 : vector<16x96xf32>
    %447 = math.exp %446 : vector<16x96xf32>
    %cst_106 = arith.constant 1.000000e+00 : f32
    %448 = vector.broadcast %cst_106 : f32 to vector<16x96xf32>
    %449 = arith.addf %448, %447 : vector<16x96xf32>
    %450 = arith.divf %448, %449 : vector<16x96xf32>
    %451 = vector.extract_strided_slice %444 {offsets = [0, 0], sizes = [16, 96], strides = [1, 1]} : vector<16x128xf32> to vector<16x96xf32>
    %452 = arith.negf %451 : vector<16x96xf32>
    %453 = math.exp %452 : vector<16x96xf32>
    %cst_107 = arith.constant 1.000000e+00 : f32
    %454 = vector.broadcast %cst_107 : f32 to vector<16x96xf32>
    %455 = arith.addf %454, %453 : vector<16x96xf32>
    %456 = arith.divf %454, %455 : vector<16x96xf32>
    %457 = vector.extract_strided_slice %450 {offsets = [0, 0], sizes = [16, 32], strides = [1, 1]} : vector<16x96xf32> to vector<16x32xf32>
    %458 = vector.extract_strided_slice %450 {offsets = [0, 32], sizes = [16, 32], strides = [1, 1]} : vector<16x96xf32> to vector<16x32xf32>
    %459 = vector.extract_strided_slice %450 {offsets = [0, 64], sizes = [16, 32], strides = [1, 1]} : vector<16x96xf32> to vector<16x32xf32>
    %460 = vector.extract_strided_slice %456 {offsets = [0, 0], sizes = [16, 32], strides = [1, 1]} : vector<16x96xf32> to vector<16x32xf32>
    %461 = vector.extract_strided_slice %456 {offsets = [0, 32], sizes = [16, 32], strides = [1, 1]} : vector<16x96xf32> to vector<16x32xf32>
    %462 = vector.extract_strided_slice %456 {offsets = [0, 64], sizes = [16, 32], strides = [1, 1]} : vector<16x96xf32> to vector<16x32xf32>
    %463 = vector.extract_strided_slice %437 {offsets = [0, 96], sizes = [16, 32], strides = [1, 1]} : vector<16x128xf32> to vector<16x32xf32>
    %464 = math.tanh %463 : vector<16x32xf32>
    %465 = vector.extract_strided_slice %444 {offsets = [0, 96], sizes = [16, 32], strides = [1, 1]} : vector<16x128xf32> to vector<16x32xf32>
    %466 = math.tanh %465 : vector<16x32xf32>
    %467 = arith.mulf %458, %399 : vector<16x32xf32>
    %468 = arith.mulf %457, %464 : vector<16x32xf32>
    %469 = arith.addf %467, %468 : vector<16x32xf32>
    %470 = arith.mulf %461, %402 : vector<16x32xf32>
    %471 = arith.mulf %460, %466 : vector<16x32xf32>
    %472 = arith.addf %470, %471 : vector<16x32xf32>
    %473 = math.tanh %469 : vector<16x32xf32>
    %474 = arith.mulf %459, %473 : vector<16x32xf32>
    %475 = math.tanh %472 : vector<16x32xf32>
    %476 = arith.mulf %462, %475 : vector<16x32xf32>
    %477 = vector.broadcast %c4_i32_99 : i32 to vector<16x1xi32>
    %478 = arith.cmpi slt, %477, %0 : vector<16x1xi32>
    %479 = vector.broadcast %c4_i32_99 : i32 to vector<16x1xi32>
    %480 = arith.cmpi sge, %479, %2 : vector<16x1xi32>
    %cst_108 = arith.constant 0.000000e+00 : f32
    %481 = vector.shape_cast %478 : vector<16x1xi1> to vector<16x1xi1>
    %482 = vector.broadcast %481 : vector<16x1xi1> to vector<16x32xi1>
    %483 = vector.broadcast %cst_108 : f32 to vector<16x32xf32>
    %484 = arith.select %482, %474, %483 : vector<16x32xi1>, vector<16x32xf32>
    %485 = arith.addf %415, %484 : vector<16x32xf32>
    %cst_109 = arith.constant 0.000000e+00 : f32
    %486 = vector.shape_cast %480 : vector<16x1xi1> to vector<16x1xi1>
    %487 = vector.broadcast %486 : vector<16x1xi1> to vector<16x32xi1>
    %488 = vector.broadcast %cst_109 : f32 to vector<16x32xf32>
    %489 = arith.select %487, %476, %488 : vector<16x32xi1>, vector<16x32xf32>
    %490 = arith.addf %420, %489 : vector<16x32xf32>
    %cst_110 = arith.constant 0xFF800000 : f32
    %491 = vector.shape_cast %478 : vector<16x1xi1> to vector<16x1xi1>
    %492 = vector.broadcast %491 : vector<16x1xi1> to vector<16x32xi1>
    %493 = vector.broadcast %cst_110 : f32 to vector<16x32xf32>
    %494 = arith.select %492, %474, %493 : vector<16x32xi1>, vector<16x32xf32>
    %495 = arith.maximumf %425, %494 : vector<16x32xf32>
    %cst_111 = arith.constant 0xFF800000 : f32
    %496 = vector.shape_cast %480 : vector<16x1xi1> to vector<16x1xi1>
    %497 = vector.broadcast %496 : vector<16x1xi1> to vector<16x32xi1>
    %498 = vector.broadcast %cst_111 : f32 to vector<16x32xf32>
    %499 = arith.select %497, %476, %498 : vector<16x32xi1>, vector<16x32xf32>
    %500 = arith.maximumf %430, %499 : vector<16x32xf32>
    %c5_i32_112 = arith.constant 5 : i32
    %501 = arith.index_cast %c5_i32_112 : i32 to index
    %c0_113 = arith.constant 0 : index
    %c0_114 = arith.constant 0 : index
    %502 = vector.load %arg12[%501, %c0_113, %c0_114] : memref<8x16x128xbf16, #tpu.memory_space<vmem>>, vector<1x16x128xbf16>
    %503 = vector.shape_cast %502 : vector<1x16x128xbf16> to vector<16x128xbf16>
    %504 = arith.truncf %474 : vector<16x32xf32> to vector<16x32xbf16>
    %cst_115 = arith.constant dense<0.000000e+00> : vector<16x128xf32>
    %505 = tpu.matmul %504, %9, %cst_115 {dimension_numbers = #tpu.dot_dimension_numbers<[1], [0], [0], [1], [0, 0, 1, 1], [], []>} : vector<16x32xbf16>, vector<32x128xbf16>, vector<16x128xf32> -> vector<16x128xf32>
    %506 = arith.extf %503 : vector<16x128xbf16> to vector<16x128xf32>
    %507 = arith.addf %506, %505 : vector<16x128xf32>
    %508 = arith.index_cast %c5_i32_112 : i32 to index
    %c0_116 = arith.constant 0 : index
    %c0_117 = arith.constant 0 : index
    %509 = vector.load %arg13[%508, %c0_116, %c0_117] : memref<8x16x128xbf16, #tpu.memory_space<vmem>>, vector<1x16x128xbf16>
    %510 = vector.shape_cast %509 : vector<1x16x128xbf16> to vector<16x128xbf16>
    %511 = arith.truncf %476 : vector<16x32xf32> to vector<16x32xbf16>
    %cst_118 = arith.constant dense<0.000000e+00> : vector<16x128xf32>
    %512 = tpu.matmul %511, %10, %cst_118 {dimension_numbers = #tpu.dot_dimension_numbers<[1], [0], [0], [1], [0, 0, 1, 1], [], []>} : vector<16x32xbf16>, vector<32x128xbf16>, vector<16x128xf32> -> vector<16x128xf32>
    %513 = arith.extf %510 : vector<16x128xbf16> to vector<16x128xf32>
    %514 = arith.addf %513, %512 : vector<16x128xf32>
    %515 = vector.extract_strided_slice %507 {offsets = [0, 0], sizes = [16, 96], strides = [1, 1]} : vector<16x128xf32> to vector<16x96xf32>
    %516 = arith.negf %515 : vector<16x96xf32>
    %517 = math.exp %516 : vector<16x96xf32>
    %cst_119 = arith.constant 1.000000e+00 : f32
    %518 = vector.broadcast %cst_119 : f32 to vector<16x96xf32>
    %519 = arith.addf %518, %517 : vector<16x96xf32>
    %520 = arith.divf %518, %519 : vector<16x96xf32>
    %521 = vector.extract_strided_slice %514 {offsets = [0, 0], sizes = [16, 96], strides = [1, 1]} : vector<16x128xf32> to vector<16x96xf32>
    %522 = arith.negf %521 : vector<16x96xf32>
    %523 = math.exp %522 : vector<16x96xf32>
    %cst_120 = arith.constant 1.000000e+00 : f32
    %524 = vector.broadcast %cst_120 : f32 to vector<16x96xf32>
    %525 = arith.addf %524, %523 : vector<16x96xf32>
    %526 = arith.divf %524, %525 : vector<16x96xf32>
    %527 = vector.extract_strided_slice %520 {offsets = [0, 0], sizes = [16, 32], strides = [1, 1]} : vector<16x96xf32> to vector<16x32xf32>
    %528 = vector.extract_strided_slice %520 {offsets = [0, 32], sizes = [16, 32], strides = [1, 1]} : vector<16x96xf32> to vector<16x32xf32>
    %529 = vector.extract_strided_slice %520 {offsets = [0, 64], sizes = [16, 32], strides = [1, 1]} : vector<16x96xf32> to vector<16x32xf32>
    %530 = vector.extract_strided_slice %526 {offsets = [0, 0], sizes = [16, 32], strides = [1, 1]} : vector<16x96xf32> to vector<16x32xf32>
    %531 = vector.extract_strided_slice %526 {offsets = [0, 32], sizes = [16, 32], strides = [1, 1]} : vector<16x96xf32> to vector<16x32xf32>
    %532 = vector.extract_strided_slice %526 {offsets = [0, 64], sizes = [16, 32], strides = [1, 1]} : vector<16x96xf32> to vector<16x32xf32>
    %533 = vector.extract_strided_slice %507 {offsets = [0, 96], sizes = [16, 32], strides = [1, 1]} : vector<16x128xf32> to vector<16x32xf32>
    %534 = math.tanh %533 : vector<16x32xf32>
    %535 = vector.extract_strided_slice %514 {offsets = [0, 96], sizes = [16, 32], strides = [1, 1]} : vector<16x128xf32> to vector<16x32xf32>
    %536 = math.tanh %535 : vector<16x32xf32>
    %537 = arith.mulf %528, %469 : vector<16x32xf32>
    %538 = arith.mulf %527, %534 : vector<16x32xf32>
    %539 = arith.addf %537, %538 : vector<16x32xf32>
    %540 = arith.mulf %531, %472 : vector<16x32xf32>
    %541 = arith.mulf %530, %536 : vector<16x32xf32>
    %542 = arith.addf %540, %541 : vector<16x32xf32>
    %543 = math.tanh %539 : vector<16x32xf32>
    %544 = arith.mulf %529, %543 : vector<16x32xf32>
    %545 = math.tanh %542 : vector<16x32xf32>
    %546 = arith.mulf %532, %545 : vector<16x32xf32>
    %547 = vector.broadcast %c5_i32_112 : i32 to vector<16x1xi32>
    %548 = arith.cmpi slt, %547, %0 : vector<16x1xi32>
    %549 = vector.broadcast %c5_i32_112 : i32 to vector<16x1xi32>
    %550 = arith.cmpi sge, %549, %2 : vector<16x1xi32>
    %cst_121 = arith.constant 0.000000e+00 : f32
    %551 = vector.shape_cast %548 : vector<16x1xi1> to vector<16x1xi1>
    %552 = vector.broadcast %551 : vector<16x1xi1> to vector<16x32xi1>
    %553 = vector.broadcast %cst_121 : f32 to vector<16x32xf32>
    %554 = arith.select %552, %544, %553 : vector<16x32xi1>, vector<16x32xf32>
    %555 = arith.addf %485, %554 : vector<16x32xf32>
    %cst_122 = arith.constant 0.000000e+00 : f32
    %556 = vector.shape_cast %550 : vector<16x1xi1> to vector<16x1xi1>
    %557 = vector.broadcast %556 : vector<16x1xi1> to vector<16x32xi1>
    %558 = vector.broadcast %cst_122 : f32 to vector<16x32xf32>
    %559 = arith.select %557, %546, %558 : vector<16x32xi1>, vector<16x32xf32>
    %560 = arith.addf %490, %559 : vector<16x32xf32>
    %cst_123 = arith.constant 0xFF800000 : f32
    %561 = vector.shape_cast %548 : vector<16x1xi1> to vector<16x1xi1>
    %562 = vector.broadcast %561 : vector<16x1xi1> to vector<16x32xi1>
    %563 = vector.broadcast %cst_123 : f32 to vector<16x32xf32>
    %564 = arith.select %562, %544, %563 : vector<16x32xi1>, vector<16x32xf32>
    %565 = arith.maximumf %495, %564 : vector<16x32xf32>
    %cst_124 = arith.constant 0xFF800000 : f32
    %566 = vector.shape_cast %550 : vector<16x1xi1> to vector<16x1xi1>
    %567 = vector.broadcast %566 : vector<16x1xi1> to vector<16x32xi1>
    %568 = vector.broadcast %cst_124 : f32 to vector<16x32xf32>
    %569 = arith.select %567, %546, %568 : vector<16x32xi1>, vector<16x32xf32>
    %570 = arith.maximumf %500, %569 : vector<16x32xf32>
    %c6_i32_125 = arith.constant 6 : i32
    %571 = arith.index_cast %c6_i32_125 : i32 to index
    %c0_126 = arith.constant 0 : index
    %c0_127 = arith.constant 0 : index
    %572 = vector.load %arg12[%571, %c0_126, %c0_127] : memref<8x16x128xbf16, #tpu.memory_space<vmem>>, vector<1x16x128xbf16>
    %573 = vector.shape_cast %572 : vector<1x16x128xbf16> to vector<16x128xbf16>
    %574 = arith.truncf %544 : vector<16x32xf32> to vector<16x32xbf16>
    %cst_128 = arith.constant dense<0.000000e+00> : vector<16x128xf32>
    %575 = tpu.matmul %574, %9, %cst_128 {dimension_numbers = #tpu.dot_dimension_numbers<[1], [0], [0], [1], [0, 0, 1, 1], [], []>} : vector<16x32xbf16>, vector<32x128xbf16>, vector<16x128xf32> -> vector<16x128xf32>
    %576 = arith.extf %573 : vector<16x128xbf16> to vector<16x128xf32>
    %577 = arith.addf %576, %575 : vector<16x128xf32>
    %578 = arith.index_cast %c6_i32_125 : i32 to index
    %c0_129 = arith.constant 0 : index
    %c0_130 = arith.constant 0 : index
    %579 = vector.load %arg13[%578, %c0_129, %c0_130] : memref<8x16x128xbf16, #tpu.memory_space<vmem>>, vector<1x16x128xbf16>
    %580 = vector.shape_cast %579 : vector<1x16x128xbf16> to vector<16x128xbf16>
    %581 = arith.truncf %546 : vector<16x32xf32> to vector<16x32xbf16>
    %cst_131 = arith.constant dense<0.000000e+00> : vector<16x128xf32>
    %582 = tpu.matmul %581, %10, %cst_131 {dimension_numbers = #tpu.dot_dimension_numbers<[1], [0], [0], [1], [0, 0, 1, 1], [], []>} : vector<16x32xbf16>, vector<32x128xbf16>, vector<16x128xf32> -> vector<16x128xf32>
    %583 = arith.extf %580 : vector<16x128xbf16> to vector<16x128xf32>
    %584 = arith.addf %583, %582 : vector<16x128xf32>
    %585 = vector.extract_strided_slice %577 {offsets = [0, 0], sizes = [16, 96], strides = [1, 1]} : vector<16x128xf32> to vector<16x96xf32>
    %586 = arith.negf %585 : vector<16x96xf32>
    %587 = math.exp %586 : vector<16x96xf32>
    %cst_132 = arith.constant 1.000000e+00 : f32
    %588 = vector.broadcast %cst_132 : f32 to vector<16x96xf32>
    %589 = arith.addf %588, %587 : vector<16x96xf32>
    %590 = arith.divf %588, %589 : vector<16x96xf32>
    %591 = vector.extract_strided_slice %584 {offsets = [0, 0], sizes = [16, 96], strides = [1, 1]} : vector<16x128xf32> to vector<16x96xf32>
    %592 = arith.negf %591 : vector<16x96xf32>
    %593 = math.exp %592 : vector<16x96xf32>
    %cst_133 = arith.constant 1.000000e+00 : f32
    %594 = vector.broadcast %cst_133 : f32 to vector<16x96xf32>
    %595 = arith.addf %594, %593 : vector<16x96xf32>
    %596 = arith.divf %594, %595 : vector<16x96xf32>
    %597 = vector.extract_strided_slice %590 {offsets = [0, 0], sizes = [16, 32], strides = [1, 1]} : vector<16x96xf32> to vector<16x32xf32>
    %598 = vector.extract_strided_slice %590 {offsets = [0, 32], sizes = [16, 32], strides = [1, 1]} : vector<16x96xf32> to vector<16x32xf32>
    %599 = vector.extract_strided_slice %590 {offsets = [0, 64], sizes = [16, 32], strides = [1, 1]} : vector<16x96xf32> to vector<16x32xf32>
    %600 = vector.extract_strided_slice %596 {offsets = [0, 0], sizes = [16, 32], strides = [1, 1]} : vector<16x96xf32> to vector<16x32xf32>
    %601 = vector.extract_strided_slice %596 {offsets = [0, 32], sizes = [16, 32], strides = [1, 1]} : vector<16x96xf32> to vector<16x32xf32>
    %602 = vector.extract_strided_slice %596 {offsets = [0, 64], sizes = [16, 32], strides = [1, 1]} : vector<16x96xf32> to vector<16x32xf32>
    %603 = vector.extract_strided_slice %577 {offsets = [0, 96], sizes = [16, 32], strides = [1, 1]} : vector<16x128xf32> to vector<16x32xf32>
    %604 = math.tanh %603 : vector<16x32xf32>
    %605 = vector.extract_strided_slice %584 {offsets = [0, 96], sizes = [16, 32], strides = [1, 1]} : vector<16x128xf32> to vector<16x32xf32>
    %606 = math.tanh %605 : vector<16x32xf32>
    %607 = arith.mulf %598, %539 : vector<16x32xf32>
    %608 = arith.mulf %597, %604 : vector<16x32xf32>
    %609 = arith.addf %607, %608 : vector<16x32xf32>
    %610 = arith.mulf %601, %542 : vector<16x32xf32>
    %611 = arith.mulf %600, %606 : vector<16x32xf32>
    %612 = arith.addf %610, %611 : vector<16x32xf32>
    %613 = math.tanh %609 : vector<16x32xf32>
    %614 = arith.mulf %599, %613 : vector<16x32xf32>
    %615 = math.tanh %612 : vector<16x32xf32>
    %616 = arith.mulf %602, %615 : vector<16x32xf32>
    %617 = vector.broadcast %c6_i32_125 : i32 to vector<16x1xi32>
    %618 = arith.cmpi slt, %617, %0 : vector<16x1xi32>
    %619 = vector.broadcast %c6_i32_125 : i32 to vector<16x1xi32>
    %620 = arith.cmpi sge, %619, %2 : vector<16x1xi32>
    %cst_134 = arith.constant 0.000000e+00 : f32
    %621 = vector.shape_cast %618 : vector<16x1xi1> to vector<16x1xi1>
    %622 = vector.broadcast %621 : vector<16x1xi1> to vector<16x32xi1>
    %623 = vector.broadcast %cst_134 : f32 to vector<16x32xf32>
    %624 = arith.select %622, %614, %623 : vector<16x32xi1>, vector<16x32xf32>
    %625 = arith.addf %555, %624 : vector<16x32xf32>
    %cst_135 = arith.constant 0.000000e+00 : f32
    %626 = vector.shape_cast %620 : vector<16x1xi1> to vector<16x1xi1>
    %627 = vector.broadcast %626 : vector<16x1xi1> to vector<16x32xi1>
    %628 = vector.broadcast %cst_135 : f32 to vector<16x32xf32>
    %629 = arith.select %627, %616, %628 : vector<16x32xi1>, vector<16x32xf32>
    %630 = arith.addf %560, %629 : vector<16x32xf32>
    %cst_136 = arith.constant 0xFF800000 : f32
    %631 = vector.shape_cast %618 : vector<16x1xi1> to vector<16x1xi1>
    %632 = vector.broadcast %631 : vector<16x1xi1> to vector<16x32xi1>
    %633 = vector.broadcast %cst_136 : f32 to vector<16x32xf32>
    %634 = arith.select %632, %614, %633 : vector<16x32xi1>, vector<16x32xf32>
    %635 = arith.maximumf %565, %634 : vector<16x32xf32>
    %cst_137 = arith.constant 0xFF800000 : f32
    %636 = vector.shape_cast %620 : vector<16x1xi1> to vector<16x1xi1>
    %637 = vector.broadcast %636 : vector<16x1xi1> to vector<16x32xi1>
    %638 = vector.broadcast %cst_137 : f32 to vector<16x32xf32>
    %639 = arith.select %637, %616, %638 : vector<16x32xi1>, vector<16x32xf32>
    %640 = arith.maximumf %570, %639 : vector<16x32xf32>
    %c7_i32_138 = arith.constant 7 : i32
    %641 = arith.index_cast %c7_i32_138 : i32 to index
    %c0_139 = arith.constant 0 : index
    %c0_140 = arith.constant 0 : index
    %642 = vector.load %arg12[%641, %c0_139, %c0_140] : memref<8x16x128xbf16, #tpu.memory_space<vmem>>, vector<1x16x128xbf16>
    %643 = vector.shape_cast %642 : vector<1x16x128xbf16> to vector<16x128xbf16>
    %644 = arith.truncf %614 : vector<16x32xf32> to vector<16x32xbf16>
    %cst_141 = arith.constant dense<0.000000e+00> : vector<16x128xf32>
    %645 = tpu.matmul %644, %9, %cst_141 {dimension_numbers = #tpu.dot_dimension_numbers<[1], [0], [0], [1], [0, 0, 1, 1], [], []>} : vector<16x32xbf16>, vector<32x128xbf16>, vector<16x128xf32> -> vector<16x128xf32>
    %646 = arith.extf %643 : vector<16x128xbf16> to vector<16x128xf32>
    %647 = arith.addf %646, %645 : vector<16x128xf32>
    %648 = arith.index_cast %c7_i32_138 : i32 to index
    %c0_142 = arith.constant 0 : index
    %c0_143 = arith.constant 0 : index
    %649 = vector.load %arg13[%648, %c0_142, %c0_143] : memref<8x16x128xbf16, #tpu.memory_space<vmem>>, vector<1x16x128xbf16>
    %650 = vector.shape_cast %649 : vector<1x16x128xbf16> to vector<16x128xbf16>
    %651 = arith.truncf %616 : vector<16x32xf32> to vector<16x32xbf16>
    %cst_144 = arith.constant dense<0.000000e+00> : vector<16x128xf32>
    %652 = tpu.matmul %651, %10, %cst_144 {dimension_numbers = #tpu.dot_dimension_numbers<[1], [0], [0], [1], [0, 0, 1, 1], [], []>} : vector<16x32xbf16>, vector<32x128xbf16>, vector<16x128xf32> -> vector<16x128xf32>
    %653 = arith.extf %650 : vector<16x128xbf16> to vector<16x128xf32>
    %654 = arith.addf %653, %652 : vector<16x128xf32>
    %655 = vector.extract_strided_slice %647 {offsets = [0, 0], sizes = [16, 96], strides = [1, 1]} : vector<16x128xf32> to vector<16x96xf32>
    %656 = arith.negf %655 : vector<16x96xf32>
    %657 = math.exp %656 : vector<16x96xf32>
    %cst_145 = arith.constant 1.000000e+00 : f32
    %658 = vector.broadcast %cst_145 : f32 to vector<16x96xf32>
    %659 = arith.addf %658, %657 : vector<16x96xf32>
    %660 = arith.divf %658, %659 : vector<16x96xf32>
    %661 = vector.extract_strided_slice %654 {offsets = [0, 0], sizes = [16, 96], strides = [1, 1]} : vector<16x128xf32> to vector<16x96xf32>
    %662 = arith.negf %661 : vector<16x96xf32>
    %663 = math.exp %662 : vector<16x96xf32>
    %cst_146 = arith.constant 1.000000e+00 : f32
    %664 = vector.broadcast %cst_146 : f32 to vector<16x96xf32>
    %665 = arith.addf %664, %663 : vector<16x96xf32>
    %666 = arith.divf %664, %665 : vector<16x96xf32>
    %667 = vector.extract_strided_slice %660 {offsets = [0, 0], sizes = [16, 32], strides = [1, 1]} : vector<16x96xf32> to vector<16x32xf32>
    %668 = vector.extract_strided_slice %660 {offsets = [0, 32], sizes = [16, 32], strides = [1, 1]} : vector<16x96xf32> to vector<16x32xf32>
    %669 = vector.extract_strided_slice %660 {offsets = [0, 64], sizes = [16, 32], strides = [1, 1]} : vector<16x96xf32> to vector<16x32xf32>
    %670 = vector.extract_strided_slice %666 {offsets = [0, 0], sizes = [16, 32], strides = [1, 1]} : vector<16x96xf32> to vector<16x32xf32>
    %671 = vector.extract_strided_slice %666 {offsets = [0, 32], sizes = [16, 32], strides = [1, 1]} : vector<16x96xf32> to vector<16x32xf32>
    %672 = vector.extract_strided_slice %666 {offsets = [0, 64], sizes = [16, 32], strides = [1, 1]} : vector<16x96xf32> to vector<16x32xf32>
    %673 = vector.extract_strided_slice %647 {offsets = [0, 96], sizes = [16, 32], strides = [1, 1]} : vector<16x128xf32> to vector<16x32xf32>
    %674 = math.tanh %673 : vector<16x32xf32>
    %675 = vector.extract_strided_slice %654 {offsets = [0, 96], sizes = [16, 32], strides = [1, 1]} : vector<16x128xf32> to vector<16x32xf32>
    %676 = math.tanh %675 : vector<16x32xf32>
    %677 = arith.mulf %668, %609 : vector<16x32xf32>
    %678 = arith.mulf %667, %674 : vector<16x32xf32>
    %679 = arith.addf %677, %678 : vector<16x32xf32>
    %680 = arith.mulf %671, %612 : vector<16x32xf32>
    %681 = arith.mulf %670, %676 : vector<16x32xf32>
    %682 = arith.addf %680, %681 : vector<16x32xf32>
    %683 = math.tanh %679 : vector<16x32xf32>
    %684 = arith.mulf %669, %683 : vector<16x32xf32>
    %685 = math.tanh %682 : vector<16x32xf32>
    %686 = arith.mulf %672, %685 : vector<16x32xf32>
    %687 = vector.broadcast %c7_i32_138 : i32 to vector<16x1xi32>
    %688 = arith.cmpi slt, %687, %0 : vector<16x1xi32>
    %689 = vector.broadcast %c7_i32_138 : i32 to vector<16x1xi32>
    %690 = arith.cmpi sge, %689, %2 : vector<16x1xi32>
    %cst_147 = arith.constant 0.000000e+00 : f32
    %691 = vector.shape_cast %688 : vector<16x1xi1> to vector<16x1xi1>
    %692 = vector.broadcast %691 : vector<16x1xi1> to vector<16x32xi1>
    %693 = vector.broadcast %cst_147 : f32 to vector<16x32xf32>
    %694 = arith.select %692, %684, %693 : vector<16x32xi1>, vector<16x32xf32>
    %695 = arith.addf %625, %694 : vector<16x32xf32>
    %cst_148 = arith.constant 0.000000e+00 : f32
    %696 = vector.shape_cast %690 : vector<16x1xi1> to vector<16x1xi1>
    %697 = vector.broadcast %696 : vector<16x1xi1> to vector<16x32xi1>
    %698 = vector.broadcast %cst_148 : f32 to vector<16x32xf32>
    %699 = arith.select %697, %686, %698 : vector<16x32xi1>, vector<16x32xf32>
    %700 = arith.addf %630, %699 : vector<16x32xf32>
    %cst_149 = arith.constant 0xFF800000 : f32
    %701 = vector.shape_cast %688 : vector<16x1xi1> to vector<16x1xi1>
    %702 = vector.broadcast %701 : vector<16x1xi1> to vector<16x32xi1>
    %703 = vector.broadcast %cst_149 : f32 to vector<16x32xf32>
    %704 = arith.select %702, %684, %703 : vector<16x32xi1>, vector<16x32xf32>
    %705 = arith.maximumf %635, %704 : vector<16x32xf32>
    %cst_150 = arith.constant 0xFF800000 : f32
    %706 = vector.shape_cast %690 : vector<16x1xi1> to vector<16x1xi1>
    %707 = vector.broadcast %706 : vector<16x1xi1> to vector<16x32xi1>
    %708 = vector.broadcast %cst_150 : f32 to vector<16x32xf32>
    %709 = arith.select %707, %686, %708 : vector<16x32xi1>, vector<16x32xf32>
    %710 = arith.maximumf %640, %709 : vector<16x32xf32>
    %c8_i32_151 = arith.constant 8 : i32
    %711 = arith.sitofp %0 : vector<16x1xi32> to vector<16x1xf32>
    %cst_152 = arith.constant 1.000000e+00 : f32
    %712 = vector.broadcast %cst_152 : f32 to vector<16x1xf32>
    %713 = arith.divf %712, %711 : vector<16x1xf32>
    %714 = tpu.concatenate %695, %700 in 1 : vector<16x32xf32>, vector<16x32xf32> -> vector<16x64xf32>
    %715 = vector.broadcast %713 : vector<16x1xf32> to vector<16x64xf32>
    %716 = arith.mulf %714, %715 : vector<16x64xf32>
    %717 = tpu.concatenate %705, %710 in 1 : vector<16x32xf32>, vector<16x32xf32> -> vector<16x64xf32>
    %718 = tpu.concatenate %716, %717 in 1 : vector<16x64xf32>, vector<16x64xf32> -> vector<16x128xf32>
    %c0_153 = arith.constant 0 : index
    %c0_154 = arith.constant 0 : index
    %719 = vector.load %arg11[%c0_153, %c0_154] : memref<16x128xf32, #tpu.memory_space<vmem>>, vector<16x128xf32>
    tpu.vector_store %arg11[%c0_153, %c0_154], %718 {strides = array<i32>} : memref<16x128xf32, #tpu.memory_space<vmem>>, vector<16x128xf32>,
    return
  }
  func.func @transform_0(%arg0: i32) -> (i32, i32, i32) {
    %c0_i32 = arith.constant 0 : i32
    %c0_i32_0 = arith.constant 0 : i32
    %c0_i32_1 = arith.constant 0 : i32
    return %c0_i32, %arg0, %c0_i32_0 : i32, i32, i32
  }
  func.func @transform_1(%arg0: i32) -> (i32, i32) {
    %c0_i32 = arith.constant 0 : i32
    %c0_i32_0 = arith.constant 0 : i32
    return %arg0, %c0_i32 : i32, i32
  }
  func.func @transform_2(%arg0: i32) -> (i32, i32) {
    %c0_i32 = arith.constant 0 : i32
    %c0_i32_0 = arith.constant 0 : i32
    %c0_i32_1 = arith.constant 0 : i32
    return %c0_i32, %c0_i32_0 : i32, i32
  }
  func.func @transform_3(%arg0: i32) -> (i32, i32) {
    %c0_i32 = arith.constant 0 : i32
    %c0_i32_0 = arith.constant 0 : i32
    %c0_i32_1 = arith.constant 0 : i32
    return %c0_i32, %c0_i32_0 : i32, i32
  }
  func.func @transform_4(%arg0: i32) -> (i32, i32) {
    %c0_i32 = arith.constant 0 : i32
    %c0_i32_0 = arith.constant 0 : i32
    %c0_i32_1 = arith.constant 0 : i32
    return %c0_i32, %c0_i32_0 : i32, i32
  }
  func.func @transform_5(%arg0: i32) -> (i32, i32) {
    %c0_i32 = arith.constant 0 : i32
    %c0_i32_0 = arith.constant 0 : i32
    %c0_i32_1 = arith.constant 0 : i32
    return %c0_i32, %c0_i32_0 : i32, i32
  }
  func.func @transform_6(%arg0: i32) -> (i32, i32) {
    %c0_i32 = arith.constant 0 : i32
    %c0_i32_0 = arith.constant 0 : i32
    %c0_i32_1 = arith.constant 0 : i32
    return %c0_i32, %c0_i32_0 : i32, i32
  }
  func.func @transform_7(%arg0: i32) -> (i32, i32) {
    %c0_i32 = arith.constant 0 : i32
    %c0_i32_0 = arith.constant 0 : i32
    %c0_i32_1 = arith.constant 0 : i32
    return %c0_i32, %c0_i32_0 : i32, i32
  }
  func.func @transform_8(%arg0: i32) -> (i32, i32) {
    %c0_i32 = arith.constant 0 : i32
    %c0_i32_0 = arith.constant 0 : i32
    %c0_i32_1 = arith.constant 0 : i32
    return %c0_i32, %c0_i32_0 : i32, i32
  }
  func.func @transform_9(%arg0: i32) -> (i32, i32) {
    %c0_i32 = arith.constant 0 : i32
    %c0_i32_0 = arith.constant 0 : i32
    %c0_i32_1 = arith.constant 0 : i32
    return %c0_i32, %c0_i32_0 : i32, i32
  }
  func.func @transform_10(%arg0: i32) -> (i32, i32) {
    %c0_i32 = arith.constant 0 : i32
    %c0_i32_0 = arith.constant 0 : i32
    return %arg0, %c0_i32 : i32, i32
  }
}

</mosaic_0001>

<bundles_post_ra>
// kernel: inference_composition_layer.1
= control target key start
LH: loop header
LB: loop body
LE: loop exit
PB: predicated region body
PF: predicated region fallthrough
CT: control target
= control target key end

     0   :  { %vm4939_vm0 = vcmask 261120   ;;  %v3729_v14 = vmov 0.0   ;;  %v3730_v15 = vmov 0   ;;  %vm3731_vm3 = vmmov 0   ;;  %s4922_s2 = inlined_call_operand.vmem [shape: bf16[32,32], index: 2, kind: input, shape index: {}]   ;;  %s4923_s0 = inlined_call_operand.vmem [shape: bf16[8,16,32], index: 0, kind: input, shape index: {}]   ;;  %s4924_s6 = inlined_call_operand.vmem [shape: bf16[32,128], index: 6, kind: input, shape index: {}]   ;;  %s4925_s4 = inlined_call_operand.vmem [shape: bf16[32,128], index: 4, kind: input, shape index: {}]   ;;  %s4926_s8 = inlined_call_operand.vmem [shape: bf16[32,128], index: 8, kind: input, shape index: {}]   ;;  %s4927_s9 = inlined_call_operand.vmem [shape: bf16[32,128], index: 9, kind: input, shape index: {}]   ;;  %s4928_s1 = inlined_call_operand.vmem [shape: s32[16,1], index: 1, kind: input, shape index: {}]   ;;  %s4929_s3 = inlined_call_operand.vmem [shape: f32[1,32], index: 3, kind: input, shape index: {}]   ;;  %s4930_s5 = inlined_call_operand.vmem [shape: f32[1,128], index: 5, kind: input, shape index: {}]   ;;  %s4931_s7 = inlined_call_operand.vmem [shape: f32[1,128], index: 7, kind: input, shape index: {}]   ;;  %s4932_s10 = inlined_call_operand.vmem [shape: f32[16,128], index: 10, kind: output, shape index: {}]  }
   0x1   :  { %v3443_v0 = vld [vmem:[%s4922_s2 + $0x8] sm:$0xff]   ;;  %v3444_v1 = vld [vmem:[%s4922_s2] sm:$0xff]   ;;  %v3447_v4 = vld [vmem:[%s4923_s0 + $0x10] sm:$0xff]   ;;  %3441 = vset.pattern.permute.xlu0 %v3730_v15  ;;  %3442 = vset.pattern.permute.xlu1 %v3730_v15 }
   0x2   :  { %3247 = vmatprep.subr.bf16.mxu0 %v3443_v0  ;;  %v3445_v2 = vld [vmem:[%s4923_s0] sm:$0xff]   ;;  %v3446_v3 = vld [vmem:[%s4923_s0 + $0x8] sm:$0xff]   ;;  %v3448_v6 = vld [vmem:[%s4923_s0 + $0x18] sm:$0xff]  }
   0x3   :  { %3248 = vmatpush3.bf16.msra.mxu0 %v3443_v0  ;;  %3251 = vmatprep.mubr.msk.bf16.mxu0 %vm4939_vm0, %v3445_v2  ;;  %v3453_v5 = vld [vmem:[%s4924_s6 + $0x8] sm:$0xff]   ;;  %v3449_v7 = vld [vmem:[%s4923_s0 + $0x20] sm:$0xff]   ;;  %v3451_v9 = vld [vmem:[%s4923_s0 + $0x30] sm:$0xff]  }
   0x4   :  { %3249 = vmatprep.subr.bf16.mxu0 %v3444_v1  ;;  %v3450_v8 = vld [vmem:[%s4923_s0 + $0x28] sm:$0xff]   ;;  %v3452_v10 = vld [vmem:[%s4923_s0 + $0x38] sm:$0xff]   ;;  %v3455_v12 = vld [vmem:[%s4924_s6] sm:$0xff]  }
   0x5   :  { %v3454_v11 = vld [vmem:[%s4925_s4 + $0x8] sm:$0xff]   ;;  %v3456_v13 = vld [vmem:[%s4925_s4] sm:$0xff]  }
   0x6   :  { %3267 = vmatprep.subr.bf16.mxu1 %v3454_v11  ;;  %v3847_v16 = vld [vmem:[%s4928_s1] sm:$0xff]  ;;  %v3852_v17 = vld [vmem:[%s4928_s1 + $0x8] sm:$0xff] }
   0x7   :  { %3250 = vmatpush3.bf16.msra.mxu0 %v3444_v1  ;;  %3268 = vmatpush3.bf16.msra.mxu1 %v3454_v11  ;;  %vm798_vm1 = vcmp.le.s32.totalorder %v3847_v16, 7  ;;  %vm799_vm2 = vcmp.le.s32.totalorder %v3852_v17, 7  ;;  %v2863_v23 = vld [vmem:[%s4929_s3] ss:$0 sm:$0xff]  ;;  %v3864_v31 = vld [vmem:[%s4926_s8 + $0x8] sm:$0xff]   ;;  %vm771_vm10 = vcmp.le.s32.totalorder %v3847_v16, 6 }
   0x8   :  { %3287 = vmatprep.subr.bf16.mxu0 %v3453_v5  ;;  %3269 = vmatprep.subr.bf16.mxu1 %v3456_v13  ;;  %v800_v18 = vsel %vm798_vm1, 1, %v3730_v15  ;;  %v801_v19 = vsel %vm799_vm2, 1, %v3730_v15  ;;  %v3874_v35 = vld [vmem:[%s4926_s8] sm:$0xff]   ;;  %v3902_v63 = vld [vmem:[%s4927_s9 + $0x8] sm:$0xff]   ;;  %vm772_vm11 = vcmp.le.s32.totalorder %v3852_v17, 6  ;;  %vm744_vm1 = vcmp.le.s32.totalorder %v3847_v16, 5 }
   0x9   :  { %803 = vperm.xlu0 %3441, %v800_v18   ;;  %v3909_v0 = vld [vmem:[%s4927_s9] sm:$0xff]   ;;  %vm745_vm2 = vcmp.le.s32.totalorder %v3852_v17, 5 }
   0xa   :  { %3252 = vmatmul.mubr.msk.bf16.vlgmr.msra.gmra.mxu0 %vm4939_vm0, %v3446_v3  ;;  %v3926_v1 = vld [vmem:[%s4930_s5] ss:$0 sm:$0xff]  ;;  %s3732_s5 = smov 32   ;;  %v747_v16 = vsel %vm745_vm2, 1, %v3730_v15 }
   0xb   :  { %3255 = vmatprep.mubr.msk.bf16.mxu0 %vm4939_vm0, %v3447_v4  ;;  %3288 = vmatpush3.bf16.msra.mxu0 %v3453_v5  ;;  %v3931_v2 = vld [vmem:[%s4931_s7] ss:$0 sm:$0xff]  ;;  %s3733_s7 = smov 64  }
   0xc   :  { %3289 = vmatprep.subr.bf16.mxu0 %v3455_v12  ;;  %3270 = vmatpush3.bf16.msra.mxu1 %v3456_v13 }
   0xd   :  { %3307 = vmatprep.subr.bf16.mxu1 %v3729_v14  ;;  %806 = vperm.xlu0 %3441, %v801_v19  }
   0xf   :  { %3290 = vmatpush3.bf16.msra.mxu0 %v3455_v12 }
  0x10   :  { %3339 = vmatprep.subr.bf16.mxu0 %v3729_v14 }
  0x12   :  { %3256 = vmatmul.mubr.msk.bf16.gmra.mxu0 %vm4939_vm0, %v3448_v6 }
  0x13   :  { %3259 = vmatprep.mubr.msk.bf16.mxu0 %vm4939_vm0, %v3449_v7 }
  0x1a   :  { %3260 = vmatmul.mubr.msk.bf16.gmra.mxu0 %vm4939_vm0, %v3450_v8 }
  0x1b   :  { %3263 = vmatprep.mubr.msk.bf16.mxu0 %vm4939_vm0, %v3451_v9 }
  0x22   :  { %3264 = vmatmul.mubr.msk.bf16.gmra.mxu0 %vm4939_vm0, %v3452_v10 }
  0xca   :  { %v3253_v20 = vpop.f32.mrf.mxu0 }
  0xcb   :  { %v211_v28 = vadd.f32 %v3253_v20, %v2863_v23 }
  0xcc   :  { %v202_v21 = vpop.f32.mrf.mxu0 }
  0xcd   :  { %v203_v26 = vadd.f32 %v2863_v23, %v202_v21 }
  0xce   :  { %v3254_v22 = vpop.f32.mrf.mxu0 }
  0xcf   :  { %v214_v24 = vadd.f32 %v3254_v22, %v2863_v23 }
  0xd0   :  { %v205_v25 = vpop.f32.mrf.mxu0 }
  0xd1   :  { %v206_v27 = vadd.f32 %v2863_v23, %v205_v25  ;;  %v266_v32 = vpack.c.bf16 %v214_v24, %v211_v28 }
  0xd2   :  { %v3257_v29 = vpop.f32.mrf.mxu0 }
  0xd3   :  { %v265_v30 = vpack.c.bf16 %v206_v27, %v203_v26  ;;  %v227_v40 = vadd.f32 %v3257_v29, %v2863_v23 }
  0xd4   :  { %v218_v33 = vpop.f32.mrf.mxu0 }
  0xd5   :  { %3271 = vmatprep.mubr.msk.bf16.mxu1 %vm4939_vm0, %v265_v30  ;;  %3291 = vmatprep.mubr.msk.bf16.mxu0 %vm4939_vm0, %v265_v30  ;;  %v219_v38 = vadd.f32 %v2863_v23, %v218_v33 }
  0xd6   :  { %v3258_v34 = vpop.f32.mrf.mxu0  ;;  %3272 = vmatmul.mubr.msk.bf16.vlgmr.msra.gmra.mxu1 %vm4939_vm0, %v266_v32  ;;  %3292 = vmatmul.mubr.msk.bf16.vlgmr.msra.gmra.mxu0 %vm4939_vm0, %v266_v32 }
  0xd7   :  { %3308 = vmatpush3.bf16.msra.mxu1 %v3864_v31  ;;  %3340 = vmatpush3.bf16.msra.mxu0 %v3864_v31  ;;  %v230_v36 = vadd.f32 %v3258_v34, %v2863_v23 }
  0xd8   :  { %v221_v37 = vpop.f32.mrf.mxu0  ;;  %3309 = vmatprep.subr.bf16.mxu1 %v3729_v14  ;;  %3341 = vmatprep.subr.bf16.mxu0 %v3729_v14 }
  0xd9   :  { %v222_v39 = vadd.f32 %v2863_v23, %v221_v37  ;;  %v268_v43 = vpack.c.bf16 %v230_v36, %v227_v40 }
  0xda   :  { %v3261_v41 = vpop.f32.mrf.mxu0 }
  0xdb   :  { %v267_v42 = vpack.c.bf16 %v222_v39, %v219_v38  ;;  %3310 = vmatpush3.bf16.msra.mxu1 %v3874_v35  ;;  %3342 = vmatpush3.bf16.msra.mxu0 %v3874_v35  ;;  %v243_v50 = vadd.f32 %v3261_v41, %v2863_v23 }
  0xdc   :  { %v234_v44 = vpop.f32.mrf.mxu0  ;;  %3315 = vmatprep.subr.bf16.mxu1 %v3729_v14  ;;  %3355 = vmatprep.subr.bf16.mxu0 %v3729_v14 }
  0xdd   :  { %3275 = vmatprep.mubr.msk.bf16.mxu1 %vm4939_vm0, %v267_v42  ;;  %3295 = vmatprep.mubr.msk.bf16.mxu0 %vm4939_vm0, %v267_v42  ;;  %v235_v48 = vadd.f32 %v2863_v23, %v234_v44 }
  0xde   :  { %v3262_v45 = vpop.f32.mrf.mxu0  ;;  %3276 = vmatmul.mubr.msk.bf16.gmra.mxu1 %vm4939_vm0, %v268_v43  ;;  %3296 = vmatmul.mubr.msk.bf16.gmra.mxu0 %vm4939_vm0, %v268_v43 }
  0xdf   :  { %v246_v46 = vadd.f32 %v3262_v45, %v2863_v23 }
  0xe0   :  { %v237_v47 = vpop.f32.mrf.mxu0 }
  0xe1   :  { %v238_v49 = vadd.f32 %v2863_v23, %v237_v47  ;;  %v270_v53 = vpack.c.bf16 %v246_v46, %v243_v50  ;;  %v63_v46 = vlaneseq  ;;  %v804_v47 = vpop.permute.xlu0 %803 }
  0xe2   :  { %v3265_v51 = vpop.f32.mrf.mxu0  ;;  %vm808_vm6 = vcmp.eq.s32.totalorder %v804_v47, 1 }
  0xe3   :  { %v269_v52 = vpack.c.bf16 %v238_v49, %v235_v48  ;;  %v259_v60 = vadd.f32 %v3265_v51, %v2863_v23 }
  0xe4   :  { %v250_v54 = vpop.f32.mrf.mxu0 }
  0xe5   :  { %3279 = vmatprep.mubr.msk.bf16.mxu1 %vm4939_vm0, %v269_v52  ;;  %3299 = vmatprep.mubr.msk.bf16.mxu0 %vm4939_vm0, %v269_v52  ;;  %v251_v58 = vadd.f32 %v2863_v23, %v250_v54 }
  0xe6   :  { %v3266_v55 = vpop.f32.mrf.mxu0  ;;  %3280 = vmatmul.mubr.msk.bf16.gmra.mxu1 %vm4939_vm0, %v270_v53  ;;  %3300 = vmatmul.mubr.msk.bf16.gmra.mxu0 %vm4939_vm0, %v270_v53 }
  0xe7   :  { %v262_v56 = vadd.f32 %v3266_v55, %v2863_v23 }
  0xe8   :  { %v253_v57 = vpop.f32.mrf.mxu0 }
  0xe9   :  { %v254_v59 = vadd.f32 %v2863_v23, %v253_v57  ;;  %v272_v62 = vpack.c.bf16 %v262_v56, %v259_v60  ;;  %v3981_v56 = vand.u32 127, %v63_v46 }
  0xeb   :  { %v271_v61 = vpack.c.bf16 %v254_v59, %v251_v58  ;;  %vm65_vm4 = vcmp.lt.s32.totalorder %v3981_v56, 64  ;;  %vm66_vm7 = vcmp.lt.s32.totalorder %v3981_v56, 32 }
  0xec   :  { %vm810_vm9 = vmand %vm808_vm6, %vm65_vm4 }
  0xed   :  { %3283 = vmatprep.mubr.msk.bf16.mxu1 %vm4939_vm0, %v271_v61  ;;  %3303 = vmatprep.mubr.msk.bf16.mxu0 %vm4939_vm0, %v271_v61 }
  0xee   :  { %3284 = vmatmul.mubr.msk.bf16.gmra.mxu1 %vm4939_vm0, %v272_v62  ;;  %3304 = vmatmul.mubr.msk.bf16.gmra.mxu0 %vm4939_vm0, %v272_v62 }
  0xef   :  { %3311 = vmatprep.mubr.msk.bf16.mxu1 %vm3731_vm3, %v3729_v14  ;;  %3343 = vmatprep.mubr.msk.bf16.mxu0 %vm3731_vm3, %v3729_v14 }
  0xf6   :  { %3312 = vmatmul.mubr.bf16.vlgmr.msra.gmra.mxu1 %v3730_v15 }
  0xf7   :  { %3316 = vmatpush3.bf16.msra.mxu1 %v3902_v63  ;;  %3319 = vmatprep.mubr.msk.bf16.mxu1 %vm3731_vm3, %v3729_v14 }
  0xf8   :  { %3317 = vmatprep.subr.bf16.mxu1 %v3729_v14 }
  0xfb   :  { %3318 = vmatpush3.bf16.msra.mxu1 %v3909_v0 }
  0xfc   :  { %3323 = vmatprep.subr.bf16.mxu1 %v3729_v14 }
  0xfe   :  { %3320 = vmatmul.mubr.bf16.vlgmr.msra.gmra.mxu1 %v3730_v15 }
  0xff   :  { %3324 = vmatpush3.bf16.msra.mxu1 %v3864_v31  ;;  %3327 = vmatprep.mubr.msk.bf16.mxu1 %vm3731_vm3, %v3729_v14 }
 0x100   :  { %3325 = vmatprep.subr.bf16.mxu1 %v3729_v14 }
 0x103   :  { %3326 = vmatpush3.bf16.msra.mxu1 %v3874_v35 }
 0x104   :  { %3331 = vmatprep.subr.bf16.mxu1 %v3729_v14 }
 0x196   :  { %v3273_v3 = vpop.f32.mrf.mxu1  ;;  %v3293_v4 = vpop.f32.mrf.mxu0 }
 0x197   :  { %v358_v5 = vadd.f32 %v3273_v3, %v3926_v1  ;;  %v3935_v6 = vadd.f32 %v3293_v4, %v3931_v2  ;;  %v807_v3 = vpop.permute.xlu0 %806 }
 0x198   :  { %v349_v7 = vpop.f32.mrf.mxu1  ;;  %v464_v8 = vpop.f32.mrf.mxu0  ;;  %vm809_vm5 = vcmp.eq.s32.totalorder %v807_v3, 1 }
 0x199   :  { %v3938_v9 = vadd.f32 %v3931_v2, %v464_v8  ;;  %v350_v8 = vadd.f32 %v3926_v1, %v349_v7  ;;  %v67_v7 = vsel %vm65_vm4, 30.0, %v3729_v14  ;;  %vm4005_vm8 = vmand %vm809_vm5, %vm65_vm4 }
 0x19a   :  { %v3274_v10 = vpop.f32.mrf.mxu1  ;;  %v3294_v11 = vpop.f32.mrf.mxu0 }
 0x19b   :  { %v361_v12 = vadd.f32 %v3274_v10, %v3926_v1  ;;  %v3942_v13 = vadd.f32 %v3294_v11, %v3931_v2 }
 0x19c   :  { %v352_v18 = vpop.f32.mrf.mxu1  ;;  %v467_v19 = vpop.f32.mrf.mxu0 }
 0x19d   :  { %v3944_v20 = vpack.c.bf16 %v361_v12, %v358_v5  ;;  %v3947_v21 = vadd.f32 %v3931_v2, %v467_v19  ;;  %v353_v59 = vadd.f32 %v3926_v1, %v352_v18 }
 0x19e   :  { %v3277_v22 = vpop.f32.mrf.mxu1  ;;  %v3297_v23 = vpop.f32.mrf.mxu0 }
 0x19f   :  { %v374_v24 = vadd.f32 %v3277_v22, %v3926_v1  ;;  %v3951_v25 = vadd.f32 %v3297_v23, %v3931_v2  ;;  %v3021_v19 = vpack.c.bf16 %v353_v59, %v350_v8 }
 0x1a0   :  { %v365_v26 = vpop.f32.mrf.mxu1  ;;  %v480_v27 = vpop.f32.mrf.mxu0 }
 0x1a1   :  { %v366_v28 = vadd.f32 %v3926_v1, %v365_v26  ;;  %v3955_v29 = vadd.f32 %v3931_v2, %v480_v27 }
 0x1a2   :  { %v3278_v30 = vpop.f32.mrf.mxu1  ;;  %v3298_v32 = vpop.f32.mrf.mxu0 }
 0x1a3   :  { %v377_v33 = vadd.f32 %v3278_v30, %v3926_v1  ;;  %v3959_v34 = vadd.f32 %v3298_v32, %v3931_v2 }
 0x1a4   :  { %v368_v36 = vpop.f32.mrf.mxu1  ;;  %v483_v37 = vpop.f32.mrf.mxu0 }
 0x1a5   :  { %v3961_v38 = vpack.c.bf16 %v377_v33, %v374_v24  ;;  %v369_v39 = vadd.f32 %v3926_v1, %v368_v36  ;;  %v3965_v40 = vadd.f32 %v3931_v2, %v483_v37  ;;  %v4014_v36 = vsel %vm66_vm7, -30.0, %v67_v7 }
 0x1a6   :  { %v3281_v41 = vpop.f32.mrf.mxu1  ;;  %v3301_v42 = vpop.f32.mrf.mxu0 }
 0x1a7   :  { %v3967_v43 = vpack.c.bf16 %v369_v39, %v366_v28  ;;  %v390_v44 = vadd.f32 %v3281_v41, %v3926_v1  ;;  %v3971_v45 = vadd.f32 %v3301_v42, %v3931_v2  ;;  %v3100_v41 = vunpack.c.l.bf16 %v3021_v19 }
 0x1a8   :  { %v381_v48 = vpop.f32.mrf.mxu1  ;;  %v496_v49 = vpop.f32.mrf.mxu0 }
 0x1a9   :  { %v382_v50 = vadd.f32 %v3926_v1, %v381_v48  ;;  %v3975_v51 = vadd.f32 %v3931_v2, %v496_v49 }
 0x1aa   :  { %v3282_v52 = vpop.f32.mrf.mxu1  ;;  %v3302_v53 = vpop.f32.mrf.mxu0 }
 0x1ab   :  { %v393_v54 = vadd.f32 %v3282_v52, %v3926_v1  ;;  %v3979_v55 = vadd.f32 %v3302_v53, %v3931_v2 }
 0x1ac   :  { %v384_v57 = vpop.f32.mrf.mxu1  ;;  %v499_v58 = vpop.f32.mrf.mxu0 }
 0x1ad   :  { %v3984_v60 = vpack.c.bf16 %v393_v54, %v390_v44  ;;  %v385_v61 = vadd.f32 %v3926_v1, %v384_v57  ;;  %v3988_v62 = vadd.f32 %v3931_v2, %v499_v58 }
 0x1ae   :  { %v3285_v4 = vpop.f32.mrf.mxu1  ;;  %v3305_v5 = vpop.f32.mrf.mxu0 }
 0x1af   :  { %v3991_v10 = vpack.c.bf16 %v385_v61, %v382_v50  ;;  %v406_v11 = vadd.f32 %v3285_v4, %v3926_v1  ;;  %v521_v32 = vadd.f32 %v3305_v5, %v3931_v2  ;;  %v3101_v50 = vunpack.c.h.bf16 %v3021_v19 }
 0x1b0   :  { %v397_v12 = vpop.f32.mrf.mxu1  ;;  %v512_v18 = vpop.f32.mrf.mxu0 }
 0x1b1   :  { %v398_v22 = vadd.f32 %v3926_v1, %v397_v12  ;;  %v3997_v23 = vadd.f32 %v3931_v2, %v512_v18  ;;  %v812_v48 = vsel %vm810_vm9, %v4014_v36, %v521_v32 }
 0x1b2   :  { %v3286_v24 = vpop.f32.mrf.mxu1  ;;  %v3306_v26 = vpop.f32.mrf.mxu0 }
 0x1b3   :  { %v409_v28 = vadd.f32 %v3286_v24, %v3926_v1  ;;  %v524_v30 = vadd.f32 %v3306_v26, %v3931_v2 }
 0x1b4   :  { %v400_v33 = vpop.f32.mrf.mxu1 }
 0x1b5   :  { %v4016_v37 = vpack.c.bf16 %v409_v28, %v406_v11  ;;  %v401_v39 = vadd.f32 %v3926_v1, %v400_v33  ;;  %v813_v42 = vsel %vm4005_vm8, %v4014_v36, %v524_v30 }
 0x1b6   :  { %v875_v44 = vpop.f32.mrf.mxu1  ;;  %v3096_v52 = vpack.c.bf16 %v813_v42, %v812_v48 }
 0x1b7   :  { %v4022_v46 = vpack.c.bf16 %v401_v39, %v398_v22  ;;  %v884_v47 = vadd.f32 %v3100_v41, %v875_v44 }
 0x1b8   :  { %v3313_v49 = vpop.f32.mrf.mxu1  ;;  %v3104_v1 = vunpack.c.l.bf16 %v3096_v52  ;;  %v3105_v3 = vunpack.c.h.bf16 %v3096_v52 }
 0x1b9   :  { %3461 = vtanh.f32 %v884_v47  ;;  %v2940_v22 = vmul.f32 -1.442695, %v884_v47 }
 0x1ba   :  { %v878_v53 = vpop.f32.mrf.mxu1 }
 0x1bb   :  { %v885_v54 = vadd.f32 %v3101_v50, %v878_v53 }
 0x1bc   :  { %v3314_v57 = vpop.f32.mrf.mxu1 }
 0x1bd   :  { %3463 = vtanh.f32 %v885_v54  ;;  %v2941_v7 = vmul.f32 -1.442695, %v885_v54 }
 0x1be   :  { %v934_v58 = vpop.f32.mrf.mxu1 }
 0x1bf   :  { %v943_v59 = vadd.f32 %v3104_v1, %v934_v58 }
 0x1c0   :  { %v3321_v61 = vpop.f32.mrf.mxu1 }
 0x1c1   :  { %3465 = vtanh.f32 %v943_v59  ;;  %v2942_v24 = vmul.f32 -1.442695, %v943_v59 }
 0x1c2   :  { %v937_v4 = vpop.f32.mrf.mxu1 }
 0x1c3   :  { %v944_v5 = vadd.f32 %v3105_v3, %v937_v4 }
 0x1c4   :  { %v3322_v8 = vpop.f32.mrf.mxu1 }
 0x1c5   :  { %3467 = vtanh.f32 %v944_v5  ;;  %v2943_v26 = vmul.f32 -1.442695, %v944_v5 }
 0x1c6   :  { %v3462_v11 = vpop.eup %3461  ;;  %3469 = vpow2.f32 %v2940_v22 }
 0x1c7   :  { %977 = vrot.lane.b32.xlu1 %v3462_v11, %s3732_s5  ;;  %3471 = vpow2.f32 %v2941_v7 }
 0x1c8   :  { %3473 = vpow2.f32 %v2942_v24 }
 0x1c9   :  { %3475 = vpow2.f32 %v2943_v26 }
 0x1ca   :  { %v3464_v12 = vpop.eup %3463 }
 0x1cb   :  { %979 = vrot.lane.b32.xlu1 %v3464_v12, %s3732_s5 }
 0x1ce   :  { %v3466_v18 = vpop.eup %3465 }
 0x1cf   :  { %999 = vrot.lane.b32.xlu0 %v3466_v18, %s3732_s5 }
 0x1d2   :  { %v3468_v19 = vpop.eup %3467 }
 0x1d3   :  { %1001 = vrot.lane.b32.xlu1 %v3468_v19, %s3732_s5  ;;  %v3470_v27 = vpop.eup %3469 }
 0x1d4   :  { %v951_v28 = vadd.f32 1.0, %v3470_v27  ;;  %v3472_v30 = vpop.eup %3471 }
 0x1d5   :  { %v952_v32 = vadd.f32 1.0, %v3472_v30  ;;  %v3474_v33 = vpop.eup %3473 }
 0x1d6   :  { %3477 = vrcp.f32 %v951_v28  ;;  %v963_v39 = vadd.f32 1.0, %v3474_v33  ;;  %v3476_v41 = vpop.eup %3475 }
 0x1d7   :  { %3479 = vrcp.f32 %v952_v32  ;;  %v964_v42 = vadd.f32 1.0, %v3476_v41 }
 0x1d8   :  { %3481 = vrcp.f32 %v963_v39 }
 0x1d9   :  { %3483 = vrcp.f32 %v964_v42 }
 0x1e3   :  { %v3478_v44 = vpop.eup %3477 }
 0x1e4   :  { %v3480_v49 = vpop.eup %3479  ;;  %v973_v61 = vmul.f32 0.0, %v3478_v44 }
 0x1e5   :  { %v3482_v53 = vpop.eup %3481  ;;  %v974_v5 = vmul.f32 0.0, %v3480_v49 }
 0x1e6   :  { %v3484_v1 = vpop.eup %3483  ;;  %v995_v12 = vmul.f32 0.0, %v3482_v53 }
 0x1e7   :  { %v996_v22 = vmul.f32 0.0, %v3484_v1 }
 0x239   :  { %v978_v47 = vpop.permute.xlu1 %977 }
 0x23a   :  { %v983_v48 = vmul.f32 %v3478_v44, %v978_v47 }
 0x23c   :  { %987 = vrot.lane.b32.xlu0 %v983_v48, %s3732_s5  ;;  %v773_v48 = vsel %vm771_vm10, 1, %v3730_v15 }
 0x23d   :  { %v980_v50 = vpop.permute.xlu1 %979 }
 0x23e   :  { %v984_v52 = vmul.f32 %v3480_v49, %v980_v50 }
 0x240   :  { %989 = vrot.lane.b32.xlu1 %v984_v52, %s3732_s5 }
 0x241   :  { %v1000_v54 = vpop.permute.xlu0 %999 }
 0x242   :  { %v1005_v57 = vmul.f32 %v3482_v53, %v1000_v54 }
 0x244   :  { %1009 = vrot.lane.b32.xlu0 %v1005_v57, %s3732_s5 }
 0x245   :  { %v1002_v58 = vpop.permute.xlu1 %1001 }
 0x246   :  { %v1006_v59 = vmul.f32 %v3484_v1, %v1002_v58  ;;  %v515_v58 = vpop.f32.mrf.mxu0 }
 0x248   :  { %1011 = vrot.lane.b32.xlu1 %v1006_v59, %s3732_s5 }
 0x2ae   :  { %v988_v3 = vpop.permute.xlu0 %987 }
 0x2af   :  { %v4033_v4 = vadd.f32 %v988_v3, %v973_v61  ;;  %v516_v61 = vadd.f32 %v3931_v2, %v515_v58 }
 0x2b1   :  { %3485 = vtanh.f32 %v4033_v4 }
 0x2b2   :  { %v990_v8 = vpop.permute.xlu1 %989 }
 0x2b3   :  { %v4036_v11 = vadd.f32 %v990_v8, %v974_v5 }
 0x2b5   :  { %3487 = vtanh.f32 %v4036_v11 }
 0x2b6   :  { %v1010_v18 = vpop.permute.xlu0 %1009 }
 0x2b7   :  { %v4039_v19 = vadd.f32 %v1010_v18, %v995_v12  ;;  %v3108_v12 = vunpack.c.l.bf16 %v3944_v20 }
 0x2b9   :  { %3489 = vtanh.f32 %v4039_v19 }
 0x2ba   :  { %v1012_v7 = vpop.permute.xlu1 %1011 }
 0x2bb   :  { %v4042_v24 = vadd.f32 %v1012_v7, %v996_v22 }
 0x2bd   :  { %3491 = vtanh.f32 %v4042_v24 }
 0x2be   :  { %v3486_v26 = vpop.eup %3485 }
 0x2bf   :  { %1021 = vrot.lane.b32.xlu0 %v3486_v26, %s3732_s5  ;;  %v3109_v26 = vunpack.c.h.bf16 %v3944_v20 }
 0x2c2   :  { %v3488_v27 = vpop.eup %3487 }
 0x2c3   :  { %1023 = vrot.lane.b32.xlu1 %v3488_v27, %s3732_s5 }
 0x2c6   :  { %v3490_v28 = vpop.eup %3489 }
 0x2c7   :  { %1033 = vrot.lane.b32.xlu0 %v3490_v28, %s3732_s5 }
 0x2ca   :  { %v3492_v30 = vpop.eup %3491 }
 0x2cb   :  { %1035 = vrot.lane.b32.xlu1 %v3492_v30, %s3732_s5 }
 0x331   :  { %v1022_v32 = vpop.permute.xlu0 %1021 }
 0x332   :  { %v4049_v39 = vmul.f32 %v3478_v44, %v1022_v32 }
 0x335   :  { %v1024_v33 = vpop.permute.xlu1 %1023 }
 0x336   :  { %v4051_v41 = vmul.f32 %v3480_v49, %v1024_v33  ;;  %v774_v49 = vsel %vm772_vm11, 1, %v3730_v15 }
 0x338   :  { %v1080_v42 = vpack.c.bf16 %v4051_v41, %v4049_v39 }
 0x339   :  { %v1034_v47 = vpop.permute.xlu0 %1033 }
 0x33a   :  { %1082 = vrot.lane.b32.xlu0 %v1080_v42, %s3733_s7  ;;  %v4058_v52 = vmul.f32 %v3482_v53, %v1034_v47 }
 0x33d   :  { %v1036_v50 = vpop.permute.xlu1 %1035 }
 0x33e   :  { %v4060_v54 = vmul.f32 %v3484_v1, %v1036_v50  ;;  %776 = vperm.xlu0 %3441, %v773_v48  }
 0x340   :  { %v1134_v44 = vpack.c.bf16 %v4060_v54, %v4058_v52 }
 0x342   :  { %1136 = vrot.lane.b32.xlu1 %v1134_v44, %s3733_s7 }
 0x346   :  { %779 = vperm.xlu1 %3442, %v774_v49  }
 0x3ac   :  { %v1083_v57 = vpop.permute.xlu0 %1082 }
 0x3ad   :  { %3328 = vmatmul.mubr.msk.bf16.vlgmr.msra.gmra.mxu1 %vm4939_vm0, %v1083_v57 }
 0x3ae   :  { %3332 = vmatpush3.bf16.msra.mxu1 %v3902_v63  ;;  %3335 = vmatprep.mubr.msk.bf16.mxu1 %vm3731_vm3, %v3729_v14 }
 0x3af   :  { %3333 = vmatprep.subr.bf16.mxu1 %v3729_v14 }
 0x3b2   :  { %3334 = vmatpush3.bf16.msra.mxu1 %v3909_v0 }
 0x3b3   :  { %3347 = vmatprep.subr.bf16.mxu1 %v3729_v14 }
 0x3b4   :  { %v1137_v53 = vpop.permute.xlu1 %1136 }
 0x3b5   :  { %3336 = vmatmul.mubr.msk.bf16.vlgmr.msra.gmra.mxu1 %vm4939_vm0, %v1137_v53 }
 0x3b6   :  { %3348 = vmatpush3.bf16.msra.mxu1 %v3902_v63  ;;  %3351 = vmatprep.mubr.msk.bf16.mxu1 %vm3731_vm3, %v3729_v14 }
 0x3b7   :  { %3349 = vmatprep.subr.bf16.mxu1 %v3729_v14 }
 0x3b9   :  { %v777_v1 = vpop.permute.xlu0 %776 }
 0x3ba   :  { %3350 = vmatpush3.bf16.msra.mxu1 %v3909_v0  ;;  %vm781_vm12 = vcmp.eq.s32.totalorder %v777_v1, 1 }
 0x3bb   :  { %3363 = vmatprep.subr.bf16.mxu1 %v3729_v14  ;;  %vm783_vm13 = vmand %vm781_vm12, %vm65_vm4 }
 0x3bc   :  { %v785_v3 = vsel %vm783_vm13, %v4014_v36, %v3997_v23 }
 0x3c1   :  { %v780_v59 = vpop.permute.xlu1 %779 }
 0x3c2   :  { %vm782_vm14 = vcmp.eq.s32.totalorder %v780_v59, 1 }
 0x3c3   :  { %vm784_vm15 = vmand %vm782_vm14, %vm65_vm4 }
 0x3c4   :  { %v786_v5 = vsel %vm784_vm15, %v4014_v36, %v516_v61 }
 0x3c5   :  { %v3091_v8 = vpack.c.bf16 %v786_v5, %v785_v3 }
 0x3c7   :  { %v3112_v30 = vunpack.c.l.bf16 %v3091_v8  ;;  %v3113_v23 = vunpack.c.h.bf16 %v3091_v8 }
 0x46d   :  { %v1121_v18 = vpop.f32.mrf.mxu1 }
 0x46e   :  { %v1130_v22 = vadd.f32 %v3108_v12, %v1121_v18 }
 0x46f   :  { %v3329_v7 = vpop.f32.mrf.mxu1 }
 0x470   :  { %3493 = vtanh.f32 %v1130_v22  ;;  %v2946_v53 = vmul.f32 -1.442695, %v1130_v22 }
 0x471   :  { %v1124_v27 = vpop.f32.mrf.mxu1 }
 0x472   :  { %v1131_v2 = vadd.f32 %v3109_v26, %v1124_v27 }
 0x473   :  { %v3330_v28 = vpop.f32.mrf.mxu1 }
 0x474   :  { %3495 = vtanh.f32 %v1131_v2  ;;  %v2947_v1 = vmul.f32 -1.442695, %v1131_v2 }
 0x475   :  { %v1175_v32 = vpop.f32.mrf.mxu1 }
 0x476   :  { %v1184_v33 = vadd.f32 %v3112_v30, %v1175_v32 }
 0x477   :  { %v3337_v42 = vpop.f32.mrf.mxu1 }
 0x478   :  { %3497 = vtanh.f32 %v1184_v33  ;;  %v2948_v58 = vmul.f32 -1.442695, %v1184_v33 }
 0x479   :  { %v1178_v47 = vpop.f32.mrf.mxu1 }
 0x47a   :  { %v1185_v48 = vadd.f32 %v3113_v23, %v1178_v47 }
 0x47b   :  { %v3338_v50 = vpop.f32.mrf.mxu1 }
 0x47c   :  { %3499 = vtanh.f32 %v1185_v48  ;;  %v2949_v59 = vmul.f32 -1.442695, %v1185_v48 }
 0x47d   :  { %v3494_v44 = vpop.eup %3493  ;;  %3501 = vpow2.f32 %v2946_v53 }
 0x47e   :  { %1218 = vrot.lane.b32.xlu0 %v3494_v44, %s3732_s5  ;;  %3503 = vpow2.f32 %v2947_v1 }
 0x47f   :  { %3505 = vpow2.f32 %v2948_v58 }
 0x480   :  { %3507 = vpow2.f32 %v2949_v59 }
 0x481   :  { %v3496_v49 = vpop.eup %3495 }
 0x482   :  { %1220 = vrot.lane.b32.xlu1 %v3496_v49, %s3732_s5 }
 0x485   :  { %v3498_v20 = vpop.eup %3497 }
 0x486   :  { %1240 = vrot.lane.b32.xlu0 %v3498_v20, %s3732_s5 }
 0x489   :  { %v3500_v57 = vpop.eup %3499 }
 0x48a   :  { %1242 = vrot.lane.b32.xlu1 %v3500_v57, %s3732_s5  ;;  %v3502_v61 = vpop.eup %3501 }
 0x48b   :  { %v1192_v3 = vadd.f32 1.0, %v3502_v61  ;;  %v3504_v5 = vpop.eup %3503 }
 0x48c   :  { %v1193_v8 = vadd.f32 1.0, %v3504_v5  ;;  %v3506_v12 = vpop.eup %3505 }
 0x48d   :  { %3509 = vrcp.f32 %v1192_v3  ;;  %v1204_v18 = vadd.f32 1.0, %v3506_v12  ;;  %v3508_v7 = vpop.eup %3507 }
 0x48e   :  { %3511 = vrcp.f32 %v1193_v8  ;;  %v1205_v26 = vadd.f32 1.0, %v3508_v7 }
 0x48f   :  { %3513 = vrcp.f32 %v1204_v18 }
 0x490   :  { %3515 = vrcp.f32 %v1205_v26 }
 0x49a   :  { %v3510_v22 = vpop.eup %3509 }
 0x49b   :  { %v3512_v28 = vpop.eup %3511  ;;  %v1214_v44 = vmul.f32 %v3510_v22, %v4033_v4 }
 0x49c   :  { %v3514_v33 = vpop.eup %3513  ;;  %v1215_v57 = vmul.f32 %v3512_v28, %v4036_v11 }
 0x49d   :  { %v3516_v47 = vpop.eup %3515  ;;  %v1236_v58 = vmul.f32 %v3514_v33, %v4039_v19 }
 0x49e   :  { %v1237_v4 = vmul.f32 %v3516_v47, %v4042_v24 }
 0x4f0   :  { %v1219_v27 = vpop.permute.xlu0 %1218 }
 0x4f1   :  { %v1224_v2 = vmul.f32 %v3510_v22, %v1219_v27 }
 0x4f3   :  { %1228 = vrot.lane.b32.xlu0 %v1224_v2, %s3732_s5 }
 0x4f4   :  { %v1221_v30 = vpop.permute.xlu1 %1220 }
 0x4f5   :  { %v1225_v32 = vmul.f32 %v3512_v28, %v1221_v30  ;;  %v746_v30 = vsel %vm744_vm1, 1, %v3730_v15 }
 0x4f7   :  { %1230 = vrot.lane.b32.xlu1 %v1225_v32, %s3732_s5 }
 0x4f8   :  { %v1241_v42 = vpop.permute.xlu0 %1240 }
 0x4f9   :  { %v1246_v23 = vmul.f32 %v3514_v33, %v1241_v42 }
 0x4fb   :  { %1250 = vrot.lane.b32.xlu0 %v1246_v23, %s3732_s5 }
 0x4fc   :  { %v1243_v48 = vpop.permute.xlu1 %1242 }
 0x4fd   :  { %v1247_v50 = vmul.f32 %v3516_v47, %v1243_v48 }
 0x4ff   :  { %1252 = vrot.lane.b32.xlu1 %v1247_v50, %s3732_s5  ;;  %v3116_v50 = vunpack.c.l.bf16 %v3967_v43 }
 0x565   :  { %v1229_v49 = vpop.permute.xlu0 %1228 }
 0x566   :  { %v4100_v20 = vadd.f32 %v1229_v49, %v1214_v44 }
 0x568   :  { %3517 = vtanh.f32 %v4100_v20 }
 0x569   :  { %v1231_v53 = vpop.permute.xlu1 %1230 }
 0x56a   :  { %v4104_v1 = vadd.f32 %v1231_v53, %v1215_v57  ;;  %v3117_v53 = vunpack.c.h.bf16 %v3967_v43 }
 0x56c   :  { %3519 = vtanh.f32 %v4104_v1 }
 0x56d   :  { %v1251_v59 = vpop.permute.xlu0 %1250 }
 0x56e   :  { %v4108_v61 = vadd.f32 %v1251_v59, %v1236_v58 }
 0x570   :  { %3521 = vtanh.f32 %v4108_v61 }
 0x571   :  { %v1253_v3 = vpop.permute.xlu1 %1252 }
 0x572   :  { %v4112_v5 = vadd.f32 %v1253_v3, %v1237_v4 }
 0x574   :  { %3523 = vtanh.f32 %v4112_v5 }
 0x575   :  { %v3518_v11 = vpop.eup %3517 }
 0x576   :  { %1262 = vrot.lane.b32.xlu0 %v3518_v11, %s3732_s5 }
 0x579   :  { %v3520_v8 = vpop.eup %3519 }
 0x57a   :  { %1264 = vrot.lane.b32.xlu1 %v3520_v8, %s3732_s5 }
 0x57d   :  { %v3522_v12 = vpop.eup %3521 }
 0x57e   :  { %1274 = vrot.lane.b32.xlu0 %v3522_v12, %s3732_s5 }
 0x581   :  { %v3524_v19 = vpop.eup %3523 }
 0x582   :  { %1276 = vrot.lane.b32.xlu1 %v3524_v19, %s3732_s5 }
 0x5e8   :  { %v1263_v18 = vpop.permute.xlu0 %1262 }
 0x5e9   :  { %v4119_v24 = vmul.f32 %v3510_v22, %v1263_v18 }
 0x5ec   :  { %v1265_v7 = vpop.permute.xlu1 %1264 }
 0x5ed   :  { %v4121_v26 = vmul.f32 %v3512_v28, %v1265_v7 }
 0x5ef   :  { %v1325_v27 = vpack.c.bf16 %v4121_v26, %v4119_v24 }
 0x5f0   :  { %v1275_v2 = vpop.permute.xlu0 %1274 }
 0x5f1   :  { %1327 = vrot.lane.b32.xlu0 %v1325_v27, %s3733_s7  ;;  %v4128_v42 = vmul.f32 %v3514_v33, %v1275_v2 }
 0x5f4   :  { %v1277_v32 = vpop.permute.xlu1 %1276 }
 0x5f5   :  { %v4130_v23 = vmul.f32 %v3516_v47, %v1277_v32  ;;  %749 = vperm.xlu0 %3441, %v746_v30  }
 0x5f7   :  { %v1379_v22 = vpack.c.bf16 %v4130_v23, %v4128_v42 }
 0x5f9   :  { %1381 = vrot.lane.b32.xlu1 %v1379_v22, %s3733_s7 }
 0x5fd   :  { %752 = vperm.xlu1 %3442, %v747_v16  }
 0x663   :  { %v1328_v28 = vpop.permute.xlu0 %1327 }
 0x664   :  { %3344 = vmatmul.mubr.msk.bf16.vlgmr.msra.gmra.mxu0 %vm4939_vm0, %v1328_v28 }
 0x665   :  { %3356 = vmatpush3.bf16.msra.mxu0 %v3864_v31  ;;  %3359 = vmatprep.mubr.msk.bf16.mxu0 %vm3731_vm3, %v3729_v14 }
 0x666   :  { %3357 = vmatprep.subr.bf16.mxu0 %v3729_v14 }
 0x669   :  { %3358 = vmatpush3.bf16.msra.mxu0 %v3874_v35 }
 0x66a   :  { %3371 = vmatprep.subr.bf16.mxu0 %v3729_v14 }
 0x66b   :  { %v1382_v17 = vpop.permute.xlu1 %1381 }
 0x66c   :  { %3352 = vmatmul.mubr.msk.bf16.vlgmr.msra.gmra.mxu1 %vm4939_vm0, %v1382_v17 }
 0x66d   :  { %3364 = vmatpush3.bf16.msra.mxu1 %v3902_v63  ;;  %3367 = vmatprep.mubr.msk.bf16.mxu1 %vm3731_vm3, %v3729_v14 }
 0x66e   :  { %3365 = vmatprep.subr.bf16.mxu1 %v3729_v14 }
 0x670   :  { %v750_v31 = vpop.permute.xlu0 %749 }
 0x671   :  { %3366 = vmatpush3.bf16.msra.mxu1 %v3909_v0  ;;  %vm754_vm5 = vcmp.eq.s32.totalorder %v750_v31, 1 }
 0x672   :  { %3379 = vmatprep.subr.bf16.mxu1 %v3729_v14  ;;  %vm756_vm6 = vmand %vm754_vm5, %vm65_vm4 }
 0x673   :  { %v758_v33 = vsel %vm756_vm6, %v4014_v36, %v3971_v45 }
 0x678   :  { %v753_v35 = vpop.permute.xlu1 %752 }
 0x679   :  { %vm755_vm7 = vcmp.eq.s32.totalorder %v753_v35, 1 }
 0x67a   :  { %vm757_vm8 = vmand %vm755_vm7, %vm65_vm4 }
 0x67b   :  { %v759_v47 = vsel %vm757_vm8, %v4014_v36, %v3979_v55 }
 0x67c   :  { %v3086_v48 = vpack.c.bf16 %v759_v47, %v758_v33 }
 0x67e   :  { %v3120_v3 = vunpack.c.l.bf16 %v3086_v48  ;;  %v3121_v12 = vunpack.c.h.bf16 %v3086_v48 }
 0x724   :  { %v1366_v44 = vpop.f32.mrf.mxu0 }
 0x725   :  { %v1375_v49 = vadd.f32 %v3116_v50, %v1366_v44 }
 0x726   :  { %v3345_v57 = vpop.f32.mrf.mxu0 }
 0x727   :  { %3525 = vtanh.f32 %v1375_v49  ;;  %v2952_v30 = vmul.f32 -1.442695, %v1375_v49 }
 0x728   :  { %v1369_v58 = vpop.f32.mrf.mxu0 }
 0x729   :  { %v1376_v59 = vadd.f32 %v3117_v53, %v1369_v58 }
 0x72a   :  { %v3346_v4 = vpop.f32.mrf.mxu0 }
 0x72b   :  { %3527 = vtanh.f32 %v1376_v59  ;;  %v2953_v32 = vmul.f32 -1.442695, %v1376_v59 }
 0x72c   :  { %v1420_v11 = vpop.f32.mrf.mxu1 }
 0x72d   :  { %v1429_v8 = vadd.f32 %v3120_v3, %v1420_v11 }
 0x72e   :  { %v3353_v45 = vpop.f32.mrf.mxu1 }
 0x72f   :  { %3529 = vtanh.f32 %v1429_v8  ;;  %v2954_v22 = vmul.f32 -1.442695, %v1429_v8 }
 0x730   :  { %v1423_v55 = vpop.f32.mrf.mxu1 }
 0x731   :  { %v1430_v19 = vadd.f32 %v3121_v12, %v1423_v55 }
 0x732   :  { %v3354_v18 = vpop.f32.mrf.mxu1 }
 0x733   :  { %3531 = vtanh.f32 %v1430_v19  ;;  %v2955_v16 = vmul.f32 -1.442695, %v1430_v19 }
 0x734   :  { %v3526_v7 = vpop.eup %3525  ;;  %3533 = vpow2.f32 %v2952_v30 }
 0x735   :  { %1463 = vrot.lane.b32.xlu0 %v3526_v7, %s3732_s5  ;;  %3535 = vpow2.f32 %v2953_v32 }
 0x736   :  { %3537 = vpow2.f32 %v2954_v22 }
 0x737   :  { %3539 = vpow2.f32 %v2955_v16 }
 0x738   :  { %v3528_v27 = vpop.eup %3527 }
 0x739   :  { %1465 = vrot.lane.b32.xlu1 %v3528_v27, %s3732_s5 }
 0x73c   :  { %v3530_v43 = vpop.eup %3529 }
 0x73d   :  { %1485 = vrot.lane.b32.xlu0 %v3530_v43, %s3732_s5 }
 0x740   :  { %v3532_v2 = vpop.eup %3531 }
 0x741   :  { %1487 = vrot.lane.b32.xlu1 %v3532_v2, %s3732_s5  ;;  %v3534_v28 = vpop.eup %3533 }
 0x742   :  { %v1437_v17 = vadd.f32 1.0, %v3534_v28  ;;  %v3536_v31 = vpop.eup %3535 }
 0x743   :  { %v1438_v35 = vadd.f32 1.0, %v3536_v31  ;;  %v3538_v33 = vpop.eup %3537 }
 0x744   :  { %3541 = vrcp.f32 %v1437_v17  ;;  %v1449_v47 = vadd.f32 1.0, %v3538_v33  ;;  %v3540_v48 = vpop.eup %3539 }
 0x745   :  { %3543 = vrcp.f32 %v1438_v35  ;;  %v1450_v50 = vadd.f32 1.0, %v3540_v48  ;;  %v4198_v48 = vld [vmem:[%s4928_s1] sm:$0xff] }
 0x746   :  { %3545 = vrcp.f32 %v1449_v47  ;;  %vm717_vm9 = vcmp.le.s32.totalorder %v4198_v48, 4  ;;  %vm690_vm15 = vcmp.le.s32.totalorder %v4198_v48, 3  ;;  %vm663_vm8 = vcmp.le.s32.totalorder %v4198_v48, 2 }
 0x747   :  { %3547 = vrcp.f32 %v1450_v50 }
 0x751   :  { %v3542_v44 = vpop.eup %3541 }
 0x752   :  { %v3544_v53 = vpop.eup %3543  ;;  %v1459_v55 = vmul.f32 %v3542_v44, %v4100_v20 }
 0x753   :  { %v3546_v4 = vpop.eup %3545  ;;  %v1460_v7 = vmul.f32 %v3544_v53, %v4104_v1 }
 0x754   :  { %v3548_v8 = vpop.eup %3547  ;;  %v1481_v2 = vmul.f32 %v3546_v4, %v4108_v61 }
 0x755   :  { %v1482_v20 = vmul.f32 %v3548_v8, %v4112_v5 }
 0x7a7   :  { %v1464_v49 = vpop.permute.xlu0 %1463 }
 0x7a8   :  { %v1469_v57 = vmul.f32 %v3542_v44, %v1464_v49  ;;  %v719_v49 = vsel %vm717_vm9, 1, %v3730_v15 }
 0x7aa   :  { %1473 = vrot.lane.b32.xlu0 %v1469_v57, %s3732_s5 }
 0x7ab   :  { %v1466_v58 = vpop.permute.xlu1 %1465 }
 0x7ac   :  { %v1470_v59 = vmul.f32 %v3544_v53, %v1466_v58 }
 0x7ae   :  { %1475 = vrot.lane.b32.xlu1 %v1470_v59, %s3732_s5  ;;  %v4212_v59 = vld [vmem:[%s4928_s1 + $0x8] sm:$0xff] }
 0x7af   :  { %v1486_v3 = vpop.permute.xlu0 %1485  ;;  %vm718_vm10 = vcmp.le.s32.totalorder %v4212_v59, 4  ;;  %vm691_vm1 = vcmp.le.s32.totalorder %v4212_v59, 3  ;;  %vm664_vm9 = vcmp.le.s32.totalorder %v4212_v59, 2 }
 0x7b0   :  { %v1491_v11 = vmul.f32 %v3546_v4, %v1486_v3  ;;  %v720_v3 = vsel %vm718_vm10, 1, %v3730_v15 }
 0x7b2   :  { %1495 = vrot.lane.b32.xlu0 %v1491_v11, %s3732_s5  ;;  %v4221_v11 = vld [vmem:[%s4926_s8 + $0x8] sm:$0xff]  }
 0x7b3   :  { %v1488_v45 = vpop.permute.xlu1 %1487 }
 0x7b4   :  { %v1492_v12 = vmul.f32 %v3548_v8, %v1488_v45 }
 0x7b6   :  { %1497 = vrot.lane.b32.xlu1 %v1492_v12, %s3732_s5 }
 0x81c   :  { %v1474_v19 = vpop.permute.xlu0 %1473 }
 0x81d   :  { %v4170_v18 = vadd.f32 %v1474_v19, %v1459_v55 }
 0x81f   :  { %3549 = vtanh.f32 %v4170_v18 }
 0x820   :  { %v1476_v27 = vpop.permute.xlu1 %1475 }
 0x821   :  { %v4174_v43 = vadd.f32 %v1476_v27, %v1460_v7 }
 0x823   :  { %3551 = vtanh.f32 %v4174_v43 }
 0x824   :  { %v1496_v30 = vpop.permute.xlu0 %1495 }
 0x825   :  { %v4178_v32 = vadd.f32 %v1496_v30, %v1481_v2 }
 0x827   :  { %3553 = vtanh.f32 %v4178_v32 }
 0x828   :  { %v1498_v22 = vpop.permute.xlu1 %1497 }
 0x829   :  { %v4182_v16 = vadd.f32 %v1498_v22, %v1482_v20  ;;  %v3125_v20 = vunpack.c.h.bf16 %v3961_v38 }
 0x82b   :  { %3555 = vtanh.f32 %v4182_v16 }
 0x82c   :  { %v3550_v1 = vpop.eup %3549 }
 0x82d   :  { %1507 = vrot.lane.b32.xlu0 %v3550_v1, %s3732_s5 }
 0x830   :  { %v3552_v28 = vpop.eup %3551 }
 0x831   :  { %1509 = vrot.lane.b32.xlu1 %v3552_v28, %s3732_s5 }
 0x834   :  { %v3554_v17 = vpop.eup %3553 }
 0x835   :  { %1519 = vrot.lane.b32.xlu0 %v3554_v17, %s3732_s5 }
 0x838   :  { %v3556_v61 = vpop.eup %3555 }
 0x839   :  { %1521 = vrot.lane.b32.xlu1 %v3556_v61, %s3732_s5 }
 0x89f   :  { %v1508_v31 = vpop.permute.xlu0 %1507 }
 0x8a0   :  { %v4189_v5 = vmul.f32 %v3542_v44, %v1508_v31 }
 0x8a3   :  { %v1510_v35 = vpop.permute.xlu1 %1509 }
 0x8a4   :  { %v4191_v33 = vmul.f32 %v3544_v53, %v1510_v35 }
 0x8a6   :  { %v1570_v47 = vpack.c.bf16 %v4191_v33, %v4189_v5 }
 0x8a7   :  { %v1520_v50 = vpop.permute.xlu0 %1519 }
 0x8a8   :  { %1572 = vrot.lane.b32.xlu0 %v1570_v47, %s3733_s7  ;;  %v4203_v44 = vmul.f32 %v3546_v4, %v1520_v50 }
 0x8ab   :  { %v1522_v57 = vpop.permute.xlu1 %1521 }
 0x8ac   :  { %v4205_v53 = vmul.f32 %v3548_v8, %v1522_v57  ;;  %722 = vperm.xlu0 %3441, %v719_v49   ;;  %v4230_v8 = vld [vmem:[%s4926_s8] sm:$0xff]  }
 0x8ae   :  { %v1624_v58 = vpack.c.bf16 %v4205_v53, %v4203_v44 }
 0x8b0   :  { %1626 = vrot.lane.b32.xlu1 %v1624_v58, %s3733_s7 }
 0x8b4   :  { %725 = vperm.xlu1 %3442, %v720_v3  }
 0x91a   :  { %v1573_v4 = vpop.permute.xlu0 %1572 }
 0x91b   :  { %3360 = vmatmul.mubr.msk.bf16.vlgmr.msra.gmra.mxu0 %vm4939_vm0, %v1573_v4 }
 0x91c   :  { %3372 = vmatpush3.bf16.msra.mxu0 %v4221_v11  ;;  %3375 = vmatprep.mubr.msk.bf16.mxu0 %vm3731_vm3, %v3729_v14 }
 0x91d   :  { %3373 = vmatprep.subr.bf16.mxu0 %v3729_v14 }
 0x920   :  { %3374 = vmatpush3.bf16.msra.mxu0 %v4230_v8 }
 0x921   :  { %3387 = vmatprep.subr.bf16.mxu0 %v3729_v14 }
 0x922   :  { %v1627_v45 = vpop.permute.xlu1 %1626 }
 0x923   :  { %3368 = vmatmul.mubr.msk.bf16.vlgmr.msra.gmra.mxu1 %vm4939_vm0, %v1627_v45 }
 0x924   :  { %3380 = vmatpush3.bf16.msra.mxu1 %v3902_v63  ;;  %3383 = vmatprep.mubr.msk.bf16.mxu1 %vm3731_vm3, %v3729_v14 }
 0x925   :  { %3381 = vmatprep.subr.bf16.mxu1 %v3729_v14 }
 0x927   :  { %v723_v12 = vpop.permute.xlu0 %722 }
 0x928   :  { %3382 = vmatpush3.bf16.msra.mxu1 %v3909_v0  ;;  %vm727_vm11 = vcmp.eq.s32.totalorder %v723_v12, 1  ;;  %v3124_v0 = vunpack.c.l.bf16 %v3961_v38 }
 0x929   :  { %3395 = vmatprep.subr.bf16.mxu1 %v3729_v14  ;;  %vm729_vm12 = vmand %vm727_vm11, %vm65_vm4 }
 0x92a   :  { %v731_v63 = vsel %vm729_vm12, %v4014_v36, %v3975_v51 }
 0x92f   :  { %v726_v55 = vpop.permute.xlu1 %725 }
 0x930   :  { %vm728_vm13 = vcmp.eq.s32.totalorder %v726_v55, 1 }
 0x931   :  { %vm730_vm14 = vmand %vm728_vm13, %vm65_vm4 }
 0x932   :  { %v732_v19 = vsel %vm730_vm14, %v4014_v36, %v3988_v62  ;;  %vm636_vm14 = vcmp.le.s32.totalorder %v4198_v48, 1 }
 0x933   :  { %v3081_v7 = vpack.c.bf16 %v732_v19, %v731_v63 }
 0x935   :  { %v3128_v17 = vunpack.c.l.bf16 %v3081_v7  ;;  %v3129_v35 = vunpack.c.h.bf16 %v3081_v7 }
 0x9db   :  { %v1611_v27 = vpop.f32.mrf.mxu0 }
 0x9dc   :  { %v1620_v2 = vadd.f32 %v3124_v0, %v1611_v27 }
 0x9dd   :  { %v3361_v30 = vpop.f32.mrf.mxu0 }
 0x9de   :  { %3557 = vtanh.f32 %v1620_v2  ;;  %v2958_v3 = vmul.f32 -1.442695, %v1620_v2 }
 0x9df   :  { %v1614_v22 = vpop.f32.mrf.mxu0 }
 0x9e0   :  { %v1621_v1 = vadd.f32 %v3125_v20, %v1614_v22 }
 0x9e1   :  { %v3362_v28 = vpop.f32.mrf.mxu0 }
 0x9e2   :  { %3559 = vtanh.f32 %v1621_v1  ;;  %v2959_v4 = vmul.f32 -1.442695, %v1621_v1 }
 0x9e3   :  { %v1665_v61 = vpop.f32.mrf.mxu1 }
 0x9e4   :  { %v1674_v31 = vadd.f32 %v3128_v17, %v1665_v61 }
 0x9e5   :  { %v3369_v51 = vpop.f32.mrf.mxu1 }
 0x9e6   :  { %3561 = vtanh.f32 %v1674_v31  ;;  %v2960_v45 = vmul.f32 -1.442695, %v1674_v31 }
 0x9e7   :  { %v1668_v62 = vpop.f32.mrf.mxu1 }
 0x9e8   :  { %v1675_v47 = vadd.f32 %v3129_v35, %v1668_v62 }
 0x9e9   :  { %v3370_v50 = vpop.f32.mrf.mxu1 }
 0x9ea   :  { %3563 = vtanh.f32 %v1675_v47  ;;  %v2961_v12 = vmul.f32 -1.442695, %v1675_v47 }
 0x9eb   :  { %v3558_v49 = vpop.eup %3557  ;;  %3565 = vpow2.f32 %v2958_v3 }
 0x9ec   :  { %1708 = vrot.lane.b32.xlu0 %v3558_v49, %s3732_s5  ;;  %3567 = vpow2.f32 %v2959_v4 }
 0x9ed   :  { %3569 = vpow2.f32 %v2960_v45 }
 0x9ee   :  { %3571 = vpow2.f32 %v2961_v12 }
 0x9ef   :  { %v3560_v57 = vpop.eup %3559 }
 0x9f0   :  { %1710 = vrot.lane.b32.xlu1 %v3560_v57, %s3732_s5 }
 0x9f3   :  { %v3562_v38 = vpop.eup %3561 }
 0x9f4   :  { %1730 = vrot.lane.b32.xlu0 %v3562_v38, %s3732_s5 }
 0x9f7   :  { %v3564_v58 = vpop.eup %3563 }
 0x9f8   :  { %1732 = vrot.lane.b32.xlu1 %v3564_v58, %s3732_s5  ;;  %v3566_v55 = vpop.eup %3565 }
 0x9f9   :  { %v1682_v63 = vadd.f32 1.0, %v3566_v55  ;;  %v3568_v19 = vpop.eup %3567 }
 0x9fa   :  { %v1683_v7 = vadd.f32 1.0, %v3568_v19  ;;  %v3570_v0 = vpop.eup %3569 }
 0x9fb   :  { %3573 = vrcp.f32 %v1682_v63  ;;  %v1694_v27 = vadd.f32 1.0, %v3570_v0  ;;  %v3572_v30 = vpop.eup %3571 }
 0x9fc   :  { %3575 = vrcp.f32 %v1683_v7  ;;  %v1695_v20 = vadd.f32 1.0, %v3572_v30 }
 0x9fd   :  { %3577 = vrcp.f32 %v1694_v27 }
 0x9fe   :  { %3579 = vrcp.f32 %v1695_v20 }
 0xa08   :  { %v3574_v2 = vpop.eup %3573 }
 0xa09   :  { %v3576_v28 = vpop.eup %3575  ;;  %v1704_v49 = vmul.f32 %v3574_v2, %v4170_v18 }
 0xa0a   :  { %v3578_v31 = vpop.eup %3577  ;;  %v1705_v58 = vmul.f32 %v3576_v28, %v4174_v43 }
 0xa0b   :  { %v3580_v62 = vpop.eup %3579  ;;  %v1726_v45 = vmul.f32 %v3578_v31, %v4178_v32 }
 0xa0c   :  { %v1727_v18 = vmul.f32 %v3580_v62, %v4182_v16 }
 0xa5e   :  { %v1709_v22 = vpop.permute.xlu0 %1708 }
 0xa5f   :  { %v1714_v1 = vmul.f32 %v3574_v2, %v1709_v22 }
 0xa61   :  { %1718 = vrot.lane.b32.xlu0 %v1714_v1, %s3732_s5 }
 0xa62   :  { %v1711_v17 = vpop.permute.xlu1 %1710 }
 0xa63   :  { %v1715_v61 = vmul.f32 %v3576_v28, %v1711_v17  ;;  %v692_v17 = vsel %vm690_vm15, 1, %v3730_v15  ;;  %vm637_vm15 = vcmp.le.s32.totalorder %v4212_v59, 1 }
 0xa64   :  { %v639_v48 = vsel %vm637_vm15, 1, %v3730_v15 }
 0xa65   :  { %1720 = vrot.lane.b32.xlu1 %v1715_v61, %s3732_s5 }
 0xa66   :  { %v1731_v51 = vpop.permute.xlu0 %1730 }
 0xa67   :  { %v1736_v35 = vmul.f32 %v3578_v31, %v1731_v51 }
 0xa69   :  { %1740 = vrot.lane.b32.xlu0 %v1736_v35, %s3732_s5 }
 0xa6a   :  { %v1733_v47 = vpop.permute.xlu1 %1732 }
 0xa6b   :  { %v1737_v50 = vmul.f32 %v3580_v62, %v1733_v47 }
 0xa6d   :  { %1742 = vrot.lane.b32.xlu1 %v1737_v50, %s3732_s5  ;;  %v4317_v50 = vld [vmem:[%s4927_s9] sm:$0xff]  }
 0xad3   :  { %v1719_v57 = vpop.permute.xlu0 %1718 }
 0xad4   :  { %v4260_v38 = vadd.f32 %v1719_v57, %v1704_v49 }
 0xad6   :  { %3581 = vtanh.f32 %v4260_v38 }
 0xad7   :  { %v1721_v3 = vpop.permute.xlu1 %1720 }
 0xad8   :  { %v4264_v4 = vadd.f32 %v1721_v3, %v1705_v58 }
 0xada   :  { %3583 = vtanh.f32 %v4264_v4 }
 0xadb   :  { %v1741_v12 = vpop.permute.xlu0 %1740 }
 0xadc   :  { %v4268_v55 = vadd.f32 %v1741_v12, %v1726_v45  ;;  %v3132_v12 = vunpack.c.l.bf16 %v3991_v10 }
 0xade   :  { %3585 = vtanh.f32 %v4268_v55 }
 0xadf   :  { %v1743_v63 = vpop.permute.xlu1 %1742 }
 0xae0   :  { %v4272_v19 = vadd.f32 %v1743_v63, %v1727_v18 }
 0xae2   :  { %3587 = vtanh.f32 %v4272_v19 }
 0xae3   :  { %v3582_v43 = vpop.eup %3581 }
 0xae4   :  { %1752 = vrot.lane.b32.xlu0 %v3582_v43, %s3732_s5 }
 0xae7   :  { %v3584_v7 = vpop.eup %3583 }
 0xae8   :  { %1754 = vrot.lane.b32.xlu1 %v3584_v7, %s3732_s5  ;;  %v3133_v7 = vunpack.c.h.bf16 %v3991_v10 }
 0xaeb   :  { %v3586_v0 = vpop.eup %3585 }
 0xaec   :  { %1764 = vrot.lane.b32.xlu0 %v3586_v0, %s3732_s5 }
 0xaef   :  { %v3588_v32 = vpop.eup %3587 }
 0xaf0   :  { %1766 = vrot.lane.b32.xlu1 %v3588_v32, %s3732_s5 }
 0xb56   :  { %v1753_v27 = vpop.permute.xlu0 %1752 }
 0xb57   :  { %v4279_v16 = vmul.f32 %v3574_v2, %v1753_v27 }
 0xb5a   :  { %v1755_v30 = vpop.permute.xlu1 %1754 }
 0xb5b   :  { %v4281_v20 = vmul.f32 %v3576_v28, %v1755_v30  ;;  %v693_v28 = vsel %vm691_vm1, 1, %v3730_v15 }
 0xb5d   :  { %v1815_v22 = vpack.c.bf16 %v4281_v20, %v4279_v16 }
 0xb5e   :  { %v1765_v1 = vpop.permute.xlu0 %1764 }
 0xb5f   :  { %1817 = vrot.lane.b32.xlu0 %v1815_v22, %s3733_s7  ;;  %v4288_v51 = vmul.f32 %v3578_v31, %v1765_v1 }
 0xb62   :  { %v1767_v61 = vpop.permute.xlu1 %1766 }
 0xb63   :  { %v4290_v35 = vmul.f32 %v3580_v62, %v1767_v61  ;;  %695 = vperm.xlu0 %3441, %v692_v17   ;;  %v4308_v62 = vld [vmem:[%s4927_s9 + $0x8] sm:$0xff]  }
 0xb65   :  { %v1869_v2 = vpack.c.bf16 %v4290_v35, %v4288_v51 }
 0xb67   :  { %1871 = vrot.lane.b32.xlu1 %v1869_v2, %s3733_s7 }
 0xb6b   :  { %698 = vperm.xlu1 %3442, %v693_v28  }
 0xbd1   :  { %v1818_v47 = vpop.permute.xlu0 %1817 }
 0xbd2   :  { %3376 = vmatmul.mubr.msk.bf16.vlgmr.msra.gmra.mxu0 %vm4939_vm0, %v1818_v47 }
 0xbd3   :  { %3388 = vmatpush3.bf16.msra.mxu0 %v4221_v11  ;;  %3391 = vmatprep.mubr.msk.bf16.mxu0 %vm3731_vm3, %v3729_v14 }
 0xbd4   :  { %3389 = vmatprep.subr.bf16.mxu0 %v3729_v14 }
 0xbd7   :  { %3390 = vmatpush3.bf16.msra.mxu0 %v4230_v8 }
 0xbd8   :  { %3403 = vmatprep.subr.bf16.mxu0 %v3729_v14 }
 0xbd9   :  { %v1872_v31 = vpop.permute.xlu1 %1871 }
 0xbda   :  { %3384 = vmatmul.mubr.msk.bf16.vlgmr.msra.gmra.mxu1 %vm4939_vm0, %v1872_v31 }
 0xbdb   :  { %3396 = vmatpush3.bf16.msra.mxu1 %v4308_v62  ;;  %3399 = vmatprep.mubr.msk.bf16.mxu1 %vm3731_vm3, %v3729_v14 }
 0xbdc   :  { %3397 = vmatprep.subr.bf16.mxu1 %v3729_v14 }
 0xbde   :  { %v696_v49 = vpop.permute.xlu0 %695 }
 0xbdf   :  { %3398 = vmatpush3.bf16.msra.mxu1 %v4317_v50  ;;  %vm700_vm2 = vcmp.eq.s32.totalorder %v696_v49, 1 }
 0xbe0   :  { %3411 = vmatprep.subr.bf16.mxu1 %v3729_v14  ;;  %vm702_vm5 = vmand %vm700_vm2, %vm65_vm4 }
 0xbe1   :  { %v704_v58 = vsel %vm702_vm5, %v4014_v36, %v3951_v25 }
 0xbe6   :  { %v699_v57 = vpop.permute.xlu1 %698 }
 0xbe7   :  { %vm701_vm6 = vcmp.eq.s32.totalorder %v699_v57, 1 }
 0xbe8   :  { %vm703_vm7 = vmand %vm701_vm6, %vm65_vm4 }
 0xbe9   :  { %v705_v3 = vsel %vm703_vm7, %v4014_v36, %v3959_v34 }
 0xbea   :  { %v3076_v45 = vpack.c.bf16 %v705_v3, %v704_v58 }
 0xbec   :  { %v3136_v30 = vunpack.c.l.bf16 %v3076_v45  ;;  %v3137_v17 = vunpack.c.h.bf16 %v3076_v45 }
 0xc92   :  { %v1856_v18 = vpop.f32.mrf.mxu0 }
 0xc93   :  { %v1865_v63 = vadd.f32 %v3132_v12, %v1856_v18 }
 0xc94   :  { %v3377_v43 = vpop.f32.mrf.mxu0 }
 0xc95   :  { %3589 = vtanh.f32 %v1865_v63  ;;  %v2964_v49 = vmul.f32 -1.442695, %v1865_v63 }
 0xc96   :  { %v1859_v0 = vpop.f32.mrf.mxu0 }
 0xc97   :  { %v1866_v32 = vadd.f32 %v3133_v7, %v1859_v0 }
 0xc98   :  { %v3378_v27 = vpop.f32.mrf.mxu0 }
 0xc99   :  { %3591 = vtanh.f32 %v1866_v32  ;;  %v2965_v57 = vmul.f32 -1.442695, %v1866_v32 }
 0xc9a   :  { %v1910_v22 = vpop.f32.mrf.mxu1 }
 0xc9b   :  { %v1919_v1 = vadd.f32 %v3136_v30, %v1910_v22 }
 0xc9c   :  { %v3385_v25 = vpop.f32.mrf.mxu1 }
 0xc9d   :  { %3593 = vtanh.f32 %v1919_v1  ;;  %v2966_v58 = vmul.f32 -1.442695, %v1919_v1 }
 0xc9e   :  { %v1913_v34 = vpop.f32.mrf.mxu1 }
 0xc9f   :  { %v1920_v61 = vadd.f32 %v3137_v17, %v1913_v34 }
 0xca0   :  { %v3386_v2 = vpop.f32.mrf.mxu1 }
 0xca1   :  { %3595 = vtanh.f32 %v1920_v61  ;;  %v2967_v3 = vmul.f32 -1.442695, %v1920_v61 }
 0xca2   :  { %v3590_v28 = vpop.eup %3589  ;;  %3597 = vpow2.f32 %v2964_v49 }
 0xca3   :  { %1953 = vrot.lane.b32.xlu0 %v3590_v28, %s3732_s5  ;;  %3599 = vpow2.f32 %v2965_v57 }
 0xca4   :  { %3601 = vpow2.f32 %v2966_v58 }
 0xca5   :  { %3603 = vpow2.f32 %v2967_v3 }
 0xca6   :  { %v3592_v47 = vpop.eup %3591 }
 0xca7   :  { %1955 = vrot.lane.b32.xlu1 %v3592_v47, %s3732_s5 }
 0xcaa   :  { %v3594_v10 = vpop.eup %3593 }
 0xcab   :  { %1975 = vrot.lane.b32.xlu0 %v3594_v10, %s3732_s5 }
 0xcae   :  { %v3596_v31 = vpop.eup %3595 }
 0xcaf   :  { %1977 = vrot.lane.b32.xlu1 %v3596_v31, %s3732_s5  ;;  %v3598_v45 = vpop.eup %3597 }
 0xcb0   :  { %v1927_v12 = vadd.f32 1.0, %v3598_v45  ;;  %v3600_v18 = vpop.eup %3599 }
 0xcb1   :  { %v1928_v43 = vadd.f32 1.0, %v3600_v18  ;;  %v3602_v7 = vpop.eup %3601 }
 0xcb2   :  { %3605 = vrcp.f32 %v1927_v12  ;;  %v1939_v0 = vadd.f32 1.0, %v3602_v7  ;;  %v3604_v27 = vpop.eup %3603 }
 0xcb3   :  { %3607 = vrcp.f32 %v1928_v43  ;;  %v1940_v30 = vadd.f32 1.0, %v3604_v27 }
 0xcb4   :  { %3609 = vrcp.f32 %v1939_v0 }
 0xcb5   :  { %3611 = vrcp.f32 %v1940_v30 }
 0xcbf   :  { %v3606_v63 = vpop.eup %3605 }
 0xcc0   :  { %v3608_v1 = vpop.eup %3607  ;;  %v1949_v31 = vmul.f32 %v3606_v63, %v4260_v38 }
 0xcc1   :  { %v3610_v34 = vpop.eup %3609  ;;  %v1950_v58 = vmul.f32 %v3608_v1, %v4264_v4 }
 0xcc2   :  { %v3612_v28 = vpop.eup %3611  ;;  %v1971_v12 = vmul.f32 %v3610_v34, %v4268_v55 }
 0xcc3   :  { %v1972_v38 = vmul.f32 %v3612_v28, %v4272_v19 }
 0xd15   :  { %v1954_v22 = vpop.permute.xlu0 %1953 }
 0xd16   :  { %v1959_v32 = vmul.f32 %v3606_v63, %v1954_v22 }
 0xd18   :  { %1963 = vrot.lane.b32.xlu0 %v1959_v32, %s3732_s5 }
 0xd19   :  { %v1956_v25 = vpop.permute.xlu1 %1955 }
 0xd1a   :  { %v1960_v17 = vmul.f32 %v3608_v1, %v1956_v25 }
 0xd1c   :  { %1965 = vrot.lane.b32.xlu1 %v1960_v17, %s3732_s5 }
 0xd1d   :  { %v1976_v61 = vpop.permute.xlu0 %1975 }
 0xd1e   :  { %v1981_v2 = vmul.f32 %v3610_v34, %v1976_v61 }
 0xd20   :  { %1985 = vrot.lane.b32.xlu0 %v1981_v2, %s3732_s5  ;;  %v665_v2 = vsel %vm663_vm8, 1, %v3730_v15 }
 0xd21   :  { %v1978_v47 = vpop.permute.xlu1 %1977 }
 0xd22   :  { %v1982_v10 = vmul.f32 %v3612_v28, %v1978_v47 }
 0xd24   :  { %1987 = vrot.lane.b32.xlu1 %v1982_v10, %s3732_s5 }
 0xd8a   :  { %v1964_v49 = vpop.permute.xlu0 %1963 }
 0xd8b   :  { %v4340_v57 = vadd.f32 %v1964_v49, %v1949_v31 }
 0xd8d   :  { %3613 = vtanh.f32 %v4340_v57 }
 0xd8e   :  { %v1966_v3 = vpop.permute.xlu1 %1965 }
 0xd8f   :  { %v4344_v45 = vadd.f32 %v1966_v3, %v1950_v58 }
 0xd91   :  { %3615 = vtanh.f32 %v4344_v45 }
 0xd92   :  { %v1986_v18 = vpop.permute.xlu0 %1985 }
 0xd93   :  { %v4348_v43 = vadd.f32 %v1986_v18, %v1971_v12 }
 0xd95   :  { %3617 = vtanh.f32 %v4348_v43 }
 0xd96   :  { %v1988_v7 = vpop.permute.xlu1 %1987 }
 0xd97   :  { %v4352_v0 = vadd.f32 %v1988_v7, %v1972_v38  ;;  %v3140_v38 = vunpack.c.l.bf16 %v3984_v60 }
 0xd99   :  { %3619 = vtanh.f32 %v4352_v0 }
 0xd9a   :  { %v3614_v4 = vpop.eup %3613 }
 0xd9b   :  { %1997 = vrot.lane.b32.xlu0 %v3614_v4, %s3732_s5 }
 0xd9e   :  { %v3616_v27 = vpop.eup %3615 }
 0xd9f   :  { %1999 = vrot.lane.b32.xlu1 %v3616_v27, %s3732_s5 }
 0xda2   :  { %v3618_v30 = vpop.eup %3617 }
 0xda3   :  { %2009 = vrot.lane.b32.xlu0 %v3618_v30, %s3732_s5  ;;  %v3141_v30 = vunpack.c.h.bf16 %v3984_v60 }
 0xda6   :  { %v3620_v55 = vpop.eup %3619 }
 0xda7   :  { %2011 = vrot.lane.b32.xlu1 %v3620_v55, %s3732_s5 }
 0xe0d   :  { %v1998_v22 = vpop.permute.xlu0 %1997 }
 0xe0e   :  { %v4359_v19 = vmul.f32 %v3606_v63, %v1998_v22 }
 0xe11   :  { %v2000_v32 = vpop.permute.xlu1 %1999 }
 0xe12   :  { %v4361_v25 = vmul.f32 %v3608_v1, %v2000_v32  ;;  %v666_v1 = vsel %vm664_vm9, 1, %v3730_v15 }
 0xe14   :  { %v2060_v17 = vpack.c.bf16 %v4361_v25, %v4359_v19 }
 0xe15   :  { %v2010_v61 = vpop.permute.xlu0 %2009 }
 0xe16   :  { %2062 = vrot.lane.b32.xlu0 %v2060_v17, %s3733_s7  ;;  %v4368_v10 = vmul.f32 %v3610_v34, %v2010_v61 }
 0xe19   :  { %v2012_v47 = vpop.permute.xlu1 %2011 }
 0xe1a   :  { %v4370_v31 = vmul.f32 %v3612_v28, %v2012_v47  ;;  %668 = vperm.xlu0 %3441, %v665_v2  }
 0xe1c   :  { %v2114_v63 = vpack.c.bf16 %v4370_v31, %v4368_v10 }
 0xe1e   :  { %2116 = vrot.lane.b32.xlu1 %v2114_v63, %s3733_s7 }
 0xe22   :  { %671 = vperm.xlu1 %3442, %v666_v1  }
 0xe88   :  { %v2063_v49 = vpop.permute.xlu0 %2062 }
 0xe89   :  { %3392 = vmatmul.mubr.msk.bf16.vlgmr.msra.gmra.mxu0 %vm4939_vm0, %v2063_v49 }
 0xe8a   :  { %3404 = vmatpush3.bf16.msra.mxu0 %v4221_v11  ;;  %3407 = vmatprep.mubr.msk.bf16.mxu0 %vm3731_vm3, %v3729_v14 }
 0xe8b   :  { %3405 = vmatprep.subr.bf16.mxu0 %v3729_v14 }
 0xe8e   :  { %3406 = vmatpush3.bf16.msra.mxu0 %v4230_v8 }
 0xe8f   :  { %3419 = vmatprep.subr.bf16.mxu0 %v3729_v14 }
 0xe90   :  { %v2117_v34 = vpop.permute.xlu1 %2116 }
 0xe91   :  { %3400 = vmatmul.mubr.msk.bf16.vlgmr.msra.gmra.mxu1 %vm4939_vm0, %v2117_v34 }
 0xe92   :  { %3412 = vmatpush3.bf16.msra.mxu1 %v4308_v62  ;;  %3415 = vmatprep.mubr.msk.bf16.mxu1 %vm3731_vm3, %v3729_v14 }
 0xe93   :  { %3413 = vmatprep.subr.bf16.mxu1 %v3729_v14 }
 0xe95   :  { %v669_v28 = vpop.permute.xlu0 %668 }
 0xe96   :  { %3414 = vmatpush3.bf16.msra.mxu1 %v4317_v50  ;;  %vm673_vm10 = vcmp.eq.s32.totalorder %v669_v28, 1 }
 0xe97   :  { %3427 = vmatprep.subr.bf16.mxu1 %v3729_v14  ;;  %vm675_vm11 = vmand %vm673_vm10, %vm65_vm4 }
 0xe98   :  { %v677_v3 = vsel %vm675_vm11, %v4014_v36, %v3955_v29 }
 0xe9d   :  { %v672_v58 = vpop.permute.xlu1 %671 }
 0xe9e   :  { %vm674_vm12 = vcmp.eq.s32.totalorder %v672_v58, 1 }
 0xe9f   :  { %vm676_vm13 = vmand %vm674_vm12, %vm65_vm4 }
 0xea0   :  { %v678_v12 = vsel %vm676_vm13, %v4014_v36, %v3965_v40 }
 0xea1   :  { %v3071_v18 = vpack.c.bf16 %v678_v12, %v677_v3 }
 0xea3   :  { %v3144_v17 = vunpack.c.l.bf16 %v3071_v18  ;;  %v3145_v47 = vunpack.c.h.bf16 %v3071_v18 }
 0xf49   :  { %v2101_v7 = vpop.f32.mrf.mxu0 }
 0xf4a   :  { %v2110_v4 = vadd.f32 %v3140_v38, %v2101_v7 }
 0xf4b   :  { %v3393_v27 = vpop.f32.mrf.mxu0 }
 0xf4c   :  { %3621 = vtanh.f32 %v2110_v4  ;;  %v2970_v58 = vmul.f32 -1.442695, %v2110_v4 }
 0xf4d   :  { %v2104_v55 = vpop.f32.mrf.mxu0 }
 0xf4e   :  { %v2111_v22 = vadd.f32 %v3141_v30, %v2104_v55 }
 0xf4f   :  { %v3394_v32 = vpop.f32.mrf.mxu0 }
 0xf50   :  { %3623 = vtanh.f32 %v2111_v22  ;;  %v2971_v3 = vmul.f32 -1.442695, %v2111_v22 }
 0xf51   :  { %v2155_v61 = vpop.f32.mrf.mxu1 }
 0xf52   :  { %v2164_v2 = vadd.f32 %v3144_v17, %v2155_v61 }
 0xf53   :  { %v3401_v29 = vpop.f32.mrf.mxu1 }
 0xf54   :  { %3625 = vtanh.f32 %v2164_v2  ;;  %v2972_v12 = vmul.f32 -1.442695, %v2164_v2 }
 0xf55   :  { %v2158_v40 = vpop.f32.mrf.mxu1 }
 0xf56   :  { %v2165_v63 = vadd.f32 %v3145_v47, %v2158_v40 }
 0xf57   :  { %v3402_v1 = vpop.f32.mrf.mxu1 }
 0xf58   :  { %3627 = vtanh.f32 %v2165_v63  ;;  %v2973_v18 = vmul.f32 -1.442695, %v2165_v63 }
 0xf59   :  { %v3622_v49 = vpop.eup %3621  ;;  %3629 = vpow2.f32 %v2970_v58 }
 0xf5a   :  { %2198 = vrot.lane.b32.xlu0 %v3622_v49, %s3732_s5  ;;  %3631 = vpow2.f32 %v2971_v3 }
 0xf5b   :  { %3633 = vpow2.f32 %v2972_v12 }
 0xf5c   :  { %3635 = vpow2.f32 %v2973_v18 }
 0xf5d   :  { %v3624_v34 = vpop.eup %3623 }
 0xf5e   :  { %2200 = vrot.lane.b32.xlu1 %v3624_v34, %s3732_s5 }
 0xf61   :  { %v3626_v60 = vpop.eup %3625 }
 0xf62   :  { %2220 = vrot.lane.b32.xlu0 %v3626_v60, %s3732_s5 }
 0xf65   :  { %v3628_v28 = vpop.eup %3627 }
 0xf66   :  { %2222 = vrot.lane.b32.xlu1 %v3628_v28, %s3732_s5  ;;  %v3630_v38 = vpop.eup %3629 }
 0xf67   :  { %v2172_v7 = vadd.f32 1.0, %v3630_v38  ;;  %v3632_v27 = vpop.eup %3631 }
 0xf68   :  { %v2173_v30 = vadd.f32 1.0, %v3632_v27  ;;  %v3634_v55 = vpop.eup %3633 }
 0xf69   :  { %3637 = vrcp.f32 %v2172_v7  ;;  %v2184_v32 = vadd.f32 1.0, %v3634_v55  ;;  %v3636_v17 = vpop.eup %3635 }
 0xf6a   :  { %3639 = vrcp.f32 %v2173_v30  ;;  %v2185_v61 = vadd.f32 1.0, %v3636_v17 }
 0xf6b   :  { %3641 = vrcp.f32 %v2184_v32 }
 0xf6c   :  { %3643 = vrcp.f32 %v2185_v61 }
 0xf76   :  { %v3638_v4 = vpop.eup %3637 }
 0xf77   :  { %v3640_v2 = vpop.eup %3639  ;;  %v2194_v58 = vmul.f32 %v3638_v4, %v4340_v57 }
 0xf78   :  { %v3642_v63 = vpop.eup %3641  ;;  %v2195_v18 = vmul.f32 %v3640_v2, %v4344_v45 }
 0xf79   :  { %v3644_v34 = vpop.eup %3643  ;;  %v2216_v27 = vmul.f32 %v3642_v63, %v4348_v43 }
 0xf7a   :  { %v2217_v57 = vmul.f32 %v3644_v34, %v4352_v0 }
 0xfcc   :  { %v2199_v29 = vpop.permute.xlu0 %2198 }
 0xfcd   :  { %v2204_v22 = vmul.f32 %v3638_v4, %v2199_v29 }
 0xfcf   :  { %2208 = vrot.lane.b32.xlu0 %v2204_v22, %s3732_s5 }
 0xfd0   :  { %v2201_v47 = vpop.permute.xlu1 %2200 }
 0xfd1   :  { %v2205_v40 = vmul.f32 %v3640_v2, %v2201_v47 }
 0xfd3   :  { %2210 = vrot.lane.b32.xlu1 %v2205_v40, %s3732_s5 }
 0xfd4   :  { %v2221_v1 = vpop.permute.xlu0 %2220 }
 0xfd5   :  { %v2226_v49 = vmul.f32 %v3642_v63, %v2221_v1 }
 0xfd7   :  { %2230 = vrot.lane.b32.xlu0 %v2226_v49, %s3732_s5 }
 0xfd8   :  { %v2223_v60 = vpop.permute.xlu1 %2222 }
 0xfd9   :  { %v2227_v28 = vmul.f32 %v3644_v34, %v2223_v60  ;;  %v638_v60 = vsel %vm636_vm14, 1, %v3730_v15 }
 0xfdb   :  { %2232 = vrot.lane.b32.xlu1 %v2227_v28, %s3732_s5 }
0x1041   :  { %v2209_v3 = vpop.permute.xlu0 %2208 }
0x1042   :  { %v4410_v12 = vadd.f32 %v2209_v3, %v2194_v58 }
0x1044   :  { %3645 = vtanh.f32 %v4410_v12 }
0x1045   :  { %v2211_v38 = vpop.permute.xlu1 %2210 }
0x1046   :  { %v4414_v7 = vadd.f32 %v2211_v38, %v2195_v18 }
0x1048   :  { %3647 = vtanh.f32 %v4414_v7 }
0x1049   :  { %v2231_v30 = vpop.permute.xlu0 %2230 }
0x104a   :  { %v4418_v55 = vadd.f32 %v2231_v30, %v2216_v27  ;;  %v3149_v27 = vunpack.c.h.bf16 %v4022_v46 }
0x104c   :  { %3649 = vtanh.f32 %v4418_v55 }
0x104d   :  { %v2233_v32 = vpop.permute.xlu1 %2232 }
0x104e   :  { %v4422_v17 = vadd.f32 %v2233_v32, %v2217_v57 }
0x1050   :  { %3651 = vtanh.f32 %v4422_v17 }
0x1051   :  { %v3646_v45 = vpop.eup %3645 }
0x1052   :  { %2242 = vrot.lane.b32.xlu0 %v3646_v45, %s3732_s5 }
0x1055   :  { %v3648_v61 = vpop.eup %3647 }
0x1056   :  { %2244 = vrot.lane.b32.xlu1 %v3648_v61, %s3732_s5 }
0x1059   :  { %v3650_v29 = vpop.eup %3649 }
0x105a   :  { %2254 = vrot.lane.b32.xlu0 %v3650_v29, %s3732_s5 }
0x105d   :  { %v3652_v43 = vpop.eup %3651 }
0x105e   :  { %2256 = vrot.lane.b32.xlu1 %v3652_v43, %s3732_s5 }
0x10c4   :  { %v2243_v22 = vpop.permute.xlu0 %2242 }
0x10c5   :  { %v4429_v0 = vmul.f32 %v3638_v4, %v2243_v22 }
0x10c8   :  { %v2245_v47 = vpop.permute.xlu1 %2244 }
0x10c9   :  { %v4431_v40 = vmul.f32 %v3640_v2, %v2245_v47 }
0x10cb   :  { %v2305_v1 = vpack.c.bf16 %v4431_v40, %v4429_v0 }
0x10cc   :  { %v2255_v49 = vpop.permute.xlu0 %2254 }
0x10cd   :  { %2307 = vrot.lane.b32.xlu0 %v2305_v1, %s3733_s7  ;;  %v4438_v58 = vmul.f32 %v3642_v63, %v2255_v49 }
0x10d0   :  { %v2257_v28 = vpop.permute.xlu1 %2256 }
0x10d1   :  { %v4440_v3 = vmul.f32 %v3644_v34, %v2257_v28  ;;  %641 = vperm.xlu0 %3441, %v638_v60  }
0x10d3   :  { %4947 = vst [vmem:[#allocation4_spill] sm:$0xff] %v4440_v3  ;;  %v2359_v4 = vpack.c.bf16 %v4440_v3, %v4438_v58 }
0x10d5   :  { %2361 = vrot.lane.b32.xlu1 %v2359_v4, %s3733_s7 }
0x10d9   :  { %644 = vperm.xlu1 %3442, %v639_v48  }
0x113f   :  { %v2308_v2 = vpop.permute.xlu0 %2307 }
0x1140   :  { %3408 = vmatmul.mubr.msk.bf16.vlgmr.msra.gmra.mxu0 %vm4939_vm0, %v2308_v2 }
0x1141   :  { %3420 = vmatpush3.bf16.msra.mxu0 %v4221_v11  ;;  %3423 = vmatprep.mubr.msk.bf16.mxu0 %vm3731_vm3, %v3729_v14 }
0x1142   :  { %3421 = vmatprep.subr.bf16.mxu0 %v3729_v14 }
0x1145   :  { %3422 = vmatpush3.bf16.msra.mxu0 %v4230_v8 }
0x1147   :  { %v2362_v63 = vpop.permute.xlu1 %2361 }
0x1148   :  { %3416 = vmatmul.mubr.msk.bf16.vlgmr.msra.gmra.mxu1 %vm4939_vm0, %v2362_v63 }
0x1149   :  { %3428 = vmatpush3.bf16.msra.mxu1 %v4308_v62  ;;  %3431 = vmatprep.mubr.msk.bf16.mxu1 %vm3731_vm3, %v3729_v14 }
0x114a   :  { %3429 = vmatprep.subr.bf16.mxu1 %v3729_v14  ;;  %v3148_v14 = vunpack.c.l.bf16 %v4022_v46 }
0x114c   :  { %v642_v59 = vpop.permute.xlu0 %641 }
0x114d   :  { %3430 = vmatpush3.bf16.msra.mxu1 %v4317_v50  ;;  %vm646_vm1 = vcmp.eq.s32.totalorder %v642_v59, 1 }
0x114e   :  { %vm648_vm2 = vmand %vm646_vm1, %vm65_vm4 }
0x114f   :  { %v650_v8 = vsel %vm648_vm2, %v4014_v36, %v3935_v6 }
0x1154   :  { %v645_v11 = vpop.permute.xlu1 %644 }
0x1155   :  { %vm647_vm5 = vcmp.eq.s32.totalorder %v645_v11, 1 }
0x1156   :  { %vm649_vm6 = vmand %vm647_vm5, %vm65_vm4 }
0x1157   :  { %v651_v62 = vsel %vm649_vm6, %v4014_v36, %v3942_v13 }
0x1158   :  { %v3066_v34 = vpack.c.bf16 %v651_v62, %v650_v8 }
0x115a   :  { %v3152_v45 = vunpack.c.l.bf16 %v3066_v34  ;;  %v3153_v43 = vunpack.c.h.bf16 %v3066_v34 }
0x1200   :  { %v2346_v50 = vpop.f32.mrf.mxu0 }
0x1201   :  { %v2355_v18 = vadd.f32 %v3148_v14, %v2346_v50 }
0x1202   :  { %v3409_v38 = vpop.f32.mrf.mxu0 }
0x1203   :  { %3653 = vtanh.f32 %v2355_v18  ;;  %v2976_v28 = vmul.f32 -1.442695, %v2355_v18 }
0x1204   :  { %v2349_v30 = vpop.f32.mrf.mxu0 }
0x1205   :  { %v2356_v57 = vadd.f32 %v3149_v27, %v2349_v30 }
0x1206   :  { %v3410_v32 = vpop.f32.mrf.mxu0 }
0x1207   :  { %3655 = vtanh.f32 %v2356_v57  ;;  %v2977_v4 = vmul.f32 -1.442695, %v2356_v57 }
0x1208   :  { %v2400_v61 = vpop.f32.mrf.mxu1 }
0x1209   :  { %v2409_v29 = vadd.f32 %v3152_v45, %v2400_v61 }
0x120a   :  { %v3417_v6 = vpop.f32.mrf.mxu1 }
0x120b   :  { %3657 = vtanh.f32 %v2409_v29  ;;  %v2978_v48 = vmul.f32 -1.442695, %v2409_v29 }
0x120c   :  { %v2403_v13 = vpop.f32.mrf.mxu1 }
0x120d   :  { %v2410_v22 = vadd.f32 %v3153_v43, %v2403_v13 }
0x120e   :  { %v3418_v47 = vpop.f32.mrf.mxu1 }
0x120f   :  { %3659 = vtanh.f32 %v2410_v22  ;;  %v2979_v2 = vmul.f32 -1.442695, %v2410_v22 }
0x1210   :  { %v3654_v1 = vpop.eup %3653  ;;  %3661 = vpow2.f32 %v2976_v28 }
0x1211   :  { %2443 = vrot.lane.b32.xlu0 %v3654_v1, %s3732_s5  ;;  %3663 = vpow2.f32 %v2977_v4 }
0x1212   :  { %3665 = vpow2.f32 %v2978_v48 }
0x1213   :  { %3667 = vpow2.f32 %v2979_v2 }
0x1214   :  { %v3656_v49 = vpop.eup %3655 }
0x1215   :  { %2445 = vrot.lane.b32.xlu1 %v3656_v49, %s3732_s5 }
0x1218   :  { %v3658_v46 = vpop.eup %3657 }
0x1219   :  { %2465 = vrot.lane.b32.xlu0 %v3658_v46, %s3732_s5 }
0x121c   :  { %v3660_v60 = vpop.eup %3659 }
0x121d   :  { %2467 = vrot.lane.b32.xlu1 %v3660_v60, %s3732_s5  ;;  %v3662_v63 = vpop.eup %3661 }
0x121e   :  { %v2417_v59 = vadd.f32 1.0, %v3662_v63  ;;  %v3664_v11 = vpop.eup %3663 }
0x121f   :  { %v2418_v8 = vadd.f32 1.0, %v3664_v11  ;;  %v3666_v62 = vpop.eup %3665 }
0x1220   :  { %3669 = vrcp.f32 %v2417_v59  ;;  %v2429_v34 = vadd.f32 1.0, %v3666_v62  ;;  %v3668_v14 = vpop.eup %3667 }
0x1221   :  { %3671 = vrcp.f32 %v2418_v8  ;;  %v2430_v50 = vadd.f32 1.0, %v3668_v14 }
0x1222   :  { %3673 = vrcp.f32 %v2429_v34 }
0x1223   :  { %3675 = vrcp.f32 %v2430_v50  ;;  %v4506_v50 = vld [vmem:[%s4928_s1] sm:$0xff] }
0x1224   :  { %vm607_vm3 = vcmp.le.s32.totalorder %v4506_v50, 0  ;;  %vm1282_vm15 = vcmp.gt.s32.totalorder %v4506_v50, 1  ;;  %vm1527_vm6 = vcmp.gt.s32.totalorder %v4506_v50, 2 }
0x122d   :  { %v3670_v18 = vpop.eup %3669 }
0x122e   :  { %v3672_v30 = vpop.eup %3671  ;;  %v2439_v22 = vmul.f32 %v3670_v18, %v4410_v12 }
0x122f   :  { %v3674_v45 = vpop.eup %3673  ;;  %v2440_v49 = vmul.f32 %v3672_v30, %v4414_v7 }
0x1230   :  { %v3676_v6 = vpop.eup %3675  ;;  %v2461_v28 = vmul.f32 %v3674_v45, %v4418_v55 }
0x1231   :  { %v2462_v12 = vmul.f32 %v3676_v6, %v4422_v17 }
0x1283   :  { %v2444_v38 = vpop.permute.xlu0 %2443 }
0x1284   :  { %v2449_v27 = vmul.f32 %v3670_v18, %v2444_v38 }
0x1286   :  { %2453 = vrot.lane.b32.xlu0 %v2449_v27, %s3732_s5  ;;  %v609_v27 = vsel %vm607_vm3, 1, %v3730_v15 }
0x1287   :  { %v2446_v57 = vpop.permute.xlu1 %2445 }
0x1288   :  { %v2450_v32 = vmul.f32 %v3672_v30, %v2446_v57 }
0x128a   :  { %2455 = vrot.lane.b32.xlu1 %v2450_v32, %s3732_s5 }
0x128b   :  { %v2466_v61 = vpop.permute.xlu0 %2465 }
0x128c   :  { %v2471_v29 = vmul.f32 %v3674_v45, %v2466_v61  ;;  %v4520_v61 = vld [vmem:[%s4928_s1 + $0x8] sm:$0xff]  ;;  %s3734_s1 = smov 96  }
0x128d   :  { %vm608_vm7 = vcmp.le.s32.totalorder %v4520_v61, 0  ;;  %vm1042_vm12 = vcmp.gt.s32.totalorder %v4520_v61, 0  ;;  %vm1283_vm1 = vcmp.gt.s32.totalorder %v4520_v61, 1  ;;  %vm1528_vm3 = vcmp.gt.s32.totalorder %v4520_v61, 2 }
0x128e   :  { %2475 = vrot.lane.b32.xlu0 %v2471_v29, %s3732_s5  ;;  %v610_v29 = vsel %vm608_vm7, 1, %v3730_v15 }
0x128f   :  { %v2468_v43 = vpop.permute.xlu1 %2467 }
0x1290   :  { %v2472_v13 = vmul.f32 %v3676_v6, %v2468_v43 }
0x1292   :  { %2477 = vrot.lane.b32.xlu1 %v2472_v13, %s3732_s5 }
0x12f8   :  { %v2454_v47 = vpop.permute.xlu0 %2453 }
0x12f9   :  { %v4478_v1 = vadd.f32 %v2454_v47, %v2439_v22 }
0x12fb   :  { %3677 = vtanh.f32 %v4478_v1 }
0x12fc   :  { %v2456_v46 = vpop.permute.xlu1 %2455 }
0x12fd   :  { %v4482_v60 = vadd.f32 %v2456_v46, %v2440_v49  ;;  %v3156_v46 = vunpack.c.l.bf16 %v4016_v37 }
0x12ff   :  { %3679 = vtanh.f32 %v4482_v60 }
0x1300   :  { %v2476_v4 = vpop.permute.xlu0 %2475 }
0x1301   :  { %v4486_v48 = vadd.f32 %v2476_v4, %v2461_v28 }
0x1303   :  { %3681 = vtanh.f32 %v4486_v48 }
0x1304   :  { %v2478_v2 = vpop.permute.xlu1 %2477 }
0x1305   :  { %v4490_v63 = vadd.f32 %v2478_v2, %v2462_v12  ;;  %v3157_v2 = vunpack.c.h.bf16 %v4016_v37 }
0x1307   :  { %3683 = vtanh.f32 %v4490_v63 }
0x1308   :  { %v3678_v7 = vpop.eup %3677 }
0x1309   :  { %2487 = vrot.lane.b32.xlu0 %v3678_v7, %s3732_s5 }
0x130c   :  { %v3680_v59 = vpop.eup %3679 }
0x130d   :  { %2489 = vrot.lane.b32.xlu1 %v3680_v59, %s3732_s5 }
0x1310   :  { %v3682_v11 = vpop.eup %3681 }
0x1311   :  { %2499 = vrot.lane.b32.xlu0 %v3682_v11, %s3732_s5 }
0x1314   :  { %v3684_v55 = vpop.eup %3683 }
0x1315   :  { %2501 = vrot.lane.b32.xlu1 %v3684_v55, %s3732_s5 }
0x137b   :  { %v2488_v8 = vpop.permute.xlu0 %2487 }
0x137c   :  { %v4497_v17 = vmul.f32 %v3670_v18, %v2488_v8 }
0x137f   :  { %v2490_v62 = vpop.permute.xlu1 %2489 }
0x1380   :  { %v4499_v34 = vmul.f32 %v3672_v30, %v2490_v62 }
0x1382   :  { %v2550_v14 = vpack.c.bf16 %v4499_v34, %v4497_v17 }
0x1383   :  { %v2500_v38 = vpop.permute.xlu0 %2499 }
0x1384   :  { %2552 = vrot.lane.b32.xlu0 %v2550_v14, %s3733_s7  ;;  %v4511_v18 = vmul.f32 %v3674_v45, %v2500_v38 }
0x1387   :  { %v2502_v57 = vpop.permute.xlu1 %2501 }
0x1388   :  { %v4513_v30 = vmul.f32 %v3676_v6, %v2502_v57  ;;  %612 = vperm.xlu0 %3441, %v609_v27  }
0x138a   :  { %4948 = vst [vmem:[#allocation5_spill] sm:$0xff] %v4513_v30  ;;  %v2604_v32 = vpack.c.bf16 %v4513_v30, %v4511_v18 }
0x138c   :  { %2606 = vrot.lane.b32.xlu1 %v2604_v32, %s3733_s7 }
0x1390   :  { %615 = vperm.xlu1 %3442, %v610_v29  }
0x13f6   :  { %v2553_v45 = vpop.permute.xlu0 %2552 }
0x13f7   :  { %3424 = vmatmul.mubr.msk.bf16.vlgmr.msra.gmra.mxu0 %vm4939_vm0, %v2553_v45 }
0x13fe   :  { %v2607_v6 = vpop.permute.xlu1 %2606 }
0x13ff   :  { %3432 = vmatmul.mubr.msk.bf16.vlgmr.msra.gmra.mxu1 %vm4939_vm0, %v2607_v6 }
0x1403   :  { %v613_v43 = vpop.permute.xlu0 %612 }
0x1404   :  { %vm617_vm8 = vcmp.eq.s32.totalorder %v613_v43, 1 }
0x1405   :  { %vm621_vm9 = vmand %vm617_vm8, %vm65_vm4 }
0x1406   :  { %v623_v22 = vsel %vm621_vm9, %v4014_v36, %v3938_v9  ;;  %vm1772_vm9 = vcmp.gt.s32.totalorder %v4506_v50, 3 }
0x140b   :  { %v616_v13 = vpop.permute.xlu1 %615 }
0x140c   :  { %vm618_vm10 = vcmp.eq.s32.totalorder %v616_v13, 1 }
0x140d   :  { %vm622_vm11 = vmand %vm618_vm10, %vm65_vm4  ;;  %vm1041_vm4 = vcmp.gt.s32.totalorder %v4506_v50, 0  ;;  %vm1773_vm10 = vcmp.gt.s32.totalorder %v4520_v61, 3 }
0x140e   :  { %v624_v47 = vsel %vm622_vm11, %v4014_v36, %v3947_v21 }
0x140f   :  { %v3061_v49 = vpack.c.bf16 %v624_v47, %v623_v22 }
0x1411   :  { %v3160_v56 = vunpack.c.l.bf16 %v3061_v49  ;;  %v3161_v62 = vunpack.c.h.bf16 %v3061_v49 }
0x14b7   :  { %v2591_v28 = vpop.f32.mrf.mxu0 }
0x14b8   :  { %v2600_v4 = vadd.f32 %v3156_v46, %v2591_v28 }
0x14b9   :  { %v3425_v12 = vpop.f32.mrf.mxu0 }
0x14ba   :  { %3685 = vtanh.f32 %v2600_v4  ;;  %v2982_v32 = vmul.f32 -1.442695, %v2600_v4 }
0x14bb   :  { %v2594_v7 = vpop.f32.mrf.mxu0 }
0x14bc   :  { %v2601_v59 = vadd.f32 %v3157_v2, %v2594_v7 }
0x14bd   :  { %v3426_v11 = vpop.f32.mrf.mxu0 }
0x14be   :  { %3687 = vtanh.f32 %v2601_v59  ;;  %v2983_v29 = vmul.f32 -1.442695, %v2601_v59 }
0x14bf   :  { %v2645_v55 = vpop.f32.mrf.mxu1 }
0x14c0   :  { %v2654_v8 = vadd.f32 %v3160_v56, %v2645_v55 }
0x14c1   :  { %v3433_v9 = vpop.f32.mrf.mxu1 }
0x14c2   :  { %3689 = vtanh.f32 %v2654_v8  ;;  %v2984_v45 = vmul.f32 -1.442695, %v2654_v8 }
0x14c3   :  { %v2648_v21 = vpop.f32.mrf.mxu1 }
0x14c4   :  { %v2655_v36 = vadd.f32 %v3161_v62, %v2648_v21  ;;  %v4554_v62 = vsub.s32 8, %v4506_v50 }
0x14c5   :  { %v3434_v14 = vpop.f32.mrf.mxu1 }
0x14c6   :  { %3691 = vtanh.f32 %v2655_v36  ;;  %v2985_v6 = vmul.f32 -1.442695, %v2655_v36  ;;  %v1045_v14 = vsel %vm1041_vm4, 1, %v3730_v15  ;;  %vm1043_vm13 = vcmp.le.s32.totalorder %v4554_v62, 0 }
0x14c7   :  { %v3686_v38 = vpop.eup %3685  ;;  %3693 = vpow2.f32 %v2982_v32  ;;  %vm1284_vm2 = vcmp.le.s32.totalorder %v4554_v62, 1  ;;  %vm1529_vm7 = vcmp.le.s32.totalorder %v4554_v62, 2  ;;  %vm1774_vm11 = vcmp.le.s32.totalorder %v4554_v62, 3 }
0x14c8   :  { %2688 = vrot.lane.b32.xlu0 %v3686_v38, %s3732_s5  ;;  %3695 = vpow2.f32 %v2983_v29  ;;  %v1286_v29 = vsel %vm1282_vm15, 1, %v3730_v15 }
0x14c9   :  { %3697 = vpow2.f32 %v2984_v45  ;;  %v1287_v45 = vsel %vm1283_vm1, 1, %v3730_v15  ;;  %vm2262_vm1 = vcmp.gt.s32.totalorder %v4506_v50, 5 }
0x14ca   :  { %3699 = vpow2.f32 %v2985_v6  ;;  %v1300_v6 = vsel %vm1284_vm2, 1, %v3730_v15  ;;  %vm2263_vm2 = vcmp.gt.s32.totalorder %v4520_v61, 5 }
0x14cb   :  { %v3688_v27 = vpop.eup %3687 }
0x14cc   :  { %2690 = vrot.lane.b32.xlu1 %v3688_v27, %s3732_s5  ;;  %v4564_v27 = vsub.s32 8, %v4520_v61 }
0x14ce   :  { %vm1044_vm14 = vcmp.le.s32.totalorder %v4564_v27, 0  ;;  %vm1285_vm5 = vcmp.le.s32.totalorder %v4564_v27, 1  ;;  %vm1530_vm8 = vcmp.le.s32.totalorder %v4564_v27, 2  ;;  %vm1775_vm4 = vcmp.le.s32.totalorder %v4564_v27, 3 }
0x14cf   :  { %v3690_v37 = vpop.eup %3689  ;;  %v1060_v32 = vsel %vm1044_vm14, 1, %v3730_v15  ;;  %vm2019_vm14 = vcmp.le.s32.totalorder %v4554_v62, 4  ;;  %vm2020_vm15 = vcmp.le.s32.totalorder %v4564_v27, 4 }
0x14d0   :  { %2710 = vrot.lane.b32.xlu0 %v3690_v37, %s3732_s5  ;;  %v1046_v37 = vsel %vm1042_vm12, 1, %v3730_v15  ;;  %vm2017_vm12 = vcmp.gt.s32.totalorder %v4506_v50, 4 }
0x14d3   :  { %v3692_v57 = vpop.eup %3691 }
0x14d4   :  { %2712 = vrot.lane.b32.xlu1 %v3692_v57, %s3732_s5  ;;  %v3694_v43 = vpop.eup %3693  ;;  %v1059_v57 = vsel %vm1043_vm13, 1, %v3730_v15  ;;  %vm2018_vm13 = vcmp.gt.s32.totalorder %v4520_v61, 4 }
0x14d5   :  { %v2662_v13 = vadd.f32 1.0, %v3694_v43  ;;  %v3696_v22 = vpop.eup %3695  ;;  %v1301_v43 = vsel %vm1285_vm5, 1, %v3730_v15  ;;  %vm2264_vm5 = vcmp.le.s32.totalorder %v4554_v62, 5 }
0x14d6   :  { %v2663_v47 = vadd.f32 1.0, %v3696_v22  ;;  %v3698_v49 = vpop.eup %3697  ;;  %v1532_v22 = vsel %vm1528_vm3, 1, %v3730_v15  ;;  %vm2507_vm3 = vcmp.gt.s32.totalorder %v4506_v50, 6 }
0x14d7   :  { %3701 = vrcp.f32 %v2662_v13  ;;  %v2674_v46 = vadd.f32 1.0, %v3698_v49  ;;  %v3700_v28 = vpop.eup %3699  ;;  %v1531_v13 = vsel %vm1527_vm6, 1, %v3730_v15  ;;  %v1546_v49 = vsel %vm1530_vm8, 1, %v3730_v15 }
0x14d8   :  { %3703 = vrcp.f32 %v2663_v47  ;;  %v2675_v12 = vadd.f32 1.0, %v3700_v28  ;;  %v1545_v47 = vsel %vm1529_vm7, 1, %v3730_v15  ;;  %v1777_v28 = vsel %vm1773_vm10, 1, %v3730_v15 }
0x14d9   :  { %3705 = vrcp.f32 %v2674_v46  ;;  %v1776_v46 = vsel %vm1772_vm9, 1, %v3730_v15  ;;  %vm2265_vm6 = vcmp.le.s32.totalorder %v4564_v27, 5  ;;  %vm2508_vm7 = vcmp.gt.s32.totalorder %v4520_v61, 6 }
0x14da   :  { %3707 = vrcp.f32 %v2675_v12  ;;  %v1790_v12 = vsel %vm1774_vm11, 1, %v3730_v15  ;;  %vm2509_vm8 = vcmp.le.s32.totalorder %v4554_v62, 6  ;;  %vm2510_vm9 = vcmp.le.s32.totalorder %v4564_v27, 6 }
0x14db   :  { %vm2752_vm10 = vcmp.gt.s32.totalorder %v4506_v50, 7  ;;  %vm2753_vm11 = vcmp.gt.s32.totalorder %v4520_v61, 7 }
0x14e4   :  { %v4541_v4 = vpop.eup %3701 }
0x14e5   :  { %v4545_v59 = vpop.eup %3703 }
0x14e6   :  { %v4549_v55 = vpop.eup %3705 }
0x14e7   :  { %4949 = vst [vmem:[#allocation6_spill] sm:$0xff] %v4549_v55  ;;  %v4557_v21 = vpop.eup %3707 }
0x14e8   :  { %4950 = vst [vmem:[#allocation7_spill] sm:$0xff] %v4557_v21 }
0x153a   :  { %v2689_v2 = vpop.permute.xlu0 %2688 }
0x153b   :  { %v2694_v7 = vmul.f32 %v4541_v4, %v2689_v2  ;;  %v1791_v2 = vsel %vm1775_vm4, 1, %v3730_v15  ;;  %vm2754_vm4 = vcmp.le.s32.totalorder %v4554_v62, 7  ;;  %v2685_v62 = vmul.f32 %v4545_v59, %v4482_v60 }
0x153d   :  { %2698 = vrot.lane.b32.xlu0 %v2694_v7, %s3732_s5  ;;  %v2021_v7 = vsel %vm2017_vm12, 1, %v3730_v15  ;;  %vm2755_vm12 = vcmp.le.s32.totalorder %v4564_v27, 7  ;;  %v2706_v27 = vmul.f32 %v4549_v55, %v4486_v48 }
0x153e   :  { %v2691_v11 = vpop.permute.xlu1 %2690 }
0x153f   :  { %v2695_v56 = vmul.f32 %v4545_v59, %v2691_v11  ;;  %v2022_v11 = vsel %vm2018_vm13, 1, %v3730_v15 }
0x1541   :  { %2700 = vrot.lane.b32.xlu1 %v2695_v56, %s3732_s5  ;;  %v2035_v56 = vsel %vm2019_vm14, 1, %v3730_v15 }
0x1542   :  { %v2711_v8 = vpop.permute.xlu0 %2710 }
0x1543   :  { %v2716_v9 = vmul.f32 %v4549_v55, %v2711_v8  ;;  %v2036_v8 = vsel %vm2020_vm15, 1, %v3730_v15 }
0x1545   :  { %2720 = vrot.lane.b32.xlu0 %v2716_v9, %s3732_s5  ;;  %v2266_v9 = vsel %vm2262_vm1, 1, %v3730_v15 }
0x1546   :  { %v2713_v36 = vpop.permute.xlu1 %2712 }
0x1547   :  { %v2717_v38 = vmul.f32 %v4557_v21, %v2713_v36  ;;  %v2267_v36 = vsel %vm2263_vm2, 1, %v3730_v15 }
0x1549   :  { %2722 = vrot.lane.b32.xlu1 %v2717_v38, %s3732_s5  ;;  %1048 = vperm.xlu0 %3441, %v1045_v14   ;;  %v2280_v14 = vsel %vm2264_vm5, 1, %v3730_v15  ;;  %v2281_v38 = vsel %vm2265_vm6, 1, %v3730_v15 }
0x154d   :  { %1051 = vperm.xlu1 %3442, %v1046_v37   ;;  %1062 = vperm.xlu0 %3441, %v1059_v57   ;;  %v2511_v37 = vsel %vm2507_vm3, 1, %v3730_v15  ;;  %v2512_v57 = vsel %vm2508_vm7, 1, %v3730_v15 }
0x1551   :  { %1065 = vperm.xlu1 %3442, %v1060_v32   ;;  %1289 = vperm.xlu0 %3441, %v1286_v29   ;;  %v2525_v32 = vsel %vm2509_vm8, 1, %v3730_v15  ;;  %v2526_v29 = vsel %vm2510_vm9, 1, %v3730_v15 }
0x1555   :  { %1292 = vperm.xlu1 %3442, %v1287_v45   ;;  %1303 = vperm.xlu0 %3441, %v1300_v6   ;;  %v2756_v45 = vsel %vm2752_vm10, 1, %v3730_v15  ;;  %v2757_v6 = vsel %vm2753_vm11, 1, %v3730_v15 }
0x1559   :  { %1306 = vperm.xlu1 %3442, %v1301_v43   ;;  %1534 = vperm.xlu0 %3441, %v1531_v13   ;;  %v2770_v43 = vsel %vm2754_vm4, 1, %v3730_v15  ;;  %v2771_v13 = vsel %vm2755_vm12, 1, %v3730_v15  ;;  %v2707_v15 = vmul.f32 %v4557_v21, %v4490_v63 }
0x155d   :  { %1537 = vperm.xlu1 %3442, %v1532_v22   ;;  %1548 = vperm.xlu0 %3441, %v1545_v47   ;;  %v2684_v22 = vmul.f32 %v4541_v4, %v4478_v1 }
0x1561   :  { %1551 = vperm.xlu1 %3442, %v1546_v49   ;;  %1779 = vperm.xlu0 %3441, %v1776_v46  }
0x1565   :  { %1782 = vperm.xlu1 %3442, %v1777_v28   ;;  %1793 = vperm.xlu0 %3441, %v1790_v12  }
0x1569   :  { %1796 = vperm.xlu1 %3442, %v1791_v2   ;;  %2024 = vperm.xlu0 %3441, %v2021_v7  }
0x156d   :  { %2027 = vperm.xlu1 %3442, %v2022_v11   ;;  %2038 = vperm.xlu0 %3441, %v2035_v56  }
0x1571   :  { %2041 = vperm.xlu1 %3442, %v2036_v8   ;;  %2269 = vperm.xlu0 %3441, %v2266_v9  }
0x1575   :  { %2272 = vperm.xlu1 %3442, %v2267_v36   ;;  %2283 = vperm.xlu0 %3441, %v2280_v14  }
0x1579   :  { %2286 = vperm.xlu1 %3442, %v2281_v38   ;;  %2514 = vperm.xlu0 %3441, %v2511_v37  }
0x157d   :  { %2517 = vperm.xlu1 %3442, %v2512_v57   ;;  %2528 = vperm.xlu0 %3441, %v2525_v32  }
0x1581   :  { %2531 = vperm.xlu1 %3442, %v2526_v29   ;;  %2759 = vperm.xlu0 %3441, %v2756_v45  }
0x1585   :  { %2762 = vperm.xlu1 %3442, %v2757_v6   ;;  %2773 = vperm.xlu0 %3441, %v2770_v43  }
0x1589   :  { %2776 = vperm.xlu1 %3442, %v2771_v13  }
0x15af   :  { %v2699_v47 = vpop.permute.xlu0 %2698 }
0x15b0   :  { %v2704_v49 = vadd.f32 %v2699_v47, %v2684_v22 }
0x15b2   :  { %3709 = vtanh.f32 %v2704_v49 }
0x15b3   :  { %v2701_v46 = vpop.permute.xlu1 %2700 }
0x15b4   :  { %v2705_v28 = vadd.f32 %v2701_v46, %v2685_v62 }
0x15b6   :  { %3711 = vtanh.f32 %v2705_v28 }
0x15b7   :  { %v2721_v12 = vpop.permute.xlu0 %2720 }
0x15b8   :  { %v2726_v2 = vadd.f32 %v2721_v12, %v2706_v27 }
0x15ba   :  { %3713 = vtanh.f32 %v2726_v2 }
0x15bb   :  { %v2723_v7 = vpop.permute.xlu1 %2722 }
0x15bc   :  { %v2727_v1 = vadd.f32 %v2723_v7, %v2707_v15 }
0x15be   :  { %3715 = vtanh.f32 %v2727_v1  ;;  %v2792_v1 = vcvt.s32.f32 %v4506_v50 }
0x15bf   :  { %v3710_v11 = vpop.eup %3709 }
0x15c0   :  { %2732 = vrot.lane.b32.xlu0 %v3710_v11, %s3732_s5  ;;  %v2793_v11 = vcvt.s32.f32 %v4520_v61  ;;  %3717 = vrcp.f32 %v2792_v1 }
0x15c2   :  { %3719 = vrcp.f32 %v2793_v11 }
0x15c3   :  { %v3712_v56 = vpop.eup %3711 }
0x15c4   :  { %2734 = vrot.lane.b32.xlu1 %v3712_v56, %s3732_s5  ;;  %v1049_v48 = vpop.permute.xlu0 %1048 }
0x15c5   :  { %vm1053_vm13 = vcmp.eq.s32.totalorder %v1049_v48, 1 }
0x15c6   :  { %v1073_v21 = vsel %vm1053_vm13, %v4049_v39, -inf }
0x15c7   :  { %v3714_v60 = vpop.eup %3713 }
0x15c8   :  { %2744 = vrot.lane.b32.xlu0 %v3714_v60, %s3732_s5  ;;  %v1052_v9 = vpop.permute.xlu1 %1051  ;;  %v1063_v36 = vpop.permute.xlu0 %1062 }
0x15c9   :  { %vm1054_vm14 = vcmp.eq.s32.totalorder %v1052_v9, 1  ;;  %vm1067_vm15 = vcmp.eq.s32.totalorder %v1063_v36, 1 }
0x15ca   :  { %v1056_v30 = vsel %vm1054_vm14, %v4051_v41, 0.0  ;;  %v1074_v50 = vsel %vm1054_vm14, %v4051_v41, -inf  ;;  %v1069_v61 = vsel %vm1067_vm15, %v4058_v52, 0.0 }
0x15cb   :  { %v3716_v8 = vpop.eup %3715 }
0x15cc   :  { %2746 = vrot.lane.b32.xlu1 %v3716_v8, %s3732_s5  ;;  %v1066_v14 = vpop.permute.xlu1 %1065  ;;  %v1290_v63 = vpop.permute.xlu0 %1289  ;;  %v1055_v8 = vsel %vm1053_vm13, %v4049_v39, 0.0 }
0x15cd   :  { %vm1294_vm1 = vcmp.eq.s32.totalorder %v1290_v63, 1  ;;  %vm1068_vm5 = vcmp.eq.s32.totalorder %v1066_v14, 1  ;;  %v1075_v14 = vsel %vm1067_vm15, %v4058_v52, -inf }
0x15ce   :  { %v1296_v48 = vsel %vm1294_vm1, %v4119_v24, 0.0  ;;  %v1314_v9 = vsel %vm1294_vm1, %v4119_v24, -inf  ;;  %v1070_v41 = vsel %vm1068_vm5, %v4060_v54, 0.0  ;;  %v4696_v1 = vsel %vm1068_vm5, %v4060_v54, -inf }
0x15cf   :  { %v1316_v55 = vmax.f32 %v1073_v21, %v1314_v9 }
0x15d0   :  { %v1293_v38 = vpop.permute.xlu1 %1292  ;;  %v1304_v37 = vpop.permute.xlu0 %1303 }
0x15d1   :  { %vm1295_vm2 = vcmp.eq.s32.totalorder %v1293_v38, 1  ;;  %vm1308_vm6 = vcmp.eq.s32.totalorder %v1304_v37, 1  ;;  %v1298_v37 = vadd.f32 %v1296_v48, %v1055_v8 }
0x15d2   :  { %v1297_v63 = vsel %vm1295_vm2, %v4121_v26, 0.0  ;;  %v1315_v38 = vsel %vm1295_vm2, %v4121_v26, -inf  ;;  %v1310_v24 = vsel %vm1308_vm6, %v4128_v42, 0.0  ;;  %v1318_v11 = vsel %vm1308_vm6, %v4128_v42, -inf }
0x15d3   :  { %v4703_v3 = vadd.f32 %v1297_v63, %v1056_v30  ;;  %v1317_v36 = vmax.f32 %v1074_v50, %v1315_v38  ;;  %v4713_v42 = vadd.f32 %v1310_v24, %v1069_v61  ;;  %v1320_v8 = vmax.f32 %v1075_v14, %v1318_v11  ;;  %v4743_v63 = vpop.eup %3717 }
0x15d4   :  { %v1307_v57 = vpop.permute.xlu1 %1306  ;;  %v4639_v32 = vpop.permute.xlu0 %1534 }
0x15d5   :  { %vm1539_vm3 = vcmp.eq.s32.totalorder %v4639_v32, 1  ;;  %vm1309_vm7 = vcmp.eq.s32.totalorder %v1307_v57, 1  ;;  %v4754_v11 = vpop.eup %3719 }
0x15d6   :  { %v1559_v52 = vsel %vm1539_vm3, %v4189_v5, -inf  ;;  %v1311_v54 = vsel %vm1309_vm7, %v4130_v23, 0.0  ;;  %v1319_v30 = vsel %vm1309_vm7, %v4130_v23, -inf  ;;  %v1541_v50 = vsel %vm1539_vm3, %v4189_v5, 0.0  ;;  %4951 = vst [vmem:[#allocation8_spill] sm:$0xff] %v4754_v11 }
0x15d7   :  { %v1561_v48 = vmax.f32 %v1316_v55, %v1559_v52  ;;  %v4727_v61 = vadd.f32 %v1311_v54, %v1070_v41  ;;  %v1321_v38 = vmax.f32 %v4696_v1, %v1319_v30  ;;  %v4746_v14 = vadd.f32 %v1541_v50, %v1298_v37 }
0x15d8   :  { %v4641_v29 = vpop.permute.xlu1 %1537  ;;  %v4643_v45 = vpop.permute.xlu0 %1548 }
0x15d9   :  { %vm1540_vm9 = vcmp.eq.s32.totalorder %v4641_v29, 1  ;;  %vm1553_vm10 = vcmp.eq.s32.totalorder %v4643_v45, 1  ;;  %v4954_v45 = vld [vmem:[#allocation5_spill] sm:$0xff] }
0x15da   :  { %v1560_v23 = vsel %vm1540_vm9, %v4191_v33, -inf  ;;  %v1563_v57 = vsel %vm1553_vm10, %v4203_v44, -inf }
0x15db   :  { %v1562_v52 = vmax.f32 %v1317_v36, %v1560_v23 }
0x15dc   :  { %v4645_v6 = vpop.permute.xlu1 %1551  ;;  %v4647_v43 = vpop.permute.xlu0 %1779 }
0x15dd   :  { %vm1784_vm8 = vcmp.eq.s32.totalorder %v4647_v43, 1  ;;  %vm1554_vm1 = vcmp.eq.s32.totalorder %v4645_v6, 1 }
0x15de   :  { %v1804_v21 = vsel %vm1784_vm8, %v4279_v16, -inf  ;;  %v1564_v23 = vsel %vm1554_vm1, %v4205_v53, -inf  ;;  %v1786_v29 = vsel %vm1784_vm8, %v4279_v16, 0.0 }
0x15df   :  { %v1806_v55 = vmax.f32 %v1561_v48, %v1804_v21  ;;  %v1565_v21 = vmax.f32 %v1320_v8, %v1563_v57 }
0x15e0   :  { %v4649_v13 = vpop.permute.xlu1 %1782  ;;  %v4651_v22 = vpop.permute.xlu0 %1793 }
0x15e1   :  { %vm1785_vm4 = vcmp.eq.s32.totalorder %v4649_v13, 1  ;;  %vm1798_vm13 = vcmp.eq.s32.totalorder %v4651_v22, 1 }
0x15e2   :  { %v1805_v41 = vsel %vm1785_vm4, %v4281_v20, -inf  ;;  %v1808_v1 = vsel %vm1798_vm13, %v4288_v51, -inf }
0x15e3   :  { %v1807_v50 = vmax.f32 %v1562_v52, %v1805_v41 }
0x15e4   :  { %v4653_v47 = vpop.permute.xlu1 %1796  ;;  %v4655_v49 = vpop.permute.xlu0 %2024 }
0x15e5   :  { %vm2029_vm11 = vcmp.eq.s32.totalorder %v4655_v49, 1  ;;  %vm1799_vm3 = vcmp.eq.s32.totalorder %v4653_v47, 1  ;;  %v4955_v49 = vld [vmem:[#allocation7_spill] sm:$0xff] }
0x15e6   :  { %v2049_v5 = vsel %vm2029_vm11, %v4359_v19, -inf  ;;  %v2031_v16 = vsel %vm2029_vm11, %v4359_v19, 0.0  ;;  %v1800_v19 = vsel %vm1798_vm13, %v4288_v51, 0.0 }
0x15e7   :  { %v2051_v54 = vmax.f32 %v1806_v55, %v2049_v5 }
0x15e8   :  { %v4657_v62 = vpop.permute.xlu1 %2027  ;;  %v4659_v46 = vpop.permute.xlu0 %2038 }
0x15e9   :  { %vm2030_vm14 = vcmp.eq.s32.totalorder %v4657_v62, 1  ;;  %vm2043_vm5 = vcmp.eq.s32.totalorder %v4659_v46, 1  ;;  %v1801_v62 = vsel %vm1799_vm3, %v4290_v35, 0.0 }
0x15ea   :  { %v2050_v37 = vsel %vm2030_vm14, %v4361_v25, -inf  ;;  %v2053_v52 = vsel %vm2043_vm5, %v4368_v10, -inf  ;;  %v2045_v51 = vsel %vm2043_vm5, %v4368_v10, 0.0 }
0x15eb   :  { %v2052_v55 = vmax.f32 %v1807_v50, %v2050_v37 }
0x15ec   :  { %v4661_v28 = vpop.permute.xlu1 %2041  ;;  %v4663_v27 = vpop.permute.xlu0 %2269 }
0x15ed   :  { %vm2274_vm12 = vcmp.eq.s32.totalorder %v4663_v27, 1 }
0x15ee   :  { %v2294_v24 = vsel %vm2274_vm12, %v4429_v0, -inf  ;;  %v2276_v6 = vsel %vm2274_vm12, %v4429_v0, 0.0 }
0x15ef   :  { %v2296_v36 = vmax.f32 %v2051_v54, %v2294_v24  ;;  %v1810_v24 = vmax.f32 %v1565_v21, %v1808_v1  ;;  %v1566_v21 = vmax.f32 %v1321_v38, %v1564_v23  ;;  %v1809_v1 = vsel %vm1799_vm3, %v4290_v35, -inf }
0x15f0   :  { %v4665_v12 = vpop.permute.xlu1 %2272  ;;  %v4667_v2 = vpop.permute.xlu0 %2283  ;;  %v1542_v38 = vsel %vm1540_vm9, %v4191_v33, 0.0  ;;  %v1555_v33 = vsel %vm1553_vm10, %v4203_v44, 0.0  ;;  %v1556_v44 = vsel %vm1554_vm1, %v4205_v53, 0.0  ;;  %v1787_v53 = vsel %vm1785_vm4, %v4281_v20, 0.0 }
0x15f1   :  { %vm4940_vm2 = vcmp.eq.s32.totalorder %v4665_v12, 1  ;;  %vm4944_vm7 = vcmp.eq.s32.totalorder %v4667_v2, 1  ;;  %v2055_v11 = vmax.f32 %v1810_v24, %v2053_v52  ;;  %v2032_v20 = vsel %vm2030_vm14, %v4361_v25, 0.0 }
0x15f2   :  { %v2295_v57 = vsel %vm4940_vm2, %v4431_v40, -inf  ;;  %vm2044_vm2 = vcmp.eq.s32.totalorder %v4661_v28, 1  ;;  %vm4957_vm11 = vcmp.eq.s32.totalorder %v4665_v12, 1  ;;  %vm4958_vm4 = vcmp.eq.s32.totalorder %v4667_v2, 1 }
0x15f3   :  { %v2297_v37 = vmax.f32 %v2052_v55, %v2295_v57  ;;  %v2054_v23 = vsel %vm2044_vm2, %v4370_v31, -inf  ;;  %v2277_v25 = vsel %vm4957_vm11, %v4431_v40, 0.0  ;;  %v2290_v10 = vsel %vm4958_vm4, %v4438_v58, 0.0 }
0x15f4   :  { %v4669_v15 = vpop.permute.xlu1 %2286  ;;  %v4671_v7 = vpop.permute.xlu0 %2514  ;;  %v2046_v35 = vsel %vm2044_vm2, %v4370_v31, 0.0  ;;  %vm2854_vm1 = vcmask 523264  }
0x15f5   :  { %vm4941_vm15 = vcmp.eq.s32.totalorder %v4671_v7, 1  ;;  %vm4956_vm10 = vcmp.eq.s32.totalorder %v4671_v7, 1 }
0x15f6   :  { %v2539_v30 = vsel %vm4941_vm15, %v4497_v17, -inf  ;;  %v2521_v0 = vsel %vm4956_vm10, %v4497_v17, 0.0 }
0x15f7   :  { %v2541_v41 = vmax.f32 %v2296_v36, %v2539_v30  ;;  %v2298_v36 = vsel %vm4944_vm7, %v4438_v58, -inf }
0x15f8   :  { %v4675_v56 = vpop.permute.xlu1 %2517  ;;  %v4677_v60 = vpop.permute.xlu0 %2528  ;;  %v2300_v24 = vmax.f32 %v2055_v11, %v2298_v36  ;;  %v1544_v11 = vadd.f32 %v1542_v38, %v4703_v3  ;;  %v1557_v36 = vadd.f32 %v1555_v33, %v4713_v42  ;;  %v1558_v42 = vadd.f32 %v1556_v44, %v4727_v61 }
0x15f9   :  { %vm4942_vm6 = vcmp.eq.s32.totalorder %v4675_v56, 1  ;;  %vm2533_vm15 = vcmp.eq.s32.totalorder %v4677_v60, 1  ;;  %vm4960_vm13 = vcmp.eq.s32.totalorder %v4675_v56, 1  ;;  %v4961_v60 = vld [vmem:[#allocation8_spill] sm:$0xff] }
0x15fa   :  { %v2540_v54 = vsel %vm4942_vm6, %v4499_v34, -inf  ;;  %vm2289_vm6 = vcmp.eq.s32.totalorder %v4669_v15, 1  ;;  %v1789_v22 = vadd.f32 %v1787_v53, %v1544_v11  ;;  %v1802_v27 = vadd.f32 %v1800_v19, %v1557_v36 }
0x15fb   :  { %v2542_v57 = vmax.f32 %v2297_v37, %v2540_v54  ;;  %v2522_v40 = vsel %vm4960_vm13, %v4499_v34, 0.0  ;;  %v2535_v58 = vsel %vm2533_vm15, %v4511_v18, 0.0  ;;  %v1803_v47 = vadd.f32 %v1801_v62, %v1558_v42 }
0x15fc   :  { %v4690_v39 = vpop.permute.xlu1 %2531  ;;  %v4701_v26 = vpop.permute.xlu0 %2759  ;;  %v2034_v46 = vadd.f32 %v2032_v20, %v1789_v22  ;;  %v2047_v7 = vadd.f32 %v2045_v51, %v1802_v27 }
0x15fd   :  { %vm4943_vm0 = vcmp.eq.s32.totalorder %v4701_v26, 1  ;;  %vm2534_vm7 = vcmp.eq.s32.totalorder %v4690_v39, 1  ;;  %vm4959_vm12 = vcmp.eq.s32.totalorder %v4701_v26, 1  ;;  %v2048_v34 = vadd.f32 %v2046_v35, %v1803_v47 }
0x15fe   :  { %v2544_v43 = vsel %vm2534_vm7, %v4954_v45, -inf  ;;  %v2279_v12 = vadd.f32 %v2277_v25, %v2034_v46  ;;  %v2292_v2 = vadd.f32 %v2290_v10, %v2047_v7 }
0x1600   :  { %v4725_v9 = vpop.permute.xlu1 %2762  ;;  %v4741_v32 = vpop.permute.xlu0 %2773  ;;  %v2524_v56 = vadd.f32 %v2522_v40, %v2279_v12 }
0x1601   :  { %vm2778_vm9 = vcmp.eq.s32.totalorder %v4741_v32, 1 }
0x1604   :  { %v4769_v48 = vpop.permute.xlu1 %2776 }
0x1605   :  { %vm2779_vm8 = vcmp.eq.s32.totalorder %v4769_v48, 1 }
0x1632   :  { %v2733_v8 = vpop.permute.xlu0 %2732 }
0x1633   :  { %v4779_v5 = vmul.f32 %v4541_v4, %v2733_v8 }
0x1635   :  { %v2784_v4 = vsel %vm4943_vm0, %v4779_v5, -inf  ;;  %vm2765_vm0 = vcmp.eq.s32.totalorder %v4725_v9, 1  ;;  %v2766_v17 = vsel %vm4959_vm12, %v4779_v5, 0.0  ;;  %v2537_v5 = vadd.f32 %v2535_v58, %v2292_v2 }
0x1636   :  { %v2786_v30 = vmax.f32 %v2541_v41, %v2784_v4  ;;  %v2735_v50 = vpop.permute.xlu1 %2734  ;;  %v1811_v41 = vmax.f32 %v1566_v21, %v1809_v1  ;;  %v4952_v4 = vld [vmem:[#allocation4_spill] sm:$0xff] }
0x1637   :  { %v4801_v8 = vmul.f32 %v4545_v59, %v2735_v50  ;;  %v2543_v59 = vsel %vm2533_vm15, %v4511_v18, -inf  ;;  %v2299_v37 = vsel %vm2289_vm6, %v4952_v4, -inf  ;;  %v2536_v18 = vsel %vm2534_vm7, %v4954_v45, 0.0 }
0x1638   :  { %2830 = vrot.lane.b32.xlu0 %v2786_v30, %s3733_s7  ;;  %v4953_v30 = vld [vmem:[#allocation6_spill] sm:$0xff]  ;;  %v2056_v21 = vmax.f32 %v1811_v41, %v2054_v23  ;;  %v2545_v1 = vmax.f32 %v2300_v24, %v2543_v59 }
0x1639   :  { %v2785_v55 = vsel %vm2765_vm0, %v4801_v8, -inf  ;;  %v2767_v31 = vsel %vm2765_vm0, %v4801_v8, 0.0  ;;  %vm4962_vm0 = vcmask 261120  }
0x163a   :  { %v2787_v52 = vmax.f32 %v2542_v57, %v2785_v55  ;;  %v2745_v54 = vpop.permute.xlu0 %2744  ;;  %v1788_v57 = vadd.f32 %v1786_v29, %v4746_v14  ;;  %v2301_v38 = vmax.f32 %v2056_v21, %v2299_v37  ;;  %vm4963_vm14 = vmmov %vm4962_vm0 }
0x163b   :  { %v2750_v50 = vmul.f32 %v4953_v30, %v2745_v54  ;;  %v2769_v54 = vadd.f32 %v2767_v31, %v2524_v56  ;;  %vm4964_vm15 = vmmov %vm4962_vm0 }
0x163c   :  { %2832 = vrot.lane.b32.xlu1 %v2787_v52, %s3733_s7  ;;  %v2033_v14 = vadd.f32 %v2031_v16, %v1788_v57  ;;  %v2546_v41 = vmax.f32 %v2301_v38, %v2544_v43  ;;  %vm4965_vm2 = vmmov %vm4962_vm0 }
0x163d   :  { %v2788_v3 = vsel %vm2778_vm9, %v2750_v50, -inf  ;;  %v2780_v28 = vsel %vm2778_vm9, %v2750_v50, 0.0 }
0x163e   :  { %v2790_v23 = vmax.f32 %v2545_v1, %v2788_v3  ;;  %v2747_v59 = vpop.permute.xlu1 %2746  ;;  %v2278_v61 = vadd.f32 %v2276_v6, %v2033_v14  ;;  %v2782_v33 = vadd.f32 %v2780_v28, %v2537_v5 }
0x163f   :  { %v2751_v55 = vmul.f32 %v4955_v49, %v2747_v59 }
0x1640   :  { %2838 = vrot.lane.b32.xlu0 %v2790_v23, %s3734_s1  ;;  %v2523_v52 = vadd.f32 %v2521_v0, %v2278_v61 }
0x1641   :  { %v2789_v13 = vsel %vm2779_vm8, %v2751_v55, -inf  ;;  %v2781_v9 = vsel %vm2779_vm8, %v2751_v55, 0.0 }
0x1642   :  { %v2791_v24 = vmax.f32 %v2546_v41, %v2789_v13  ;;  %v2768_v26 = vadd.f32 %v2766_v17, %v2523_v52 }
0x1644   :  { %2840 = vrot.lane.b32.xlu1 %v2791_v24, %s3734_s1  ;;  %2818 = vperm.xlu0 %3441, %v4743_v63   ;;  %v2291_v63 = vsel %vm2289_vm6, %v4952_v4, 0.0 }
0x1645   :  { %v2293_v15 = vadd.f32 %v2291_v63, %v2048_v34 }
0x1647   :  { %v2538_v8 = vadd.f32 %v2536_v18, %v2293_v15 }
0x1648   :  { %2823 = vperm.xlu1 %3442, %v4961_v60   ;;  %2800 = vrot.lane.b32.xlu0 %v2768_v26, %s3733_s7 }
0x1649   :  { %v2783_v32 = vadd.f32 %v2781_v9, %v2538_v8 }
0x164c   :  { %2802 = vrot.lane.b32.xlu1 %v2769_v54, %s3733_s7  ;;  %2808 = vrot.lane.b32.xlu0 %v2782_v33, %s3734_s1 }
0x1650   :  { %2810 = vrot.lane.b32.xlu1 %v2783_v32, %s3734_s1 }
0x16aa   :  { %v2831_v29 = vpop.permute.xlu0 %2830 }
0x16ae   :  { %v2833_v4 = vpop.permute.xlu1 %2832 }
0x16b2   :  { %v2839_v37 = vpop.permute.xlu0 %2838 }
0x16b3   :  { %v2844_v39 = vsel %vm4962_vm0, %v2831_v29, %v2839_v37 }
0x16b4   :  { %2848 = vrot.lane.b32.xlu0 %v2844_v39, %s3733_s7 }
0x16b6   :  { %v2841_v30 = vpop.permute.xlu1 %2840 }
0x16b7   :  { %v2845_v50 = vsel %vm4963_vm14, %v2833_v4, %v2841_v30 }
0x16b8   :  { %2850 = vrot.lane.b32.xlu1 %v2845_v50, %s3733_s7 }
0x16bf   :  { %v2819_v48 = vpop.permute.xlu0 %2818 }
0x16c3   :  { %v2824_v11 = vpop.permute.xlu1 %2823  ;;  %v2801_v21 = vpop.permute.xlu0 %2800 }
0x16c7   :  { %v2803_v1 = vpop.permute.xlu1 %2802  ;;  %v2809_v44 = vpop.permute.xlu0 %2808 }
0x16c8   :  { %v2814_v16 = vsel %vm4964_vm15, %v2801_v21, %v2809_v44 }
0x16c9   :  { %v2826_v43 = vmul.f32 %v2819_v48, %v2814_v16 }
0x16cb   :  { %v2811_v45 = vpop.permute.xlu1 %2810 }
0x16cc   :  { %v2815_v3 = vsel %vm4965_vm2, %v2803_v1, %v2811_v45 }
0x16cd   :  { %v2827_v38 = vmul.f32 %v2824_v11, %v2815_v3 }
0x1726   :  { %v2849_v36 = vpop.permute.xlu0 %2848 }
0x1727   :  { %v2855_v57 = vsel %vm2854_vm1, %v2826_v43, %v2849_v36 }
0x1728   :  { %2857 = vst [vmem:[%s4932_s10] sm:$0xff] %v2855_v57 }
0x172a   :  { %v2851_v23 = vpop.permute.xlu1 %2850 }
0x172b   :  { %v2856_v59 = vsel %vm2854_vm1, %v2827_v38, %v2851_v23 }
0x172c   :  { %2858 = vst [vmem:[%s4932_s10 + $0x8] sm:$0xff] %v2856_v59 }

</bundles_post_ra>
